<compile_context>
chip_gen: v6e
topology: v6e:2x2x1
jax: 0.10.0
libtpu: 0.0.40
codegen_flags: <defaults>
</compile_context>

<pallas_src>
import jax
import jax.numpy as jnp
from jax import lax
from jax.experimental import pallas as pl
from jax.experimental.pallas import tpu as pltpu


# ----------------------------------------------------------------------------
# helpers
# ----------------------------------------------------------------------------
def full_spec(shape):
    """BlockSpec covering the whole array (single-program call, no grid)."""
    nd = len(shape)
    return pl.BlockSpec(shape, lambda: (0,) * nd)


def rep_spec(shape):
    """BlockSpec for an array replicated across a 1-D grid (weights)."""
    nd = len(shape)
    return pl.BlockSpec(shape, lambda b: (0,) * nd)


# ----------------------------------------------------------------------------
# fused conv backbone kernel (one image per grid step)
# ----------------------------------------------------------------------------
def _make_backbone_kernel(Ho, Wo):
    HoWo = Ho * Wo

    def kernel(rows_ref, stem_w_ref, stem_b_ref, exp_w_ref, exp_b_ref,
               dw_w_ref, proj_w_ref, proj_b_ref, fc_w_ref, fc_b_ref, out_ref):
        rows = rows_ref[0]                                       # (HoWo, 27) bf16

        # --- stem: 3x3 stride-2 conv as im2col matmul (bf16 MXU, f32 acc) + ReLU6
        y0 = jnp.dot(rows, stem_w_ref[...],
                     preferred_element_type=jnp.float32) + stem_b_ref[...]
        y0 = jnp.clip(y0, 0.0, 6.0)                              # (HoWo, 8) f32

        # --- inverted residual: expand 1x1 + ReLU6
        ye = jnp.dot(y0.astype(jnp.bfloat16), exp_w_ref[...],
                     preferred_element_type=jnp.float32) + exp_b_ref[...]
        ye = jnp.clip(ye, 0.0, 6.0)                              # (HoWo, 16) f32

        # --- depthwise 3x3 (stride 1, pad 1) + ReLU6.
        # Taps built in-register: roll the flattened spatial (sublane) axis by
        # di*Wo + dj and mask out-of-image contributions (zero padding).
        n_idx = lax.broadcasted_iota(jnp.int32, (HoWo, 1), 0)
        col = n_idx % Wo
        dww = dw_w_ref[...]                                      # (9, 16) f32
        acc = jnp.zeros((HoWo, ye.shape[-1]), jnp.float32)
        for t in range(9):                                       # static unroll
            di, dj = t // 3 - 1, t % 3 - 1
            off = di * Wo + dj
            tap = ye if off == 0 else pltpu.roll(ye, shift=(-off) % HoWo, axis=0)
            mask = None
            if di == -1:
                mask = n_idx >= Wo
            elif di == 1:
                mask = n_idx < (Ho - 1) * Wo
            if dj == -1:
                mj = col >= 1
                mask = mj if mask is None else jnp.logical_and(mask, mj)
            elif dj == 1:
                mj = col <= Wo - 2
                mask = mj if mask is None else jnp.logical_and(mask, mj)
            contrib = tap * dww[t:t + 1, :]
            if mask is not None:
                contrib = jnp.where(mask, contrib, 0.0)
            acc = acc + contrib
        yd = jnp.clip(acc, 0.0, 6.0)                             # (HoWo, 16) f32

        # --- project 1x1 (linear bottleneck) + residual + global average pool.
        # GAP is linear and the projection/residual have no activation, so the
        # spatial mean commutes with them: reduce first, then project.
        yd_mean = jnp.mean(yd, axis=0, keepdims=True)            # (1, 16)
        y0_mean = jnp.mean(y0, axis=0, keepdims=True)            # (1, 8)
        feat = (jnp.dot(yd_mean.astype(jnp.bfloat16), proj_w_ref[...],
                        preferred_element_type=jnp.float32)
                + proj_b_ref[...] + y0_mean)                     # (1, 8)

        # --- 400-way classifier, columns padded to 512 for lane-dense stores
        logits = jnp.dot(feat.astype(jnp.bfloat16), fc_w_ref[...],
                         preferred_element_type=jnp.float32) + fc_b_ref[...]
        out_ref[0] = logits                                      # (1, 512)

    return kernel


def fused_backbone(rows, cp, Ho, Wo):
    """rows: (B, Ho*Wo, 27) bf16 im2col rows. Returns (B, N_pad) f32 logits."""
    B, HoWo, K = rows.shape
    n_pad = cp["fc_w"].shape[1]                                  # 512
    wargs = (cp["stem_w"], cp["stem_b"], cp["exp_w"], cp["exp_b"],
             cp["dw_w"], cp["proj_w"], cp["proj_b"], cp["fc_w"], cp["fc_b"])
    out = pl.pallas_call(
        _make_backbone_kernel(Ho, Wo),
        out_shape=jax.ShapeDtypeStruct((B, 1, n_pad), jnp.float32),
        grid=(B,),
        in_specs=[pl.BlockSpec((1, HoWo, K), lambda b: (b, 0, 0))]
                 + [rep_spec(w.shape) for w in wargs],
        out_specs=pl.BlockSpec((1, 1, n_pad), lambda b: (b, 0, 0)),
        compiler_params=pltpu.CompilerParams(
            dimension_semantics=("parallel",)),
    )(rows, *wargs)
    return out.reshape(B, n_pad)


# ----------------------------------------------------------------------------
# 2-layer GRU kernel (torch.nn.GRU semantics, batch_first=False)
# ----------------------------------------------------------------------------
def _make_gru_kernel(L, N, H):
    def kernel(x_ref,
               wih0_ref, whh0_ref, bih0_ref, bhh0_ref,
               wih1_ref, whh1_ref, bih1_ref, bhh1_ref,
               out_ref, h1_ref):
        # Per-gate weights are separate leading-axis blocks: w[0]=r, w[1]=z, w[2]=n.

        def gate_inputs(x2, wih_ref, bih_ref):
            # Hoisted input->hidden projection for ALL timesteps at once.
            return [jnp.dot(x2, wih_ref[g], preferred_element_type=jnp.float32)
                    + bih_ref[g] for g in range(3)]

        def recur(gates, whh_ref, bhh_ref, dst_ref):
            gr, gz, gn = gates
            h = jnp.zeros((N, H), jnp.float32)
            for t in range(L):                                   # static unroll
                lo = t * N
                hr = jnp.dot(h, whh_ref[0], preferred_element_type=jnp.float32) + bhh_ref[0]
                hz = jnp.dot(h, whh_ref[1], preferred_element_type=jnp.float32) + bhh_ref[1]
                hn = jnp.dot(h, whh_ref[2], preferred_element_type=jnp.float32) + bhh_ref[2]
                r = jax.nn.sigmoid(gr[lo:lo + N, :] + hr)
                z = jax.nn.sigmoid(gz[lo:lo + N, :] + hz)
                n = jnp.tanh(gn[lo:lo + N, :] + r * hn)
                h = (1.0 - z) * n + z * h
                dst_ref[lo:lo + N, :] = h

        # layer 0: store all timestep outputs into VMEM scratch
        recur(gate_inputs(x_ref[...], wih0_ref, bih0_ref), whh0_ref, bhh0_ref, h1_ref)
        # layer 1: consume the whole layer-0 sequence (hoisted again)
        recur(gate_inputs(h1_ref[...], wih1_ref, bih1_ref), whh1_ref, bhh1_ref, out_ref)

    return kernel


def gru_2layer(x2, p, L, N):
    """x2: (L*N, I) f32, rows ordered (l-major, n). Returns (L*N, H) f32."""
    H = p["gru0_whh"].shape[-1]
    args = (x2,
            p["gru0_wih"], p["gru0_whh"], p["gru0_bih"], p["gru0_bhh"],
            p["gru1_wih"], p["gru1_whh"], p["gru1_bih"], p["gru1_bhh"])
    return pl.pallas_call(
        _make_gru_kernel(L, N, H),
        out_shape=jax.ShapeDtypeStruct((L * N, H), jnp.float32),
        in_specs=[full_spec(a.shape) for a in args],
        out_specs=full_spec((L * N, H)),
        scratch_shapes=[pltpu.VMEM((L * N, H), jnp.float32)],
    )(*args)


# ----------------------------------------------------------------------------
# plain-JAX glue: im2col for the stem conv (data movement only)
# ----------------------------------------------------------------------------
def im2col_stem(x, k=3, stride=2, pad=1):
    """NCHW -> (B, Ho*Wo, Cin*k*k) bf16 rows, row-major over (ho, wo),
    feature order = channel-major then tap (t = kh*3 + kw)."""
    B, C, H, W = x.shape
    xp = jnp.pad(x, ((0, 0), (0, 0), (pad, pad), (pad, pad)))
    Ho = (H + 2 * pad - k) // stride + 1
    Wo = (W + 2 * pad - k) // stride + 1
    pats = []
    for di in range(k):
        for dj in range(k):
            pats.append(xp[:, :, di:di + stride * Ho:stride,
                              dj:dj + stride * Wo:stride])
    p = jnp.stack(pats, axis=2)                       # (B, C, 9, Ho, Wo)
    p = jnp.transpose(p, (0, 3, 4, 1, 2))             # (B, Ho, Wo, C, 9)
    rows = p.reshape(B, Ho * Wo, C * k * k).astype(jnp.bfloat16)
    return rows, Ho, Wo


# ----------------------------------------------------------------------------
# full forward pass
# ----------------------------------------------------------------------------
def mobile_gru_forward(x, p):
    B = x.shape[0]
    bf16 = jnp.bfloat16

    # im2col rows for the stem conv (only large HBM read, in bf16)
    rows, Ho, Wo = im2col_stem(x)

    # kernel-ready conv weights: matmul weights bf16, biases f32,
    # FC padded up to the next multiple of 128 output columns (400 -> 512).
    n_fc = p["fc_w"].shape[1]
    fc_pad = (-n_fc) % 128
    conv_params = dict(
        stem_w=p["stem_w"].astype(bf16), stem_b=p["stem_b"],
        exp_w=p["exp_w"].astype(bf16),   exp_b=p["exp_b"],
        dw_w=p["dw_w"],
        proj_w=p["proj_w"].astype(bf16), proj_b=p["proj_b"],
        fc_w=jnp.pad(p["fc_w"], ((0, 0), (0, fc_pad))).astype(bf16),
        fc_b=jnp.pad(p["fc_b"], ((0, 0), (0, fc_pad))),
    )

    logits = fused_backbone(rows, conv_params, Ho, Wo)   # (B, 512)
    logits = logits[:, :n_fc]                            # drop lane padding -> (B, 400)

    # ---- reshape -> 2-layer GRU -> reshape (exact module semantics) ----
    # torch.nn.GRU sees (L=B, N=16, input=25); rows here are (l*16 + n).
    seq = logits.reshape(B * 16, 25)
    gru_out = gru_2layer(seq, p, L=B, N=16)              # (B*16, 16)
    return gru_out.reshape(B, 256)


# ----------------------------------------------------------------------------
# deterministic parameter init + run
# ----------------------------------------------------------------------------
def init_params(key):
    ks = jax.random.split(key, 17)

    def nrm(k, shape, scale=0.1):
        return (jax.random.normal(k, shape) * scale).astype(jnp.float32)

    return dict(
        # backbone (BN folded)
        stem_w=nrm(ks[0], (27, 8)),        # (Cin*3*3, Cout)
        stem_b=nrm(ks[1], (1, 8)),
        exp_w=nrm(ks[2], (8, 16)),
        exp_b=nrm(ks[3], (1, 16)),
        dw_w=nrm(ks[4], (9, 16)),          # (k*k, C), tap t = kh*3 + kw
        proj_w=nrm(ks[5], (16, 8)),
        proj_b=nrm(ks[6], (1, 8)),
        fc_w=nrm(ks[7], (8, 400)),
        fc_b=nrm(ks[8], (1, 400)),
        # GRU layer 0 (input 25, hidden 16): per-gate [r, z, n] leading blocks
        gru0_wih=nrm(ks[9],  (3, 25, 16)),
        gru0_whh=nrm(ks[10], (3, 16, 16)),
        gru0_bih=nrm(ks[11], (3, 1, 16)),
        gru0_bhh=nrm(ks[12], (3, 1, 16)),
        # GRU layer 1 (input 16, hidden 16)
        gru1_wih=nrm(ks[13], (3, 16, 16)),
        gru1_whh=nrm(ks[14], (3, 16, 16)),
        gru1_bih=nrm(ks[15], (3, 1, 16)),
        gru1_bhh=nrm(ks[16], (3, 1, 16)),
    )


if __name__ == "__main__":
    key = jax.random.PRNGKey(0)
    params = init_params(key)
    # small NCHW image batch (sample_size scaled down from 160 -> 32 for speed)
    x = jax.random.normal(jax.random.fold_in(key, 1), (2, 3, 32, 32),
                          dtype=jnp.float32)

    fwd = jax.jit(lambda inp: mobile_gru_forward(inp, params))
    out = jax.block_until_ready(fwd(x))

    assert out.shape == (2, 256), out.shape
    assert bool(jnp.all(jnp.isfinite(out)))
    print("KERNEL_OK")
</pallas_src>

<mosaic_0001>
module attributes {stable_mosaic.version = 11 : i64} {
  func.func @kernel(%arg0: i32, %arg1: memref<1x256x27xbf16, #tpu.memory_space<vmem>>, %arg2: memref<27x8xbf16, #tpu.memory_space<vmem>>, %arg3: memref<1x8xf32, #tpu.memory_space<vmem>>, %arg4: memref<8x16xbf16, #tpu.memory_space<vmem>>, %arg5: memref<1x16xf32, #tpu.memory_space<vmem>>, %arg6: memref<9x16xf32, #tpu.memory_space<vmem>>, %arg7: memref<16x8xbf16, #tpu.memory_space<vmem>>, %arg8: memref<1x8xf32, #tpu.memory_space<vmem>>, %arg9: memref<8x512xbf16, #tpu.memory_space<vmem>>, %arg10: memref<1x512xf32, #tpu.memory_space<vmem>>, %arg11: memref<1x1x512xf32, #tpu.memory_space<vmem>>) attributes {dimension_semantics = [#tpu.dimension_semantics<parallel>], iteration_bounds = array<i64: 2>, scalar_prefetch = 0 : i64, scratch_operands = 0 : i64, tpu.core_type = #tpu.core_type<tc>, window_params = [{transform_indices = @transform_0, window_bounds = array<i64: 1, 256, 27>}, {pipeline_mode = #tpu.pipeline_mode<synchronous>, transform_indices = @transform_1, window_bounds = array<i64: 27, 8>}, {pipeline_mode = #tpu.pipeline_mode<synchronous>, transform_indices = @transform_2, window_bounds = array<i64: 1, 8>}, {pipeline_mode = #tpu.pipeline_mode<synchronous>, transform_indices = @transform_3, window_bounds = array<i64: 8, 16>}, {pipeline_mode = #tpu.pipeline_mode<synchronous>, transform_indices = @transform_4, window_bounds = array<i64: 1, 16>}, {pipeline_mode = #tpu.pipeline_mode<synchronous>, transform_indices = @transform_5, window_bounds = array<i64: 9, 16>}, {pipeline_mode = #tpu.pipeline_mode<synchronous>, transform_indices = @transform_6, window_bounds = array<i64: 16, 8>}, {pipeline_mode = #tpu.pipeline_mode<synchronous>, transform_indices = @transform_7, window_bounds = array<i64: 1, 8>}, {pipeline_mode = #tpu.pipeline_mode<synchronous>, transform_indices = @transform_8, window_bounds = array<i64: 8, 512>}, {pipeline_mode = #tpu.pipeline_mode<synchronous>, transform_indices = @transform_9, window_bounds = array<i64: 1, 512>}, {transform_indices = @transform_10, window_bounds = array<i64: 1, 1, 512>}]} {
    %c0 = arith.constant 0 : index
    %c0_0 = arith.constant 0 : index
    %c0_1 = arith.constant 0 : index
    %0 = vector.load %arg1[%c0, %c0_0, %c0_1] : memref<1x256x27xbf16, #tpu.memory_space<vmem>>, vector<1x256x27xbf16>
    %1 = vector.shape_cast %0 : vector<1x256x27xbf16> to vector<256x27xbf16>
    %c0_2 = arith.constant 0 : index
    %c0_3 = arith.constant 0 : index
    %2 = vector.load %arg2[%c0_2, %c0_3] : memref<27x8xbf16, #tpu.memory_space<vmem>>, vector<27x8xbf16>
    %cst = arith.constant dense<0.000000e+00> : vector<256x8xf32>
    %3 = tpu.matmul %1, %2, %cst {dimension_numbers = #tpu.dot_dimension_numbers<[1], [0], [0], [1], [0, 0, 1, 1], [], []>} : vector<256x27xbf16>, vector<27x8xbf16>, vector<256x8xf32> -> vector<256x8xf32>
    %c0_4 = arith.constant 0 : index
    %c0_5 = arith.constant 0 : index
    %4 = vector.load %arg3[%c0_4, %c0_5] : memref<1x8xf32, #tpu.memory_space<vmem>>, vector<1x8xf32>
    %5 = vector.broadcast %4 : vector<1x8xf32> to vector<256x8xf32>
    %6 = arith.addf %3, %5 : vector<256x8xf32>
    %cst_6 = arith.constant 0.000000e+00 : f32
    %cst_7 = arith.constant 6.000000e+00 : f32
    %7 = vector.broadcast %cst_6 : f32 to vector<256x8xf32>
    %8 = arith.maximumf %7, %6 : vector<256x8xf32>
    %9 = vector.broadcast %cst_7 : f32 to vector<256x8xf32>
    %10 = arith.minimumf %9, %8 : vector<256x8xf32>
    %11 = arith.truncf %10 : vector<256x8xf32> to vector<256x8xbf16>
    %c0_8 = arith.constant 0 : index
    %c0_9 = arith.constant 0 : index
    %12 = vector.load %arg4[%c0_8, %c0_9] : memref<8x16xbf16, #tpu.memory_space<vmem>>, vector<8x16xbf16>
    %cst_10 = arith.constant dense<0.000000e+00> : vector<256x16xf32>
    %13 = tpu.matmul %11, %12, %cst_10 {dimension_numbers = #tpu.dot_dimension_numbers<[1], [0], [0], [1], [0, 0, 1, 1], [], []>} : vector<256x8xbf16>, vector<8x16xbf16>, vector<256x16xf32> -> vector<256x16xf32>
    %c0_11 = arith.constant 0 : index
    %c0_12 = arith.constant 0 : index
    %14 = vector.load %arg5[%c0_11, %c0_12] : memref<1x16xf32, #tpu.memory_space<vmem>>, vector<1x16xf32>
    %15 = vector.broadcast %14 : vector<1x16xf32> to vector<256x16xf32>
    %16 = arith.addf %13, %15 : vector<256x16xf32>
    %cst_13 = arith.constant 0.000000e+00 : f32
    %cst_14 = arith.constant 6.000000e+00 : f32
    %17 = vector.broadcast %cst_13 : f32 to vector<256x16xf32>
    %18 = arith.maximumf %17, %16 : vector<256x16xf32>
    %19 = vector.broadcast %cst_14 : f32 to vector<256x16xf32>
    %20 = arith.minimumf %19, %18 : vector<256x16xf32>
    %21 = tpu.iota {dimensions = array<i32: 0>} : vector<256x1xi32>
    %c16_i32 = arith.constant 16 : i32
    %c0_i32 = arith.constant 0 : i32
    %22 = arith.cmpi eq, %c16_i32, %c0_i32 : i32
    %c1_i32 = arith.constant 1 : i32
    %23 = arith.select %22, %c1_i32, %c16_i32 : i32
    %24 = vector.broadcast %23 : i32 to vector<256x1xi32>
    %25 = arith.remsi %21, %24 : vector<256x1xi32>
    %c0_i32_15 = arith.constant 0 : i32
    %26 = vector.broadcast %c0_i32_15 : i32 to vector<256x1xi32>
    %27 = arith.cmpi ne, %25, %26 : vector<256x1xi32>
    %c0_i32_16 = arith.constant 0 : i32
    %28 = vector.broadcast %c0_i32_16 : i32 to vector<256x1xi32>
    %29 = arith.cmpi slt, %25, %28 : vector<256x1xi32>
    %c0_i32_17 = arith.constant 0 : i32
    %30 = arith.cmpi slt, %23, %c0_i32_17 : i32
    %31 = vector.broadcast %30 : i1 to vector<256x1xi1>
    %32 = vector.broadcast %31 : vector<256x1xi1> to vector<256x1xi1>
    %33 = arith.xori %29, %32 : vector<256x1xi1>
    %34 = arith.andi %33, %27 : vector<256x1xi1>
    %35 = vector.broadcast %23 : i32 to vector<256x1xi32>
    %36 = arith.addi %25, %35 : vector<256x1xi32>
    %37 = arith.select %34, %36, %25 : vector<256x1xi1>, vector<256x1xi32>
    %c0_18 = arith.constant 0 : index
    %c0_19 = arith.constant 0 : index
    %38 = vector.load %arg6[%c0_18, %c0_19] : memref<9x16xf32, #tpu.memory_space<vmem>>, vector<9x16xf32>
    %cst_20 = arith.constant 0.000000e+00 : f32
    %39 = vector.broadcast %cst_20 : f32 to vector<256x16xf32>
    %c17_i32 = arith.constant 17 : i32
    %40 = tpu.dynamic_rotate %20 by %c17_i32 dim 0 : vector<256x16xf32>, i32 -> vector<256x16xf32>
    %c16_i32_21 = arith.constant 16 : i32
    %41 = vector.broadcast %c16_i32_21 : i32 to vector<256x1xi32>
    %42 = arith.cmpi sge, %21, %41 : vector<256x1xi32>
    %c1_i32_22 = arith.constant 1 : i32
    %43 = vector.broadcast %c1_i32_22 : i32 to vector<256x1xi32>
    %44 = arith.cmpi sge, %37, %43 : vector<256x1xi32>
    %45 = arith.andi %42, %44 : vector<256x1xi1>
    %46 = vector.extract_strided_slice %38 {offsets = [0, 0], sizes = [1, 16], strides = [1, 1]} : vector<9x16xf32> to vector<1x16xf32>
    %47 = vector.broadcast %46 : vector<1x16xf32> to vector<256x16xf32>
    %48 = arith.mulf %40, %47 : vector<256x16xf32>
    %cst_23 = arith.constant 0.000000e+00 : f32
    %49 = vector.shape_cast %45 : vector<256x1xi1> to vector<256x1xi1>
    %50 = vector.broadcast %49 : vector<256x1xi1> to vector<256x16xi1>
    %51 = vector.broadcast %cst_23 : f32 to vector<256x16xf32>
    %52 = arith.select %50, %48, %51 : vector<256x16xi1>, vector<256x16xf32>
    %53 = arith.addf %39, %52 : vector<256x16xf32>
    %c16_i32_24 = arith.constant 16 : i32
    %54 = tpu.dynamic_rotate %20 by %c16_i32_24 dim 0 : vector<256x16xf32>, i32 -> vector<256x16xf32>
    %c16_i32_25 = arith.constant 16 : i32
    %55 = vector.broadcast %c16_i32_25 : i32 to vector<256x1xi32>
    %56 = arith.cmpi sge, %21, %55 : vector<256x1xi32>
    %57 = vector.extract_strided_slice %38 {offsets = [1, 0], sizes = [1, 16], strides = [1, 1]} : vector<9x16xf32> to vector<1x16xf32>
    %58 = vector.broadcast %57 : vector<1x16xf32> to vector<256x16xf32>
    %59 = arith.mulf %54, %58 : vector<256x16xf32>
    %cst_26 = arith.constant 0.000000e+00 : f32
    %60 = vector.shape_cast %56 : vector<256x1xi1> to vector<256x1xi1>
    %61 = vector.broadcast %60 : vector<256x1xi1> to vector<256x16xi1>
    %62 = vector.broadcast %cst_26 : f32 to vector<256x16xf32>
    %63 = arith.select %61, %59, %62 : vector<256x16xi1>, vector<256x16xf32>
    %64 = arith.addf %53, %63 : vector<256x16xf32>
    %c15_i32 = arith.constant 15 : i32
    %65 = tpu.dynamic_rotate %20 by %c15_i32 dim 0 : vector<256x16xf32>, i32 -> vector<256x16xf32>
    %c16_i32_27 = arith.constant 16 : i32
    %66 = vector.broadcast %c16_i32_27 : i32 to vector<256x1xi32>
    %67 = arith.cmpi sge, %21, %66 : vector<256x1xi32>
    %c14_i32 = arith.constant 14 : i32
    %68 = vector.broadcast %c14_i32 : i32 to vector<256x1xi32>
    %69 = arith.cmpi sle, %37, %68 : vector<256x1xi32>
    %70 = arith.andi %67, %69 : vector<256x1xi1>
    %71 = vector.extract_strided_slice %38 {offsets = [2, 0], sizes = [1, 16], strides = [1, 1]} : vector<9x16xf32> to vector<1x16xf32>
    %72 = vector.broadcast %71 : vector<1x16xf32> to vector<256x16xf32>
    %73 = arith.mulf %65, %72 : vector<256x16xf32>
    %cst_28 = arith.constant 0.000000e+00 : f32
    %74 = vector.shape_cast %70 : vector<256x1xi1> to vector<256x1xi1>
    %75 = vector.broadcast %74 : vector<256x1xi1> to vector<256x16xi1>
    %76 = vector.broadcast %cst_28 : f32 to vector<256x16xf32>
    %77 = arith.select %75, %73, %76 : vector<256x16xi1>, vector<256x16xf32>
    %78 = arith.addf %64, %77 : vector<256x16xf32>
    %c1_i32_29 = arith.constant 1 : i32
    %79 = tpu.dynamic_rotate %20 by %c1_i32_29 dim 0 : vector<256x16xf32>, i32 -> vector<256x16xf32>
    %c1_i32_30 = arith.constant 1 : i32
    %80 = vector.broadcast %c1_i32_30 : i32 to vector<256x1xi32>
    %81 = arith.cmpi sge, %37, %80 : vector<256x1xi32>
    %82 = vector.extract_strided_slice %38 {offsets = [3, 0], sizes = [1, 16], strides = [1, 1]} : vector<9x16xf32> to vector<1x16xf32>
    %83 = vector.broadcast %82 : vector<1x16xf32> to vector<256x16xf32>
    %84 = arith.mulf %79, %83 : vector<256x16xf32>
    %cst_31 = arith.constant 0.000000e+00 : f32
    %85 = vector.shape_cast %81 : vector<256x1xi1> to vector<256x1xi1>
    %86 = vector.broadcast %85 : vector<256x1xi1> to vector<256x16xi1>
    %87 = vector.broadcast %cst_31 : f32 to vector<256x16xf32>
    %88 = arith.select %86, %84, %87 : vector<256x16xi1>, vector<256x16xf32>
    %89 = arith.addf %78, %88 : vector<256x16xf32>
    %90 = vector.extract_strided_slice %38 {offsets = [4, 0], sizes = [1, 16], strides = [1, 1]} : vector<9x16xf32> to vector<1x16xf32>
    %91 = vector.broadcast %90 : vector<1x16xf32> to vector<256x16xf32>
    %92 = arith.mulf %20, %91 : vector<256x16xf32>
    %93 = arith.addf %89, %92 : vector<256x16xf32>
    %c255_i32 = arith.constant 255 : i32
    %94 = tpu.dynamic_rotate %20 by %c255_i32 dim 0 : vector<256x16xf32>, i32 -> vector<256x16xf32>
    %c14_i32_32 = arith.constant 14 : i32
    %95 = vector.broadcast %c14_i32_32 : i32 to vector<256x1xi32>
    %96 = arith.cmpi sle, %37, %95 : vector<256x1xi32>
    %97 = vector.extract_strided_slice %38 {offsets = [5, 0], sizes = [1, 16], strides = [1, 1]} : vector<9x16xf32> to vector<1x16xf32>
    %98 = vector.broadcast %97 : vector<1x16xf32> to vector<256x16xf32>
    %99 = arith.mulf %94, %98 : vector<256x16xf32>
    %cst_33 = arith.constant 0.000000e+00 : f32
    %100 = vector.shape_cast %96 : vector<256x1xi1> to vector<256x1xi1>
    %101 = vector.broadcast %100 : vector<256x1xi1> to vector<256x16xi1>
    %102 = vector.broadcast %cst_33 : f32 to vector<256x16xf32>
    %103 = arith.select %101, %99, %102 : vector<256x16xi1>, vector<256x16xf32>
    %104 = arith.addf %93, %103 : vector<256x16xf32>
    %c241_i32 = arith.constant 241 : i32
    %105 = tpu.dynamic_rotate %20 by %c241_i32 dim 0 : vector<256x16xf32>, i32 -> vector<256x16xf32>
    %c240_i32 = arith.constant 240 : i32
    %106 = vector.broadcast %c240_i32 : i32 to vector<256x1xi32>
    %107 = arith.cmpi slt, %21, %106 : vector<256x1xi32>
    %c1_i32_34 = arith.constant 1 : i32
    %108 = vector.broadcast %c1_i32_34 : i32 to vector<256x1xi32>
    %109 = arith.cmpi sge, %37, %108 : vector<256x1xi32>
    %110 = arith.andi %107, %109 : vector<256x1xi1>
    %111 = vector.extract_strided_slice %38 {offsets = [6, 0], sizes = [1, 16], strides = [1, 1]} : vector<9x16xf32> to vector<1x16xf32>
    %112 = vector.broadcast %111 : vector<1x16xf32> to vector<256x16xf32>
    %113 = arith.mulf %105, %112 : vector<256x16xf32>
    %cst_35 = arith.constant 0.000000e+00 : f32
    %114 = vector.shape_cast %110 : vector<256x1xi1> to vector<256x1xi1>
    %115 = vector.broadcast %114 : vector<256x1xi1> to vector<256x16xi1>
    %116 = vector.broadcast %cst_35 : f32 to vector<256x16xf32>
    %117 = arith.select %115, %113, %116 : vector<256x16xi1>, vector<256x16xf32>
    %118 = arith.addf %104, %117 : vector<256x16xf32>
    %c240_i32_36 = arith.constant 240 : i32
    %119 = tpu.dynamic_rotate %20 by %c240_i32_36 dim 0 : vector<256x16xf32>, i32 -> vector<256x16xf32>
    %c240_i32_37 = arith.constant 240 : i32
    %120 = vector.broadcast %c240_i32_37 : i32 to vector<256x1xi32>
    %121 = arith.cmpi slt, %21, %120 : vector<256x1xi32>
    %122 = vector.extract_strided_slice %38 {offsets = [7, 0], sizes = [1, 16], strides = [1, 1]} : vector<9x16xf32> to vector<1x16xf32>
    %123 = vector.broadcast %122 : vector<1x16xf32> to vector<256x16xf32>
    %124 = arith.mulf %119, %123 : vector<256x16xf32>
    %cst_38 = arith.constant 0.000000e+00 : f32
    %125 = vector.shape_cast %121 : vector<256x1xi1> to vector<256x1xi1>
    %126 = vector.broadcast %125 : vector<256x1xi1> to vector<256x16xi1>
    %127 = vector.broadcast %cst_38 : f32 to vector<256x16xf32>
    %128 = arith.select %126, %124, %127 : vector<256x16xi1>, vector<256x16xf32>
    %129 = arith.addf %118, %128 : vector<256x16xf32>
    %c239_i32 = arith.constant 239 : i32
    %130 = tpu.dynamic_rotate %20 by %c239_i32 dim 0 : vector<256x16xf32>, i32 -> vector<256x16xf32>
    %c240_i32_39 = arith.constant 240 : i32
    %131 = vector.broadcast %c240_i32_39 : i32 to vector<256x1xi32>
    %132 = arith.cmpi slt, %21, %131 : vector<256x1xi32>
    %c14_i32_40 = arith.constant 14 : i32
    %133 = vector.broadcast %c14_i32_40 : i32 to vector<256x1xi32>
    %134 = arith.cmpi sle, %37, %133 : vector<256x1xi32>
    %135 = arith.andi %132, %134 : vector<256x1xi1>
    %136 = vector.extract_strided_slice %38 {offsets = [8, 0], sizes = [1, 16], strides = [1, 1]} : vector<9x16xf32> to vector<1x16xf32>
    %137 = vector.broadcast %136 : vector<1x16xf32> to vector<256x16xf32>
    %138 = arith.mulf %130, %137 : vector<256x16xf32>
    %cst_41 = arith.constant 0.000000e+00 : f32
    %139 = vector.shape_cast %135 : vector<256x1xi1> to vector<256x1xi1>
    %140 = vector.broadcast %139 : vector<256x1xi1> to vector<256x16xi1>
    %141 = vector.broadcast %cst_41 : f32 to vector<256x16xf32>
    %142 = arith.select %140, %138, %141 : vector<256x16xi1>, vector<256x16xf32>
    %143 = arith.addf %129, %142 : vector<256x16xf32>
    %cst_42 = arith.constant 0.000000e+00 : f32
    %cst_43 = arith.constant 6.000000e+00 : f32
    %144 = vector.broadcast %cst_42 : f32 to vector<256x16xf32>
    %145 = arith.maximumf %144, %143 : vector<256x16xf32>
    %146 = vector.broadcast %cst_43 : f32 to vector<256x16xf32>
    %147 = arith.minimumf %146, %145 : vector<256x16xf32>
    %cst_44 = arith.constant dense<0.000000e+00> : vector<16xf32>
    %148 = vector.multi_reduction <add>, %147, %cst_44 [0] : vector<256x16xf32> to vector<16xf32>
    %149 = vector.shape_cast %148 : vector<16xf32> to vector<1x16xf32>
    %cst_45 = arith.constant 2.560000e+02 : f32
    %150 = vector.broadcast %cst_45 : f32 to vector<1x16xf32>
    %151 = arith.divf %149, %150 : vector<1x16xf32>
    %cst_46 = arith.constant dense<0.000000e+00> : vector<8xf32>
    %152 = vector.multi_reduction <add>, %10, %cst_46 [0] : vector<256x8xf32> to vector<8xf32>
    %153 = vector.shape_cast %152 : vector<8xf32> to vector<1x8xf32>
    %cst_47 = arith.constant 2.560000e+02 : f32
    %154 = vector.broadcast %cst_47 : f32 to vector<1x8xf32>
    %155 = arith.divf %153, %154 : vector<1x8xf32>
    %156 = arith.truncf %151 : vector<1x16xf32> to vector<1x16xbf16>
    %c0_48 = arith.constant 0 : index
    %c0_49 = arith.constant 0 : index
    %157 = vector.load %arg7[%c0_48, %c0_49] : memref<16x8xbf16, #tpu.memory_space<vmem>>, vector<16x8xbf16>
    %cst_50 = arith.constant dense<0.000000e+00> : vector<1x8xf32>
    %158 = tpu.matmul %156, %157, %cst_50 {dimension_numbers = #tpu.dot_dimension_numbers<[1], [0], [0], [1], [0, 0, 1, 1], [], []>} : vector<1x16xbf16>, vector<16x8xbf16>, vector<1x8xf32> -> vector<1x8xf32>
    %c0_51 = arith.constant 0 : index
    %c0_52 = arith.constant 0 : index
    %159 = vector.load %arg8[%c0_51, %c0_52] : memref<1x8xf32, #tpu.memory_space<vmem>>, vector<1x8xf32>
    %160 = arith.addf %158, %159 : vector<1x8xf32>
    %161 = arith.addf %160, %155 : vector<1x8xf32>
    %162 = arith.truncf %161 : vector<1x8xf32> to vector<1x8xbf16>
    %c0_53 = arith.constant 0 : index
    %c0_54 = arith.constant 0 : index
    %163 = vector.load %arg9[%c0_53, %c0_54] : memref<8x512xbf16, #tpu.memory_space<vmem>>, vector<8x512xbf16>
    %cst_55 = arith.constant dense<0.000000e+00> : vector<1x512xf32>
    %164 = tpu.matmul %162, %163, %cst_55 {dimension_numbers = #tpu.dot_dimension_numbers<[1], [0], [0], [1], [0, 0, 1, 1], [], []>} : vector<1x8xbf16>, vector<8x512xbf16>, vector<1x512xf32> -> vector<1x512xf32>
    %c0_56 = arith.constant 0 : index
    %c0_57 = arith.constant 0 : index
    %165 = vector.load %arg10[%c0_56, %c0_57] : memref<1x512xf32, #tpu.memory_space<vmem>>, vector<1x512xf32>
    %166 = arith.addf %164, %165 : vector<1x512xf32>
    %c0_58 = arith.constant 0 : index
    %c0_59 = arith.constant 0 : index
    %c0_60 = arith.constant 0 : index
    %167 = vector.load %arg11[%c0_58, %c0_59, %c0_60] : memref<1x1x512xf32, #tpu.memory_space<vmem>>, vector<1x1x512xf32>
    %168 = vector.shape_cast %167 : vector<1x1x512xf32> to vector<1x512xf32>
    %169 = vector.shape_cast %166 : vector<1x512xf32> to vector<1x1x512xf32>
    tpu.vector_store %arg11[%c0_58, %c0_59, %c0_60], %169 {strides = array<i32>} : memref<1x1x512xf32, #tpu.memory_space<vmem>>, vector<1x1x512xf32>,
    return
  }
  func.func @transform_0(%arg0: i32) -> (i32, i32, i32) {
    %c0_i32 = arith.constant 0 : i32
    %c0_i32_0 = arith.constant 0 : i32
    %c0_i32_1 = arith.constant 0 : i32
    return %arg0, %c0_i32, %c0_i32_0 : i32, i32, i32
  }
  func.func @transform_1(%arg0: i32) -> (i32, i32) {
    %c0_i32 = arith.constant 0 : i32
    %c0_i32_0 = arith.constant 0 : i32
    %c0_i32_1 = arith.constant 0 : i32
    return %c0_i32, %c0_i32_0 : i32, i32
  }
  func.func @transform_2(%arg0: i32) -> (i32, i32) {
    %c0_i32 = arith.constant 0 : i32
    %c0_i32_0 = arith.constant 0 : i32
    %c0_i32_1 = arith.constant 0 : i32
    return %c0_i32, %c0_i32_0 : i32, i32
  }
  func.func @transform_3(%arg0: i32) -> (i32, i32) {
    %c0_i32 = arith.constant 0 : i32
    %c0_i32_0 = arith.constant 0 : i32
    %c0_i32_1 = arith.constant 0 : i32
    return %c0_i32, %c0_i32_0 : i32, i32
  }
  func.func @transform_4(%arg0: i32) -> (i32, i32) {
    %c0_i32 = arith.constant 0 : i32
    %c0_i32_0 = arith.constant 0 : i32
    %c0_i32_1 = arith.constant 0 : i32
    return %c0_i32, %c0_i32_0 : i32, i32
  }
  func.func @transform_5(%arg0: i32) -> (i32, i32) {
    %c0_i32 = arith.constant 0 : i32
    %c0_i32_0 = arith.constant 0 : i32
    %c0_i32_1 = arith.constant 0 : i32
    return %c0_i32, %c0_i32_0 : i32, i32
  }
  func.func @transform_6(%arg0: i32) -> (i32, i32) {
    %c0_i32 = arith.constant 0 : i32
    %c0_i32_0 = arith.constant 0 : i32
    %c0_i32_1 = arith.constant 0 : i32
    return %c0_i32, %c0_i32_0 : i32, i32
  }
  func.func @transform_7(%arg0: i32) -> (i32, i32) {
    %c0_i32 = arith.constant 0 : i32
    %c0_i32_0 = arith.constant 0 : i32
    %c0_i32_1 = arith.constant 0 : i32
    return %c0_i32, %c0_i32_0 : i32, i32
  }
  func.func @transform_8(%arg0: i32) -> (i32, i32) {
    %c0_i32 = arith.constant 0 : i32
    %c0_i32_0 = arith.constant 0 : i32
    %c0_i32_1 = arith.constant 0 : i32
    return %c0_i32, %c0_i32_0 : i32, i32
  }
  func.func @transform_9(%arg0: i32) -> (i32, i32) {
    %c0_i32 = arith.constant 0 : i32
    %c0_i32_0 = arith.constant 0 : i32
    %c0_i32_1 = arith.constant 0 : i32
    return %c0_i32, %c0_i32_0 : i32, i32
  }
  func.func @transform_10(%arg0: i32) -> (i32, i32, i32) {
    %c0_i32 = arith.constant 0 : i32
    %c0_i32_0 = arith.constant 0 : i32
    %c0_i32_1 = arith.constant 0 : i32
    return %arg0, %c0_i32, %c0_i32_0 : i32, i32, i32
  }
}

module attributes {stable_mosaic.version = 11 : i64} {
  func.func @kernel(%arg0: memref<32x25xf32, #tpu.memory_space<vmem>>, %arg1: memref<3x25x16xf32, #tpu.memory_space<vmem>>, %arg2: memref<3x16x16xf32, #tpu.memory_space<vmem>>, %arg3: memref<3x1x16xf32, #tpu.memory_space<vmem>>, %arg4: memref<3x1x16xf32, #tpu.memory_space<vmem>>, %arg5: memref<3x16x16xf32, #tpu.memory_space<vmem>>, %arg6: memref<3x16x16xf32, #tpu.memory_space<vmem>>, %arg7: memref<3x1x16xf32, #tpu.memory_space<vmem>>, %arg8: memref<3x1x16xf32, #tpu.memory_space<vmem>>, %arg9: memref<32x16xf32, #tpu.memory_space<vmem>>, %arg10: memref<32x16xf32, #tpu.memory_space<vmem>>) attributes {dimension_semantics = [], scalar_prefetch = 0 : i64, scratch_operands = 1 : i64, tpu.core_type = #tpu.core_type<tc>} {
    %c0 = arith.constant 0 : index
    %c0_0 = arith.constant 0 : index
    %0 = vector.load %arg0[%c0, %c0_0] : memref<32x25xf32, #tpu.memory_space<vmem>>, vector<32x25xf32>
    %c0_1 = arith.constant 0 : index
    %c0_2 = arith.constant 0 : index
    %c0_3 = arith.constant 0 : index
    %1 = vector.load %arg1[%c0_1, %c0_2, %c0_3] : memref<3x25x16xf32, #tpu.memory_space<vmem>>, vector<1x25x16xf32>
    %2 = vector.shape_cast %1 : vector<1x25x16xf32> to vector<25x16xf32>
    %cst = arith.constant dense<0.000000e+00> : vector<32x16xf32>
    %3 = tpu.matmul %0, %2, %cst {dimension_numbers = #tpu.dot_dimension_numbers<[1], [0], [0], [1], [0, 0, 1, 1], [], []>} : vector<32x25xf32>, vector<25x16xf32>, vector<32x16xf32> -> vector<32x16xf32>
    %c0_4 = arith.constant 0 : index
    %c0_5 = arith.constant 0 : index
    %c0_6 = arith.constant 0 : index
    %4 = vector.load %arg3[%c0_4, %c0_5, %c0_6] : memref<3x1x16xf32, #tpu.memory_space<vmem>>, vector<1x1x16xf32>
    %5 = vector.shape_cast %4 : vector<1x1x16xf32> to vector<1x16xf32>
    %6 = vector.broadcast %5 : vector<1x16xf32> to vector<32x16xf32>
    %7 = arith.addf %3, %6 : vector<32x16xf32>
    %c1 = arith.constant 1 : index
    %c0_7 = arith.constant 0 : index
    %c0_8 = arith.constant 0 : index
    %8 = vector.load %arg1[%c1, %c0_7, %c0_8] : memref<3x25x16xf32, #tpu.memory_space<vmem>>, vector<1x25x16xf32>
    %9 = vector.shape_cast %8 : vector<1x25x16xf32> to vector<25x16xf32>
    %cst_9 = arith.constant dense<0.000000e+00> : vector<32x16xf32>
    %10 = tpu.matmul %0, %9, %cst_9 {dimension_numbers = #tpu.dot_dimension_numbers<[1], [0], [0], [1], [0, 0, 1, 1], [], []>} : vector<32x25xf32>, vector<25x16xf32>, vector<32x16xf32> -> vector<32x16xf32>
    %c1_10 = arith.constant 1 : index
    %c0_11 = arith.constant 0 : index
    %c0_12 = arith.constant 0 : index
    %11 = vector.load %arg3[%c1_10, %c0_11, %c0_12] : memref<3x1x16xf32, #tpu.memory_space<vmem>>, vector<1x1x16xf32>
    %12 = vector.shape_cast %11 : vector<1x1x16xf32> to vector<1x16xf32>
    %13 = vector.broadcast %12 : vector<1x16xf32> to vector<32x16xf32>
    %14 = arith.addf %10, %13 : vector<32x16xf32>
    %c2 = arith.constant 2 : index
    %c0_13 = arith.constant 0 : index
    %c0_14 = arith.constant 0 : index
    %15 = vector.load %arg1[%c2, %c0_13, %c0_14] : memref<3x25x16xf32, #tpu.memory_space<vmem>>, vector<1x25x16xf32>
    %16 = vector.shape_cast %15 : vector<1x25x16xf32> to vector<25x16xf32>
    %cst_15 = arith.constant dense<0.000000e+00> : vector<32x16xf32>
    %17 = tpu.matmul %0, %16, %cst_15 {dimension_numbers = #tpu.dot_dimension_numbers<[1], [0], [0], [1], [0, 0, 1, 1], [], []>} : vector<32x25xf32>, vector<25x16xf32>, vector<32x16xf32> -> vector<32x16xf32>
    %c2_16 = arith.constant 2 : index
    %c0_17 = arith.constant 0 : index
    %c0_18 = arith.constant 0 : index
    %18 = vector.load %arg3[%c2_16, %c0_17, %c0_18] : memref<3x1x16xf32, #tpu.memory_space<vmem>>, vector<1x1x16xf32>
    %19 = vector.shape_cast %18 : vector<1x1x16xf32> to vector<1x16xf32>
    %20 = vector.broadcast %19 : vector<1x16xf32> to vector<32x16xf32>
    %21 = arith.addf %17, %20 : vector<32x16xf32>
    %cst_19 = arith.constant 0.000000e+00 : f32
    %22 = vector.broadcast %cst_19 : f32 to vector<16x16xf32>
    %c0_20 = arith.constant 0 : index
    %c0_21 = arith.constant 0 : index
    %c0_22 = arith.constant 0 : index
    %23 = vector.load %arg2[%c0_20, %c0_21, %c0_22] : memref<3x16x16xf32, #tpu.memory_space<vmem>>, vector<1x16x16xf32>
    %24 = vector.shape_cast %23 : vector<1x16x16xf32> to vector<16x16xf32>
    %cst_23 = arith.constant dense<0.000000e+00> : vector<16x16xf32>
    %25 = tpu.matmul %22, %24, %cst_23 {dimension_numbers = #tpu.dot_dimension_numbers<[1], [0], [0], [1], [0, 0, 1, 1], [], []>} : vector<16x16xf32>, vector<16x16xf32>, vector<16x16xf32> -> vector<16x16xf32>
    %c0_24 = arith.constant 0 : index
    %c0_25 = arith.constant 0 : index
    %c0_26 = arith.constant 0 : index
    %26 = vector.load %arg4[%c0_24, %c0_25, %c0_26] : memref<3x1x16xf32, #tpu.memory_space<vmem>>, vector<1x1x16xf32>
    %27 = vector.shape_cast %26 : vector<1x1x16xf32> to vector<1x16xf32>
    %28 = vector.broadcast %27 : vector<1x16xf32> to vector<16x16xf32>
    %29 = arith.addf %25, %28 : vector<16x16xf32>
    %c1_27 = arith.constant 1 : index
    %c0_28 = arith.constant 0 : index
    %c0_29 = arith.constant 0 : index
    %30 = vector.load %arg2[%c1_27, %c0_28, %c0_29] : memref<3x16x16xf32, #tpu.memory_space<vmem>>, vector<1x16x16xf32>
    %31 = vector.shape_cast %30 : vector<1x16x16xf32> to vector<16x16xf32>
    %cst_30 = arith.constant dense<0.000000e+00> : vector<16x16xf32>
    %32 = tpu.matmul %22, %31, %cst_30 {dimension_numbers = #tpu.dot_dimension_numbers<[1], [0], [0], [1], [0, 0, 1, 1], [], []>} : vector<16x16xf32>, vector<16x16xf32>, vector<16x16xf32> -> vector<16x16xf32>
    %c1_31 = arith.constant 1 : index
    %c0_32 = arith.constant 0 : index
    %c0_33 = arith.constant 0 : index
    %33 = vector.load %arg4[%c1_31, %c0_32, %c0_33] : memref<3x1x16xf32, #tpu.memory_space<vmem>>, vector<1x1x16xf32>
    %34 = vector.shape_cast %33 : vector<1x1x16xf32> to vector<1x16xf32>
    %35 = vector.broadcast %34 : vector<1x16xf32> to vector<16x16xf32>
    %36 = arith.addf %32, %35 : vector<16x16xf32>
    %c2_34 = arith.constant 2 : index
    %c0_35 = arith.constant 0 : index
    %c0_36 = arith.constant 0 : index
    %37 = vector.load %arg2[%c2_34, %c0_35, %c0_36] : memref<3x16x16xf32, #tpu.memory_space<vmem>>, vector<1x16x16xf32>
    %38 = vector.shape_cast %37 : vector<1x16x16xf32> to vector<16x16xf32>
    %cst_37 = arith.constant dense<0.000000e+00> : vector<16x16xf32>
    %39 = tpu.matmul %22, %38, %cst_37 {dimension_numbers = #tpu.dot_dimension_numbers<[1], [0], [0], [1], [0, 0, 1, 1], [], []>} : vector<16x16xf32>, vector<16x16xf32>, vector<16x16xf32> -> vector<16x16xf32>
    %c2_38 = arith.constant 2 : index
    %c0_39 = arith.constant 0 : index
    %c0_40 = arith.constant 0 : index
    %40 = vector.load %arg4[%c2_38, %c0_39, %c0_40] : memref<3x1x16xf32, #tpu.memory_space<vmem>>, vector<1x1x16xf32>
    %41 = vector.shape_cast %40 : vector<1x1x16xf32> to vector<1x16xf32>
    %42 = vector.broadcast %41 : vector<1x16xf32> to vector<16x16xf32>
    %43 = arith.addf %39, %42 : vector<16x16xf32>
    %44 = vector.extract_strided_slice %7 {offsets = [0, 0], sizes = [16, 16], strides = [1, 1]} : vector<32x16xf32> to vector<16x16xf32>
    %45 = arith.addf %44, %29 : vector<16x16xf32>
    %46 = arith.negf %45 : vector<16x16xf32>
    %47 = math.exp %46 : vector<16x16xf32>
    %cst_41 = arith.constant 1.000000e+00 : f32
    %48 = vector.broadcast %cst_41 : f32 to vector<16x16xf32>
    %49 = arith.addf %48, %47 : vector<16x16xf32>
    %50 = arith.divf %48, %49 : vector<16x16xf32>
    %51 = vector.extract_strided_slice %14 {offsets = [0, 0], sizes = [16, 16], strides = [1, 1]} : vector<32x16xf32> to vector<16x16xf32>
    %52 = arith.addf %51, %36 : vector<16x16xf32>
    %53 = arith.negf %52 : vector<16x16xf32>
    %54 = math.exp %53 : vector<16x16xf32>
    %cst_42 = arith.constant 1.000000e+00 : f32
    %55 = vector.broadcast %cst_42 : f32 to vector<16x16xf32>
    %56 = arith.addf %55, %54 : vector<16x16xf32>
    %57 = arith.divf %55, %56 : vector<16x16xf32>
    %58 = vector.extract_strided_slice %21 {offsets = [0, 0], sizes = [16, 16], strides = [1, 1]} : vector<32x16xf32> to vector<16x16xf32>
    %59 = arith.mulf %50, %43 : vector<16x16xf32>
    %60 = arith.addf %58, %59 : vector<16x16xf32>
    %61 = math.tanh %60 : vector<16x16xf32>
    %cst_43 = arith.constant 1.000000e+00 : f32
    %62 = vector.broadcast %cst_43 : f32 to vector<16x16xf32>
    %63 = arith.subf %62, %57 : vector<16x16xf32>
    %64 = arith.mulf %63, %61 : vector<16x16xf32>
    %65 = arith.mulf %57, %22 : vector<16x16xf32>
    %66 = arith.addf %64, %65 : vector<16x16xf32>
    %c0_44 = arith.constant 0 : index
    %c0_45 = arith.constant 0 : index
    %67 = vector.load %arg10[%c0_44, %c0_45] : memref<32x16xf32, #tpu.memory_space<vmem>>, vector<16x16xf32>
    tpu.vector_store %arg10[%c0_44, %c0_45], %66 {strides = array<i32>} : memref<32x16xf32, #tpu.memory_space<vmem>>, vector<16x16xf32>,
    %c0_46 = arith.constant 0 : index
    %c0_47 = arith.constant 0 : index
    %c0_48 = arith.constant 0 : index
    %68 = vector.load %arg2[%c0_46, %c0_47, %c0_48] : memref<3x16x16xf32, #tpu.memory_space<vmem>>, vector<1x16x16xf32>
    %69 = vector.shape_cast %68 : vector<1x16x16xf32> to vector<16x16xf32>
    %cst_49 = arith.constant dense<0.000000e+00> : vector<16x16xf32>
    %70 = tpu.matmul %66, %69, %cst_49 {dimension_numbers = #tpu.dot_dimension_numbers<[1], [0], [0], [1], [0, 0, 1, 1], [], []>} : vector<16x16xf32>, vector<16x16xf32>, vector<16x16xf32> -> vector<16x16xf32>
    %c0_50 = arith.constant 0 : index
    %c0_51 = arith.constant 0 : index
    %c0_52 = arith.constant 0 : index
    %71 = vector.load %arg4[%c0_50, %c0_51, %c0_52] : memref<3x1x16xf32, #tpu.memory_space<vmem>>, vector<1x1x16xf32>
    %72 = vector.shape_cast %71 : vector<1x1x16xf32> to vector<1x16xf32>
    %73 = vector.broadcast %72 : vector<1x16xf32> to vector<16x16xf32>
    %74 = arith.addf %70, %73 : vector<16x16xf32>
    %c1_53 = arith.constant 1 : index
    %c0_54 = arith.constant 0 : index
    %c0_55 = arith.constant 0 : index
    %75 = vector.load %arg2[%c1_53, %c0_54, %c0_55] : memref<3x16x16xf32, #tpu.memory_space<vmem>>, vector<1x16x16xf32>
    %76 = vector.shape_cast %75 : vector<1x16x16xf32> to vector<16x16xf32>
    %cst_56 = arith.constant dense<0.000000e+00> : vector<16x16xf32>
    %77 = tpu.matmul %66, %76, %cst_56 {dimension_numbers = #tpu.dot_dimension_numbers<[1], [0], [0], [1], [0, 0, 1, 1], [], []>} : vector<16x16xf32>, vector<16x16xf32>, vector<16x16xf32> -> vector<16x16xf32>
    %c1_57 = arith.constant 1 : index
    %c0_58 = arith.constant 0 : index
    %c0_59 = arith.constant 0 : index
    %78 = vector.load %arg4[%c1_57, %c0_58, %c0_59] : memref<3x1x16xf32, #tpu.memory_space<vmem>>, vector<1x1x16xf32>
    %79 = vector.shape_cast %78 : vector<1x1x16xf32> to vector<1x16xf32>
    %80 = vector.broadcast %79 : vector<1x16xf32> to vector<16x16xf32>
    %81 = arith.addf %77, %80 : vector<16x16xf32>
    %c2_60 = arith.constant 2 : index
    %c0_61 = arith.constant 0 : index
    %c0_62 = arith.constant 0 : index
    %82 = vector.load %arg2[%c2_60, %c0_61, %c0_62] : memref<3x16x16xf32, #tpu.memory_space<vmem>>, vector<1x16x16xf32>
    %83 = vector.shape_cast %82 : vector<1x16x16xf32> to vector<16x16xf32>
    %cst_63 = arith.constant dense<0.000000e+00> : vector<16x16xf32>
    %84 = tpu.matmul %66, %83, %cst_63 {dimension_numbers = #tpu.dot_dimension_numbers<[1], [0], [0], [1], [0, 0, 1, 1], [], []>} : vector<16x16xf32>, vector<16x16xf32>, vector<16x16xf32> -> vector<16x16xf32>
    %c2_64 = arith.constant 2 : index
    %c0_65 = arith.constant 0 : index
    %c0_66 = arith.constant 0 : index
    %85 = vector.load %arg4[%c2_64, %c0_65, %c0_66] : memref<3x1x16xf32, #tpu.memory_space<vmem>>, vector<1x1x16xf32>
    %86 = vector.shape_cast %85 : vector<1x1x16xf32> to vector<1x16xf32>
    %87 = vector.broadcast %86 : vector<1x16xf32> to vector<16x16xf32>
    %88 = arith.addf %84, %87 : vector<16x16xf32>
    %89 = vector.extract_strided_slice %7 {offsets = [16, 0], sizes = [16, 16], strides = [1, 1]} : vector<32x16xf32> to vector<16x16xf32>
    %90 = arith.addf %89, %74 : vector<16x16xf32>
    %91 = arith.negf %90 : vector<16x16xf32>
    %92 = math.exp %91 : vector<16x16xf32>
    %cst_67 = arith.constant 1.000000e+00 : f32
    %93 = vector.broadcast %cst_67 : f32 to vector<16x16xf32>
    %94 = arith.addf %93, %92 : vector<16x16xf32>
    %95 = arith.divf %93, %94 : vector<16x16xf32>
    %96 = vector.extract_strided_slice %14 {offsets = [16, 0], sizes = [16, 16], strides = [1, 1]} : vector<32x16xf32> to vector<16x16xf32>
    %97 = arith.addf %96, %81 : vector<16x16xf32>
    %98 = arith.negf %97 : vector<16x16xf32>
    %99 = math.exp %98 : vector<16x16xf32>
    %cst_68 = arith.constant 1.000000e+00 : f32
    %100 = vector.broadcast %cst_68 : f32 to vector<16x16xf32>
    %101 = arith.addf %100, %99 : vector<16x16xf32>
    %102 = arith.divf %100, %101 : vector<16x16xf32>
    %103 = vector.extract_strided_slice %21 {offsets = [16, 0], sizes = [16, 16], strides = [1, 1]} : vector<32x16xf32> to vector<16x16xf32>
    %104 = arith.mulf %95, %88 : vector<16x16xf32>
    %105 = arith.addf %103, %104 : vector<16x16xf32>
    %106 = math.tanh %105 : vector<16x16xf32>
    %cst_69 = arith.constant 1.000000e+00 : f32
    %107 = vector.broadcast %cst_69 : f32 to vector<16x16xf32>
    %108 = arith.subf %107, %102 : vector<16x16xf32>
    %109 = arith.mulf %108, %106 : vector<16x16xf32>
    %110 = arith.mulf %102, %66 : vector<16x16xf32>
    %111 = arith.addf %109, %110 : vector<16x16xf32>
    %c16 = arith.constant 16 : index
    %c0_70 = arith.constant 0 : index
    %112 = vector.load %arg10[%c16, %c0_70] : memref<32x16xf32, #tpu.memory_space<vmem>>, vector<16x16xf32>
    tpu.vector_store %arg10[%c16, %c0_70], %111 {strides = array<i32>} : memref<32x16xf32, #tpu.memory_space<vmem>>, vector<16x16xf32>,
    %c0_71 = arith.constant 0 : index
    %c0_72 = arith.constant 0 : index
    %113 = vector.load %arg10[%c0_71, %c0_72] : memref<32x16xf32, #tpu.memory_space<vmem>>, vector<32x16xf32>
    %c0_73 = arith.constant 0 : index
    %c0_74 = arith.constant 0 : index
    %c0_75 = arith.constant 0 : index
    %114 = vector.load %arg5[%c0_73, %c0_74, %c0_75] : memref<3x16x16xf32, #tpu.memory_space<vmem>>, vector<1x16x16xf32>
    %115 = vector.shape_cast %114 : vector<1x16x16xf32> to vector<16x16xf32>
    %cst_76 = arith.constant dense<0.000000e+00> : vector<32x16xf32>
    %116 = tpu.matmul %113, %115, %cst_76 {dimension_numbers = #tpu.dot_dimension_numbers<[1], [0], [0], [1], [0, 0, 1, 1], [], []>} : vector<32x16xf32>, vector<16x16xf32>, vector<32x16xf32> -> vector<32x16xf32>
    %c0_77 = arith.constant 0 : index
    %c0_78 = arith.constant 0 : index
    %c0_79 = arith.constant 0 : index
    %117 = vector.load %arg7[%c0_77, %c0_78, %c0_79] : memref<3x1x16xf32, #tpu.memory_space<vmem>>, vector<1x1x16xf32>
    %118 = vector.shape_cast %117 : vector<1x1x16xf32> to vector<1x16xf32>
    %119 = vector.broadcast %118 : vector<1x16xf32> to vector<32x16xf32>
    %120 = arith.addf %116, %119 : vector<32x16xf32>
    %c1_80 = arith.constant 1 : index
    %c0_81 = arith.constant 0 : index
    %c0_82 = arith.constant 0 : index
    %121 = vector.load %arg5[%c1_80, %c0_81, %c0_82] : memref<3x16x16xf32, #tpu.memory_space<vmem>>, vector<1x16x16xf32>
    %122 = vector.shape_cast %121 : vector<1x16x16xf32> to vector<16x16xf32>
    %cst_83 = arith.constant dense<0.000000e+00> : vector<32x16xf32>
    %123 = tpu.matmul %113, %122, %cst_83 {dimension_numbers = #tpu.dot_dimension_numbers<[1], [0], [0], [1], [0, 0, 1, 1], [], []>} : vector<32x16xf32>, vector<16x16xf32>, vector<32x16xf32> -> vector<32x16xf32>
    %c1_84 = arith.constant 1 : index
    %c0_85 = arith.constant 0 : index
    %c0_86 = arith.constant 0 : index
    %124 = vector.load %arg7[%c1_84, %c0_85, %c0_86] : memref<3x1x16xf32, #tpu.memory_space<vmem>>, vector<1x1x16xf32>
    %125 = vector.shape_cast %124 : vector<1x1x16xf32> to vector<1x16xf32>
    %126 = vector.broadcast %125 : vector<1x16xf32> to vector<32x16xf32>
    %127 = arith.addf %123, %126 : vector<32x16xf32>
    %c2_87 = arith.constant 2 : index
    %c0_88 = arith.constant 0 : index
    %c0_89 = arith.constant 0 : index
    %128 = vector.load %arg5[%c2_87, %c0_88, %c0_89] : memref<3x16x16xf32, #tpu.memory_space<vmem>>, vector<1x16x16xf32>
    %129 = vector.shape_cast %128 : vector<1x16x16xf32> to vector<16x16xf32>
    %cst_90 = arith.constant dense<0.000000e+00> : vector<32x16xf32>
    %130 = tpu.matmul %113, %129, %cst_90 {dimension_numbers = #tpu.dot_dimension_numbers<[1], [0], [0], [1], [0, 0, 1, 1], [], []>} : vector<32x16xf32>, vector<16x16xf32>, vector<32x16xf32> -> vector<32x16xf32>
    %c2_91 = arith.constant 2 : index
    %c0_92 = arith.constant 0 : index
    %c0_93 = arith.constant 0 : index
    %131 = vector.load %arg7[%c2_91, %c0_92, %c0_93] : memref<3x1x16xf32, #tpu.memory_space<vmem>>, vector<1x1x16xf32>
    %132 = vector.shape_cast %131 : vector<1x1x16xf32> to vector<1x16xf32>
    %133 = vector.broadcast %132 : vector<1x16xf32> to vector<32x16xf32>
    %134 = arith.addf %130, %133 : vector<32x16xf32>
    %cst_94 = arith.constant 0.000000e+00 : f32
    %135 = vector.broadcast %cst_94 : f32 to vector<16x16xf32>
    %c0_95 = arith.constant 0 : index
    %c0_96 = arith.constant 0 : index
    %c0_97 = arith.constant 0 : index
    %136 = vector.load %arg6[%c0_95, %c0_96, %c0_97] : memref<3x16x16xf32, #tpu.memory_space<vmem>>, vector<1x16x16xf32>
    %137 = vector.shape_cast %136 : vector<1x16x16xf32> to vector<16x16xf32>
    %cst_98 = arith.constant dense<0.000000e+00> : vector<16x16xf32>
    %138 = tpu.matmul %135, %137, %cst_98 {dimension_numbers = #tpu.dot_dimension_numbers<[1], [0], [0], [1], [0, 0, 1, 1], [], []>} : vector<16x16xf32>, vector<16x16xf32>, vector<16x16xf32> -> vector<16x16xf32>
    %c0_99 = arith.constant 0 : index
    %c0_100 = arith.constant 0 : index
    %c0_101 = arith.constant 0 : index
    %139 = vector.load %arg8[%c0_99, %c0_100, %c0_101] : memref<3x1x16xf32, #tpu.memory_space<vmem>>, vector<1x1x16xf32>
    %140 = vector.shape_cast %139 : vector<1x1x16xf32> to vector<1x16xf32>
    %141 = vector.broadcast %140 : vector<1x16xf32> to vector<16x16xf32>
    %142 = arith.addf %138, %141 : vector<16x16xf32>
    %c1_102 = arith.constant 1 : index
    %c0_103 = arith.constant 0 : index
    %c0_104 = arith.constant 0 : index
    %143 = vector.load %arg6[%c1_102, %c0_103, %c0_104] : memref<3x16x16xf32, #tpu.memory_space<vmem>>, vector<1x16x16xf32>
    %144 = vector.shape_cast %143 : vector<1x16x16xf32> to vector<16x16xf32>
    %cst_105 = arith.constant dense<0.000000e+00> : vector<16x16xf32>
    %145 = tpu.matmul %135, %144, %cst_105 {dimension_numbers = #tpu.dot_dimension_numbers<[1], [0], [0], [1], [0, 0, 1, 1], [], []>} : vector<16x16xf32>, vector<16x16xf32>, vector<16x16xf32> -> vector<16x16xf32>
    %c1_106 = arith.constant 1 : index
    %c0_107 = arith.constant 0 : index
    %c0_108 = arith.constant 0 : index
    %146 = vector.load %arg8[%c1_106, %c0_107, %c0_108] : memref<3x1x16xf32, #tpu.memory_space<vmem>>, vector<1x1x16xf32>
    %147 = vector.shape_cast %146 : vector<1x1x16xf32> to vector<1x16xf32>
    %148 = vector.broadcast %147 : vector<1x16xf32> to vector<16x16xf32>
    %149 = arith.addf %145, %148 : vector<16x16xf32>
    %c2_109 = arith.constant 2 : index
    %c0_110 = arith.constant 0 : index
    %c0_111 = arith.constant 0 : index
    %150 = vector.load %arg6[%c2_109, %c0_110, %c0_111] : memref<3x16x16xf32, #tpu.memory_space<vmem>>, vector<1x16x16xf32>
    %151 = vector.shape_cast %150 : vector<1x16x16xf32> to vector<16x16xf32>
    %cst_112 = arith.constant dense<0.000000e+00> : vector<16x16xf32>
    %152 = tpu.matmul %135, %151, %cst_112 {dimension_numbers = #tpu.dot_dimension_numbers<[1], [0], [0], [1], [0, 0, 1, 1], [], []>} : vector<16x16xf32>, vector<16x16xf32>, vector<16x16xf32> -> vector<16x16xf32>
    %c2_113 = arith.constant 2 : index
    %c0_114 = arith.constant 0 : index
    %c0_115 = arith.constant 0 : index
    %153 = vector.load %arg8[%c2_113, %c0_114, %c0_115] : memref<3x1x16xf32, #tpu.memory_space<vmem>>, vector<1x1x16xf32>
    %154 = vector.shape_cast %153 : vector<1x1x16xf32> to vector<1x16xf32>
    %155 = vector.broadcast %154 : vector<1x16xf32> to vector<16x16xf32>
    %156 = arith.addf %152, %155 : vector<16x16xf32>
    %157 = vector.extract_strided_slice %120 {offsets = [0, 0], sizes = [16, 16], strides = [1, 1]} : vector<32x16xf32> to vector<16x16xf32>
    %158 = arith.addf %157, %142 : vector<16x16xf32>
    %159 = arith.negf %158 : vector<16x16xf32>
    %160 = math.exp %159 : vector<16x16xf32>
    %cst_116 = arith.constant 1.000000e+00 : f32
    %161 = vector.broadcast %cst_116 : f32 to vector<16x16xf32>
    %162 = arith.addf %161, %160 : vector<16x16xf32>
    %163 = arith.divf %161, %162 : vector<16x16xf32>
    %164 = vector.extract_strided_slice %127 {offsets = [0, 0], sizes = [16, 16], strides = [1, 1]} : vector<32x16xf32> to vector<16x16xf32>
    %165 = arith.addf %164, %149 : vector<16x16xf32>
    %166 = arith.negf %165 : vector<16x16xf32>
    %167 = math.exp %166 : vector<16x16xf32>
    %cst_117 = arith.constant 1.000000e+00 : f32
    %168 = vector.broadcast %cst_117 : f32 to vector<16x16xf32>
    %169 = arith.addf %168, %167 : vector<16x16xf32>
    %170 = arith.divf %168, %169 : vector<16x16xf32>
    %171 = vector.extract_strided_slice %134 {offsets = [0, 0], sizes = [16, 16], strides = [1, 1]} : vector<32x16xf32> to vector<16x16xf32>
    %172 = arith.mulf %163, %156 : vector<16x16xf32>
    %173 = arith.addf %171, %172 : vector<16x16xf32>
    %174 = math.tanh %173 : vector<16x16xf32>
    %cst_118 = arith.constant 1.000000e+00 : f32
    %175 = vector.broadcast %cst_118 : f32 to vector<16x16xf32>
    %176 = arith.subf %175, %170 : vector<16x16xf32>
    %177 = arith.mulf %176, %174 : vector<16x16xf32>
    %178 = arith.mulf %170, %135 : vector<16x16xf32>
    %179 = arith.addf %177, %178 : vector<16x16xf32>
    %c0_119 = arith.constant 0 : index
    %c0_120 = arith.constant 0 : index
    %180 = vector.load %arg9[%c0_119, %c0_120] : memref<32x16xf32, #tpu.memory_space<vmem>>, vector<16x16xf32>
    tpu.vector_store %arg9[%c0_119, %c0_120], %179 {strides = array<i32>} : memref<32x16xf32, #tpu.memory_space<vmem>>, vector<16x16xf32>,
    %c0_121 = arith.constant 0 : index
    %c0_122 = arith.constant 0 : index
    %c0_123 = arith.constant 0 : index
    %181 = vector.load %arg6[%c0_121, %c0_122, %c0_123] : memref<3x16x16xf32, #tpu.memory_space<vmem>>, vector<1x16x16xf32>
    %182 = vector.shape_cast %181 : vector<1x16x16xf32> to vector<16x16xf32>
    %cst_124 = arith.constant dense<0.000000e+00> : vector<16x16xf32>
    %183 = tpu.matmul %179, %182, %cst_124 {dimension_numbers = #tpu.dot_dimension_numbers<[1], [0], [0], [1], [0, 0, 1, 1], [], []>} : vector<16x16xf32>, vector<16x16xf32>, vector<16x16xf32> -> vector<16x16xf32>
    %c0_125 = arith.constant 0 : index
    %c0_126 = arith.constant 0 : index
    %c0_127 = arith.constant 0 : index
    %184 = vector.load %arg8[%c0_125, %c0_126, %c0_127] : memref<3x1x16xf32, #tpu.memory_space<vmem>>, vector<1x1x16xf32>
    %185 = vector.shape_cast %184 : vector<1x1x16xf32> to vector<1x16xf32>
    %186 = vector.broadcast %185 : vector<1x16xf32> to vector<16x16xf32>
    %187 = arith.addf %183, %186 : vector<16x16xf32>
    %c1_128 = arith.constant 1 : index
    %c0_129 = arith.constant 0 : index
    %c0_130 = arith.constant 0 : index
    %188 = vector.load %arg6[%c1_128, %c0_129, %c0_130] : memref<3x16x16xf32, #tpu.memory_space<vmem>>, vector<1x16x16xf32>
    %189 = vector.shape_cast %188 : vector<1x16x16xf32> to vector<16x16xf32>
    %cst_131 = arith.constant dense<0.000000e+00> : vector<16x16xf32>
    %190 = tpu.matmul %179, %189, %cst_131 {dimension_numbers = #tpu.dot_dimension_numbers<[1], [0], [0], [1], [0, 0, 1, 1], [], []>} : vector<16x16xf32>, vector<16x16xf32>, vector<16x16xf32> -> vector<16x16xf32>
    %c1_132 = arith.constant 1 : index
    %c0_133 = arith.constant 0 : index
    %c0_134 = arith.constant 0 : index
    %191 = vector.load %arg8[%c1_132, %c0_133, %c0_134] : memref<3x1x16xf32, #tpu.memory_space<vmem>>, vector<1x1x16xf32>
    %192 = vector.shape_cast %191 : vector<1x1x16xf32> to vector<1x16xf32>
    %193 = vector.broadcast %192 : vector<1x16xf32> to vector<16x16xf32>
    %194 = arith.addf %190, %193 : vector<16x16xf32>
    %c2_135 = arith.constant 2 : index
    %c0_136 = arith.constant 0 : index
    %c0_137 = arith.constant 0 : index
    %195 = vector.load %arg6[%c2_135, %c0_136, %c0_137] : memref<3x16x16xf32, #tpu.memory_space<vmem>>, vector<1x16x16xf32>
    %196 = vector.shape_cast %195 : vector<1x16x16xf32> to vector<16x16xf32>
    %cst_138 = arith.constant dense<0.000000e+00> : vector<16x16xf32>
    %197 = tpu.matmul %179, %196, %cst_138 {dimension_numbers = #tpu.dot_dimension_numbers<[1], [0], [0], [1], [0, 0, 1, 1], [], []>} : vector<16x16xf32>, vector<16x16xf32>, vector<16x16xf32> -> vector<16x16xf32>
    %c2_139 = arith.constant 2 : index
    %c0_140 = arith.constant 0 : index
    %c0_141 = arith.constant 0 : index
    %198 = vector.load %arg8[%c2_139, %c0_140, %c0_141] : memref<3x1x16xf32, #tpu.memory_space<vmem>>, vector<1x1x16xf32>
    %199 = vector.shape_cast %198 : vector<1x1x16xf32> to vector<1x16xf32>
    %200 = vector.broadcast %199 : vector<1x16xf32> to vector<16x16xf32>
    %201 = arith.addf %197, %200 : vector<16x16xf32>
    %202 = vector.extract_strided_slice %120 {offsets = [16, 0], sizes = [16, 16], strides = [1, 1]} : vector<32x16xf32> to vector<16x16xf32>
    %203 = arith.addf %202, %187 : vector<16x16xf32>
    %204 = arith.negf %203 : vector<16x16xf32>
    %205 = math.exp %204 : vector<16x16xf32>
    %cst_142 = arith.constant 1.000000e+00 : f32
    %206 = vector.broadcast %cst_142 : f32 to vector<16x16xf32>
    %207 = arith.addf %206, %205 : vector<16x16xf32>
    %208 = arith.divf %206, %207 : vector<16x16xf32>
    %209 = vector.extract_strided_slice %127 {offsets = [16, 0], sizes = [16, 16], strides = [1, 1]} : vector<32x16xf32> to vector<16x16xf32>
    %210 = arith.addf %209, %194 : vector<16x16xf32>
    %211 = arith.negf %210 : vector<16x16xf32>
    %212 = math.exp %211 : vector<16x16xf32>
    %cst_143 = arith.constant 1.000000e+00 : f32
    %213 = vector.broadcast %cst_143 : f32 to vector<16x16xf32>
    %214 = arith.addf %213, %212 : vector<16x16xf32>
    %215 = arith.divf %213, %214 : vector<16x16xf32>
    %216 = vector.extract_strided_slice %134 {offsets = [16, 0], sizes = [16, 16], strides = [1, 1]} : vector<32x16xf32> to vector<16x16xf32>
    %217 = arith.mulf %208, %201 : vector<16x16xf32>
    %218 = arith.addf %216, %217 : vector<16x16xf32>
    %219 = math.tanh %218 : vector<16x16xf32>
    %cst_144 = arith.constant 1.000000e+00 : f32
    %220 = vector.broadcast %cst_144 : f32 to vector<16x16xf32>
    %221 = arith.subf %220, %215 : vector<16x16xf32>
    %222 = arith.mulf %221, %219 : vector<16x16xf32>
    %223 = arith.mulf %215, %179 : vector<16x16xf32>
    %224 = arith.addf %222, %223 : vector<16x16xf32>
    %c16_145 = arith.constant 16 : index
    %c0_146 = arith.constant 0 : index
    %225 = vector.load %arg9[%c16_145, %c0_146] : memref<32x16xf32, #tpu.memory_space<vmem>>, vector<16x16xf32>
    tpu.vector_store %arg9[%c16_145, %c0_146], %224 {strides = array<i32>} : memref<32x16xf32, #tpu.memory_space<vmem>>, vector<16x16xf32>,
    return
  }
}

</mosaic_0001>

<bundles_post_ra>
// kernel: _lambda_.3
= control target key start
LH: loop header
LB: loop body
LE: loop exit
PB: predicated region body
PF: predicated region fallthrough
CT: control target
= control target key end

     0   :  { %vm60_vm0 = vcmask 1040384   ;;  %vm47_vm1 = vcmask 203776   ;;  %v2305_v16 = vmov 0.0   ;;  %vm360_vm2 = vcmask 130048   ;;  %s2736_s1 = inlined_call_operand.vmem [shape: f32[3,25,16], index: 1, kind: input, shape index: {}]   ;;  %s2737_s0 = inlined_call_operand.vmem [shape: f32[32,25], index: 0, kind: input, shape index: {}]   ;;  %s2738_s2 = inlined_call_operand.vmem [shape: f32[3,16,16], index: 2, kind: input, shape index: {}]   ;;  %s2739_s5 = inlined_call_operand.vmem [shape: f32[3,16,16], index: 5, kind: input, shape index: {}]   ;;  %s2740_s3 = inlined_call_operand.vmem [shape: f32[3,1,16], index: 3, kind: input, shape index: {}]   ;;  %s2741_s4 = inlined_call_operand.vmem [shape: f32[3,1,16], index: 4, kind: input, shape index: {}]   ;;  %s2742_s6 = inlined_call_operand.vmem [shape: f32[3,16,16], index: 6, kind: input, shape index: {}]   ;;  %s2743_s7 = inlined_call_operand.vmem [shape: f32[3,1,16], index: 7, kind: input, shape index: {}]   ;;  %s2744_s8 = inlined_call_operand.vmem [shape: f32[3,1,16], index: 8, kind: input, shape index: {}]   ;;  %s2745_s9 = inlined_call_operand.vmem [shape: f32[32,16], index: 9, kind: output, shape index: {}]  }
   0x1   :  { %v1874_v0 = vld [vmem:[%s2736_s1 + $0x38] sm:$0x1]  ;;  %v1873_v1 = vld [vmem:[%s2736_s1 + $0x30] sm:$0xff]  ;;  %v32_v3 = vld [vmem:[%s2737_s0] sm:$0xff] }
   0x2   :  { %2082 = vmatprep.subr.msk.mxu1 %vm60_vm0, %v1874_v0  ;;  %v39_v2 = vld [vmem:[%s2736_s1 + $0x18] sm:$0x1]  ;;  %v1872_v4 = vld [vmem:[%s2736_s1 + $0x28] sm:$0xff]  ;;  %v38_v5 = vld [vmem:[%s2736_s1 + $0x10] sm:$0xff]  ;;  %2090 = vmatprep.mubr.msk.f32.mxu1 %vm47_vm1, %v32_v3 }
   0x3   :  { %2083 = vmatpush3.msk.msra.mxu1 %vm60_vm0, %v1874_v0  ;;  %2068 = vmatprep.subr.msk.mxu0 %vm60_vm0, %v39_v2  ;;  %v1871_v6 = vld [vmem:[%s2736_s1 + $0x20] sm:$0xff]  ;;  %v37_v7 = vld [vmem:[%s2736_s1 + $0x8] sm:$0xff]  ;;  %v34_v10 = vld [vmem:[%s2737_s0 + $0x10] sm:$0xff] }
   0x4   :  { %2084 = vmatprep.subr.mxu1 %v1873_v1  ;;  %2069 = vmatpush3.msk.msra.mxu0 %vm60_vm0, %v39_v2  ;;  %v33_v8 = vld [vmem:[%s2737_s0 + $0x8] sm:$0xff]  ;;  %v351_v11 = vld [vmem:[%s2738_s2] sm:$0xff]  ;;  %v35_v13 = vld [vmem:[%s2737_s0 + $0x18] sm:$0xff] }
   0x5   :  { %2085 = vmatpush3.msra.mxu1 %v1873_v1  ;;  %2070 = vmatprep.subr.mxu0 %v38_v5  ;;  %v352_v9 = vld [vmem:[%s2738_s2 + $0x8] sm:$0xff]  ;;  %v36_v12 = vld [vmem:[%s2736_s1] sm:$0xff]  ;;  %v1895_v14 = vld [vmem:[%s2738_s2 + $0x18] sm:$0xff] }
   0x6   :  { %2086 = vmatprep.subr.mxu1 %v1872_v4  ;;  %2071 = vmatpush3.msra.mxu0 %v38_v5  ;;  %v1885_v15 = vld [vmem:[%s2736_s1 + $0x58] sm:$0x1]  ;;  %v1884_v17 = vld [vmem:[%s2736_s1 + $0x50] sm:$0xff]  ;;  %v1883_v19 = vld [vmem:[%s2736_s1 + $0x48] sm:$0xff] }
   0x7   :  { %2087 = vmatpush3.msra.mxu1 %v1872_v4  ;;  %2072 = vmatprep.subr.mxu0 %v37_v7  ;;  %v1894_v18 = vld [vmem:[%s2738_s2 + $0x10] sm:$0xff]  ;;  %v1882_v20 = vld [vmem:[%s2736_s1 + $0x40] sm:$0xff]  ;;  %v2438_v21 = vld [vmem:[%s2738_s2 + $0x28] sm:$0xff] }
   0x8   :  { %2088 = vmatprep.subr.mxu1 %v1871_v6  ;;  %2073 = vmatpush3.msra.mxu0 %v37_v7  ;;  %v2443_v22 = vld [vmem:[%s2738_s2 + $0x20] sm:$0xff]  ;;  %v2458_v23 = vld [vmem:[%s2739_s5 + $0x8] sm:$0xff] }
   0x9   :  { %2089 = vmatpush3.msra.mxu1 %v1871_v6  ;;  %2074 = vmatprep.subr.mxu0 %v36_v12  ;;  %v1876_v26 = vld [vmem:[%s2740_s3 + $0x1] ss:$0 sm:$0xff]  ;;  %v1865_v28 = vld [vmem:[%s2740_s3] ss:$0 sm:$0xff]  ;;  %v1887_v60 = vld [vmem:[%s2740_s3 + $0x2] ss:$0 sm:$0xff] }
   0xa   :  { %2091 = vmatmul.mubr.msk.f32.vlgmr.msra.gmra.mxu1 %vm47_vm1, %v33_v8  ;;  %2110 = vmatprep.subr.mxu1 %v352_v9  ;;  %v2472_v32 = vld [vmem:[%s2741_s4] ss:$0 sm:$0xff]  ;;  %v2480_v39 = vld [vmem:[%s2741_s4 + $0x1] ss:$0 sm:$0xff] }
   0xb   :  { %2111 = vmatpush3.msra.mxu1 %v352_v9  ;;  %2093 = vmatprep.mubr.msk.f32.mxu1 %vm47_vm1, %v34_v10 }
   0xc   :  { %2112 = vmatprep.subr.mxu1 %v351_v11  ;;  %2075 = vmatpush3.msra.mxu0 %v36_v12 }
   0xd   :  { %2113 = vmatpush3.msra.mxu1 %v351_v11  ;;  %2076 = vmatprep.mubr.msk.f32.mxu0 %vm47_vm1, %v32_v3 }
   0xe   :  { %2094 = vmatmul.mubr.msk.f32.gmra.mxu1 %vm47_vm1, %v35_v13  ;;  %2077 = vmatmul.mubr.msk.f32.vlgmr.msra.gmra.mxu0 %vm47_vm1, %v33_v8 }
   0xf   :  { %2114 = vmatprep.mubr.f32.mxu1 %v2305_v16  ;;  %2117 = vmatprep.subr.mxu1 %v1895_v14 }
  0x10   :  { %2096 = vmatprep.subr.msk.mxu0 %vm60_vm0, %v1885_v15  ;;  %2079 = vmatprep.mubr.msk.f32.mxu0 %vm47_vm1, %v34_v10 }
  0x11   :  { %2097 = vmatpush3.msk.msra.mxu0 %vm60_vm0, %v1885_v15 }
  0x12   :  { %2115 = vmatmul.mubr.f32.vlgmr.msra.gmra.mxu1 %v2305_v16  ;;  %2098 = vmatprep.subr.mxu0 %v1884_v17 }
  0x13   :  { %2118 = vmatpush3.msra.mxu1 %v1895_v14  ;;  %2121 = vmatprep.mubr.f32.mxu1 %v2305_v16 }
  0x14   :  { %2119 = vmatprep.subr.mxu1 %v1894_v18  ;;  %2099 = vmatpush3.msra.mxu0 %v1884_v17 }
  0x15   :  { %2120 = vmatpush3.msra.mxu1 %v1894_v18  ;;  %2080 = vmatmul.mubr.msk.f32.gmra.mxu0 %vm47_vm1, %v35_v13 }
  0x16   :  { %2122 = vmatmul.mubr.f32.vlgmr.msra.gmra.mxu1 %v2305_v16  ;;  %2100 = vmatprep.subr.mxu0 %v1883_v19 }
  0x17   :  { %2101 = vmatpush3.msra.mxu0 %v1883_v19  ;;  %2104 = vmatprep.mubr.msk.f32.mxu0 %vm47_vm1, %v32_v3 }
  0x18   :  { %2102 = vmatprep.subr.mxu0 %v1882_v20  ;;  %2131 = vmatprep.subr.mxu1 %v352_v9 }
  0x19   :  { %2103 = vmatpush3.msra.mxu0 %v1882_v20  ;;  %2132 = vmatpush3.msra.mxu1 %v352_v9  ;;  %v2499_v9 = vld [vmem:[%s2741_s4 + $0x2] ss:$0 sm:$0xff] }
  0x1a   :  { %2105 = vmatmul.mubr.msk.f32.vlgmr.msra.gmra.mxu0 %vm47_vm1, %v33_v8  ;;  %2124 = vmatprep.subr.mxu0 %v2438_v21 }
  0x1b   :  { %2125 = vmatpush3.msra.mxu0 %v2438_v21  ;;  %2107 = vmatprep.mubr.msk.f32.mxu0 %vm47_vm1, %v34_v10 }
  0x1c   :  { %2126 = vmatprep.subr.mxu0 %v2443_v22  ;;  %2133 = vmatprep.subr.mxu1 %v351_v11 }
  0x1d   :  { %2127 = vmatpush3.msra.mxu0 %v2443_v22  ;;  %2134 = vmatpush3.msra.mxu1 %v351_v11 }
  0x1e   :  { %2108 = vmatmul.mubr.msk.f32.gmra.mxu0 %vm47_vm1, %v35_v13  ;;  %2138 = vmatprep.subr.mxu0 %v1895_v14 }
  0x1f   :  { %2128 = vmatprep.mubr.f32.mxu0 %v2305_v16  ;;  %2145 = vmatprep.subr.mxu1 %v2438_v21 }
  0x22   :  { %2129 = vmatmul.mubr.f32.vlgmr.msra.gmra.mxu0 %v2305_v16 }
  0x23   :  { %2139 = vmatpush3.msra.mxu0 %v1895_v14 }
  0x24   :  { %2140 = vmatprep.subr.mxu0 %v1894_v18 }
  0x25   :  { %2141 = vmatpush3.msra.mxu0 %v1894_v18 }
  0x26   :  { %2152 = vmatprep.subr.mxu0 %v2458_v23 }
  0xca   :  { %v2092_v24 = vpop.f32.mrf.mxu1 }
  0xcb   :  { %v237_v52 = vadd.f32 %v2092_v24, %v1876_v26 }
  0xcc   :  { %v231_v25 = vpop.f32.mrf.mxu1 }
  0xcd   :  { %v232_v56 = vadd.f32 %v1876_v26, %v231_v25 }
  0xce   :  { %v2095_v27 = vpop.f32.mrf.mxu1  ;;  %v2078_v30 = vpop.f32.mrf.mxu0 }
  0xcf   :  { %v2467_v29 = vadd.f32 %v2095_v27, %v1876_v26  ;;  %v136_v34 = vadd.f32 %v2078_v30, %v1865_v28 }
  0xd0   :  { %v241_v31 = vpop.f32.mrf.mxu1  ;;  %v130_v36 = vpop.f32.mrf.mxu0 }
  0xd1   :  { %v2474_v33 = vadd.f32 %v1876_v26, %v241_v31  ;;  %v131_v41 = vadd.f32 %v1865_v28, %v130_v36 }
  0xd2   :  { %v2116_v35 = vpop.f32.mrf.mxu1 }
  0xd3   :  { %v436_v37 = vadd.f32 %v2116_v35, %v2472_v32 }
  0xd4   :  { %v430_v38 = vpop.f32.mrf.mxu1 }
  0xd5   :  { %v612_v40 = vadd.f32 %v436_v37, %v136_v34  ;;  %v431_v42 = vadd.f32 %v2472_v32, %v430_v38  ;;  %v2081_v43 = vpop.f32.mrf.mxu0 }
  0xd6   :  { %v2123_v44 = vpop.f32.mrf.mxu1  ;;  %v2483_v45 = vadd.f32 %v2081_v43, %v1865_v28 }
  0xd7   :  { %v1903_v46 = vmul.f32 -1.442695, %v612_v40  ;;  %v611_v47 = vadd.f32 %v431_v42, %v131_v41  ;;  %v522_v48 = vadd.f32 %v2123_v44, %v2480_v39  ;;  %v140_v49 = vpop.f32.mrf.mxu0  ;;  %v961_v44 = vld [vmem:[%s2739_s5] sm:$0xff] }
  0xd8   :  { %v516_v50 = vpop.f32.mrf.mxu1  ;;  %v2486_v51 = vadd.f32 %v1865_v28, %v140_v49  ;;  %v2561_v49 = vld [vmem:[%s2742_s6] sm:$0xff] }
  0xd9   :  { %2225 = vpow2.f32 %v1903_v46  ;;  %v1902_v53 = vmul.f32 -1.442695, %v611_v47  ;;  %v517_v54 = vadd.f32 %v2480_v39, %v516_v50  ;;  %v626_v57 = vadd.f32 %v522_v48, %v237_v52  ;;  %v1931_v46 = vld [vmem:[%s2739_s5 + $0x18] sm:$0xff]  ;;  %v1930_v47 = vld [vmem:[%s2739_s5 + $0x10] sm:$0xff]  ;;  %v1939_v48 = vld [vmem:[%s2739_s5 + $0x28] sm:$0xff] }
  0xda   :  { %v2106_v55 = vpop.f32.mrf.mxu0  ;;  %v1938_v50 = vld [vmem:[%s2739_s5 + $0x20] sm:$0xff]  ;;  %v2571_v52 = vld [vmem:[%s2742_s6 + $0x18] sm:$0xff] }
  0xdb   :  { %2227 = vpow2.f32 %v1902_v53  ;;  %v625_v59 = vadd.f32 %v517_v54, %v232_v56  ;;  %v1905_v62 = vmul.f32 -1.442695, %v626_v57  ;;  %v338_v17 = vadd.f32 %v2106_v55, %v1887_v60  ;;  %v2577_v53 = vld [vmem:[%s2742_s6 + $0x28] sm:$0xff] }
  0xdc   :  { %v332_v58 = vpop.f32.mrf.mxu0 }
  0xdd   :  { %v1904_v1 = vmul.f32 -1.442695, %v625_v59  ;;  %2229 = vpow2.f32 %v1905_v62  ;;  %v333_v24 = vadd.f32 %v1887_v60, %v332_v58 }
  0xde   :  { %v2109_v61 = vpop.f32.mrf.mxu0 }
  0xdf   :  { %v2492_v63 = vadd.f32 %v2109_v61, %v1887_v60  ;;  %2231 = vpow2.f32 %v1904_v1 }
  0xe0   :  { %v342_v0 = vpop.f32.mrf.mxu0 }
  0xe1   :  { %v2494_v2 = vadd.f32 %v1887_v60, %v342_v0 }
  0xe2   :  { %v2130_v8 = vpop.f32.mrf.mxu0 }
  0xe3   :  { %v608_v12 = vadd.f32 %v2130_v8, %v2499_v9 }
  0xe4   :  { %v602_v13 = vpop.f32.mrf.mxu0 }
  0xe5   :  { %v603_v19 = vadd.f32 %v2499_v9, %v602_v13 }
  0xe6   :  { %v2226_v3 = vpop.eup %2225 }
  0xe7   :  { %v620_v4 = vadd.f32 1.0, %v2226_v3 }
  0xe8   :  { %v2228_v5 = vpop.eup %2227 }
  0xe9   :  { %2233 = vrcp.f32 %v620_v4  ;;  %v619_v6 = vadd.f32 1.0, %v2228_v5 }
  0xea   :  { %v2230_v7 = vpop.eup %2229 }
  0xeb   :  { %2235 = vrcp.f32 %v619_v6  ;;  %v634_v11 = vadd.f32 1.0, %v2230_v7 }
  0xec   :  { %v2232_v10 = vpop.eup %2231 }
  0xed   :  { %v633_v14 = vadd.f32 1.0, %v2232_v10  ;;  %2237 = vrcp.f32 %v634_v11 }
  0xef   :  { %2239 = vrcp.f32 %v633_v14 }
  0xf6   :  { %v2234_v15 = vpop.eup %2233 }
  0xf7   :  { %v640_v18 = vmul.f32 %v2234_v15, %v608_v12 }
  0xf8   :  { %v2236_v20 = vpop.eup %2235 }
  0xf9   :  { %v642_v25 = vadd.f32 %v640_v18, %v338_v17  ;;  %v639_v26 = vmul.f32 %v2236_v20, %v603_v19 }
  0xfa   :  { %v2238_v28 = vpop.eup %2237 }
  0xfb   :  { %2241 = vtanh.f32 %v642_v25  ;;  %v641_v27 = vadd.f32 %v639_v26, %v333_v24  ;;  %v646_v31 = vsub.f32 1.0, %v2238_v28  ;;  %v650_v37 = vmul.f32 0.0, %v2238_v28 }
  0xfc   :  { %v2240_v30 = vpop.eup %2239 }
  0xfd   :  { %2243 = vtanh.f32 %v641_v27  ;;  %v645_v35 = vsub.f32 1.0, %v2240_v30  ;;  %v649_v41 = vmul.f32 0.0, %v2240_v30 }
 0x108   :  { %v2242_v34 = vpop.eup %2241 }
 0x109   :  { %v648_v36 = vmul.f32 %v2242_v34, %v646_v31 }
 0x10a   :  { %v2244_v38 = vpop.eup %2243 }
 0x10b   :  { %v647_v40 = vmul.f32 %v2244_v38, %v645_v35  ;;  %v2503_v42 = vadd.f32 %v650_v37, %v648_v36 }
 0x10d   :  { %v2505_v43 = vadd.f32 %v649_v41, %v647_v40  ;;  %654 = vst.msk [vmem:[#allocation2 + $0x8] sm:$0xff] %vm360_vm2, %v2503_v42  ;;  %v1947_v40 = vld [vmem:[%s2742_s6 + $0x10] sm:$0xff]  ;;  %v2615_v41 = vld [vmem:[%s2742_s6 + $0x20] sm:$0xff] }
 0x10f   :  { %653 = vst.msk [vmem:[#allocation2] sm:$0xff] %vm360_vm2, %v2505_v43  ;;  %2135 = vmatprep.mubr.msk.f32.mxu1 %vm360_vm2, %v2505_v43  ;;  %2142 = vmatprep.mubr.msk.f32.mxu0 %vm360_vm2, %v2505_v43 }
 0x110   :  { %2136 = vmatmul.mubr.msk.f32.vlgmr.msra.gmra.mxu1 %vm360_vm2, %v2503_v42  ;;  %2143 = vmatmul.mubr.msk.f32.vlgmr.msra.gmra.mxu0 %vm360_vm2, %v2503_v42 }
 0x111   :  { %2146 = vmatpush3.msra.mxu1 %v2438_v21  ;;  %2149 = vmatprep.mubr.msk.f32.mxu1 %vm360_vm2, %v2505_v43 }
 0x112   :  { %2147 = vmatprep.subr.mxu1 %v2443_v22  ;;  %2153 = vmatpush3.msra.mxu0 %v2458_v23 }
 0x113   :  { %2148 = vmatpush3.msra.mxu1 %v2443_v22  ;;  %2154 = vmatprep.subr.mxu0 %v961_v44  ;;  %v2551_v22 = vld [vmem:[%s2742_s6 + $0x8] sm:$0xff] }
 0x114   :  { %2150 = vmatmul.mubr.msk.f32.vlgmr.msra.gmra.mxu1 %vm360_vm2, %v2503_v42  ;;  %2162 = vmatprep.subr.mxu1 %v1931_v46  ;;  %v2540_v23 = vld [vmem:[#allocation2 + $0x8] sm:$0xff] }
 0x115   :  { %2163 = vmatpush3.msra.mxu1 %v1931_v46  ;;  %2155 = vmatpush3.msra.mxu0 %v961_v44 }
 0x116   :  { %2164 = vmatprep.subr.mxu1 %v1930_v47  ;;  %v2536_v21 = vld [vmem:[#allocation2] sm:$0xff]  ;;  %2172 = vmatprep.subr.mxu0 %v1939_v48 }
 0x117   :  { %2156 = vmatprep.mubr.msk.f32.mxu0 %vm360_vm2, %v2536_v21  ;;  %2165 = vmatpush3.msra.mxu1 %v1930_v47 }
 0x118   :  { %2166 = vmatprep.mubr.msk.f32.mxu1 %vm360_vm2, %v2536_v21  ;;  %2157 = vmatmul.mubr.msk.f32.vlgmr.msra.gmra.mxu0 %vm360_vm2, %v2540_v23 }
 0x119   :  { %2167 = vmatmul.mubr.msk.f32.vlgmr.msra.gmra.mxu1 %vm360_vm2, %v2540_v23  ;;  %2182 = vmatprep.subr.mxu1 %v2551_v22 }
 0x11a   :  { %2183 = vmatpush3.msra.mxu1 %v2551_v22  ;;  %2173 = vmatpush3.msra.mxu0 %v1939_v48  ;;  %v2647_v48 = vld [vmem:[%s2744_s8] ss:$0 sm:$0xff] }
 0x11b   :  { %2184 = vmatprep.subr.mxu1 %v2561_v49  ;;  %2174 = vmatprep.subr.mxu0 %v1938_v50 }
 0x11c   :  { %2185 = vmatpush3.msra.mxu1 %v2561_v49  ;;  %2175 = vmatpush3.msra.mxu0 %v1938_v50 }
 0x11d   :  { %2189 = vmatprep.subr.mxu1 %v2571_v52  ;;  %2196 = vmatprep.subr.mxu0 %v2577_v53 }
 0x1d0   :  { %v2137_v54 = vpop.f32.mrf.mxu1  ;;  %v2144_v55 = vpop.f32.mrf.mxu0 }
 0x1d1   :  { %v742_v56 = vadd.f32 %v2137_v54, %v2472_v32  ;;  %v826_v62 = vadd.f32 %v2144_v55, %v2480_v39 }
 0x1d2   :  { %v736_v57 = vpop.f32.mrf.mxu1  ;;  %v820_v60 = vpop.f32.mrf.mxu0 }
 0x1d3   :  { %v914_v58 = vadd.f32 %v742_v56, %v2483_v45  ;;  %v737_v59 = vadd.f32 %v2472_v32, %v736_v57  ;;  %v821_v3 = vadd.f32 %v2480_v39, %v820_v60  ;;  %v928_v4 = vadd.f32 %v826_v62, %v2467_v29  ;;  %v2654_v57 = vld [vmem:[%s2744_s8 + $0x1] ss:$0 sm:$0xff]  ;;  %v1941_v62 = vld [vmem:[%s2743_s7 + $0x2] ss:$0 sm:$0xff] }
 0x1d4   :  { %v2151_v11 = vpop.f32.mrf.mxu1 }
 0x1d5   :  { %v1922_v61 = vmul.f32 -1.442695, %v914_v58  ;;  %v913_v0 = vadd.f32 %v737_v59, %v2486_v51  ;;  %v927_v5 = vadd.f32 %v821_v3, %v2474_v33  ;;  %v1924_v6 = vmul.f32 -1.442695, %v928_v4 }
 0x1d6   :  { %v904_v39 = vpop.f32.mrf.mxu1  ;;  %v910_v29 = vadd.f32 %v2151_v11, %v2499_v9 }
 0x1d7   :  { %2245 = vpow2.f32 %v1922_v61  ;;  %v1921_v1 = vmul.f32 -1.442695, %v913_v0  ;;  %v1923_v7 = vmul.f32 -1.442695, %v927_v5  ;;  %v905_v17 = vadd.f32 %v2499_v9, %v904_v39  ;;  %v2661_v61 = vld [vmem:[%s2743_s7 + $0x1] ss:$0 sm:$0xff] }
 0x1d9   :  { %2247 = vpow2.f32 %v1921_v1 }
 0x1da   :  { %2249 = vpow2.f32 %v1924_v6 }
 0x1db   :  { %2251 = vpow2.f32 %v1923_v7 }
 0x1e4   :  { %v2246_v32 = vpop.eup %2245 }
 0x1e5   :  { %v922_v45 = vadd.f32 1.0, %v2246_v32 }
 0x1e6   :  { %v2248_v8 = vpop.eup %2247 }
 0x1e7   :  { %2253 = vrcp.f32 %v922_v45  ;;  %v921_v10 = vadd.f32 1.0, %v2248_v8  ;;  %v2250_v51 = vpop.eup %2249 }
 0x1e8   :  { %v2252_v12 = vpop.eup %2251  ;;  %v936_v13 = vadd.f32 1.0, %v2250_v51 }
 0x1e9   :  { %2255 = vrcp.f32 %v921_v10  ;;  %v935_v14 = vadd.f32 1.0, %v2252_v12 }
 0x1ea   :  { %2257 = vrcp.f32 %v936_v13 }
 0x1eb   :  { %2259 = vrcp.f32 %v935_v14 }
 0x1f4   :  { %v2254_v15 = vpop.eup %2253 }
 0x1f5   :  { %v942_v33 = vmul.f32 %v2254_v15, %v910_v29 }
 0x1f6   :  { %v2256_v18 = vpop.eup %2255 }
 0x1f7   :  { %v944_v19 = vadd.f32 %v942_v33, %v2492_v63  ;;  %v941_v20 = vmul.f32 %v2256_v18, %v905_v17  ;;  %v2258_v25 = vpop.eup %2257 }
 0x1f8   :  { %v2260_v26 = vpop.eup %2259  ;;  %v948_v27 = vsub.f32 1.0, %v2258_v25  ;;  %v952_v30 = vmul.f32 %v2258_v25, %v2503_v42  ;;  %v2158_v42 = vpop.f32.mrf.mxu0 }
 0x1f9   :  { %2261 = vtanh.f32 %v944_v19  ;;  %v943_v24 = vadd.f32 %v941_v20, %v2494_v2  ;;  %v947_v34 = vsub.f32 1.0, %v2260_v26  ;;  %v951_v9 = vmul.f32 %v2260_v26, %v2505_v43  ;;  %v2168_v43 = vpop.f32.mrf.mxu1  ;;  %v2677_v20 = vld [vmem:[%s2744_s8 + $0x2] ss:$0 sm:$0xff] }
 0x1fa   :  { %v1048_v44 = vpop.f32.mrf.mxu0  ;;  %v1150_v45 = vadd.f32 %v2168_v43, %v2661_v61 }
 0x1fb   :  { %2263 = vtanh.f32 %v943_v24  ;;  %v1144_v46 = vpop.f32.mrf.mxu1 }
 0x1fc   :  { %v1145_v11 = vadd.f32 %v2661_v61, %v1144_v46 }
 0x206   :  { %v2262_v28 = vpop.eup %2261 }
 0x207   :  { %v950_v31 = vmul.f32 %v2262_v28, %v948_v27 }
 0x208   :  { %v2264_v35 = vpop.eup %2263 }
 0x209   :  { %v954_v36 = vadd.f32 %v952_v30, %v950_v31  ;;  %v949_v37 = vmul.f32 %v2264_v35, %v947_v34 }
 0x20b   :  { %956 = vst.msk [vmem:[#allocation2 + $0x18] sm:$0xff] %vm360_vm2, %v954_v36  ;;  %v953_v63 = vadd.f32 %v951_v9, %v949_v37 }
 0x20d   :  { %955 = vst.msk [vmem:[#allocation2 + $0x10] sm:$0xff] %vm360_vm2, %v953_v63 }
 0x212   :  { %v960_v38 = vld [vmem:[#allocation2 + $0x18] sm:$0xff] }
 0x214   :  { %v959_v2 = vld [vmem:[#allocation2 + $0x10] sm:$0xff] }
 0x215   :  { %2159 = vmatprep.mubr.msk.f32.mxu0 %vm360_vm2, %v959_v2  ;;  %2169 = vmatprep.mubr.msk.f32.mxu1 %vm360_vm2, %v959_v2 }
 0x216   :  { %2160 = vmatmul.mubr.msk.f32.gmra.mxu0 %vm360_vm2, %v960_v38  ;;  %2170 = vmatmul.mubr.msk.f32.gmra.mxu1 %vm360_vm2, %v960_v38 }
 0x217   :  { %2176 = vmatprep.mubr.msk.f32.mxu0 %vm360_vm2, %v2536_v21  ;;  %2186 = vmatprep.mubr.f32.mxu1 %v2305_v16 }
 0x21a   :  { %2177 = vmatmul.mubr.msk.f32.vlgmr.msra.gmra.mxu0 %vm360_vm2, %v2540_v23  ;;  %2187 = vmatmul.mubr.f32.vlgmr.msra.gmra.mxu1 %v2305_v16 }
 0x21b   :  { %2179 = vmatprep.mubr.msk.f32.mxu0 %vm360_vm2, %v959_v2  ;;  %2190 = vmatpush3.msra.mxu1 %v2571_v52 }
 0x21c   :  { %2191 = vmatprep.subr.mxu1 %v1947_v40  ;;  %2193 = vmatprep.mubr.f32.mxu1 %v2305_v16 }
 0x21d   :  { %2192 = vmatpush3.msra.mxu1 %v1947_v40  ;;  %2197 = vmatpush3.msra.mxu0 %v2577_v53 }
 0x21e   :  { %2180 = vmatmul.mubr.msk.f32.gmra.mxu0 %vm360_vm2, %v960_v38  ;;  %2194 = vmatmul.mubr.f32.vlgmr.msra.gmra.mxu1 %v2305_v16 }
 0x21f   :  { %2198 = vmatprep.subr.mxu0 %v2615_v41  ;;  %2200 = vmatprep.mubr.f32.mxu0 %v2305_v16 }
 0x220   :  { %2199 = vmatpush3.msra.mxu0 %v2615_v41  ;;  %2203 = vmatprep.subr.mxu1 %v2551_v22 }
 0x221   :  { %2210 = vmatprep.subr.mxu0 %v2571_v52  ;;  %2204 = vmatpush3.msra.mxu1 %v2551_v22 }
 0x222   :  { %2201 = vmatmul.mubr.f32.vlgmr.msra.gmra.mxu0 %v2305_v16  ;;  %2205 = vmatprep.subr.mxu1 %v2561_v49  ;;  %v2638_v16 = vld [vmem:[%s2743_s7] ss:$0 sm:$0xff] }
 0x223   :  { %2211 = vmatpush3.msra.mxu0 %v2571_v52  ;;  %2206 = vmatpush3.msra.mxu1 %v2561_v49  ;;  %v1054_v52 = vadd.f32 %v2158_v42, %v2638_v16  ;;  %v1049_v58 = vadd.f32 %v2638_v16, %v1048_v44 }
 0x224   :  { %2212 = vmatprep.subr.mxu0 %v1947_v40  ;;  %2217 = vmatprep.subr.mxu1 %v2577_v53 }
 0x225   :  { %2213 = vmatpush3.msra.mxu0 %v1947_v40 }
 0x2d6   :  { %v2631_v47 = vpop.f32.mrf.mxu0  ;;  %v2633_v21 = vpop.f32.mrf.mxu1 }
 0x2d8   :  { %v2640_v23 = vpop.f32.mrf.mxu0  ;;  %v2642_v22 = vpop.f32.mrf.mxu1 }
 0x2da   :  { %v2178_v49 = vpop.f32.mrf.mxu0  ;;  %v2188_v50 = vpop.f32.mrf.mxu1 }
 0x2db   :  { %v1340_v54 = vadd.f32 %v2188_v50, %v2647_v48  ;;  %v1246_v31 = vadd.f32 %v2178_v49, %v1941_v62 }
 0x2dc   :  { %v1240_v55 = vpop.f32.mrf.mxu0  ;;  %v1334_v56 = vpop.f32.mrf.mxu1 }
 0x2dd   :  { %v1516_v59 = vadd.f32 %v1340_v54, %v1054_v52  ;;  %v1335_v60 = vadd.f32 %v2647_v48, %v1334_v56  ;;  %v1241_v36 = vadd.f32 %v1941_v62, %v1240_v55 }
 0x2de   :  { %v2181_v0 = vpop.f32.mrf.mxu0  ;;  %v2195_v1 = vpop.f32.mrf.mxu1 }
 0x2df   :  { %v1956_v3 = vmul.f32 -1.442695, %v1516_v59  ;;  %v1515_v4 = vadd.f32 %v1335_v60, %v1049_v58  ;;  %v2666_v5 = vadd.f32 %v2181_v0, %v1941_v62  ;;  %v1426_v6 = vadd.f32 %v2195_v1, %v2654_v57 }
 0x2e0   :  { %v1250_v7 = vpop.f32.mrf.mxu0  ;;  %v1420_v32 = vpop.f32.mrf.mxu1  ;;  %v1064_v60 = vadd.f32 %v2631_v47, %v2638_v16 }
 0x2e1   :  { %2265 = vpow2.f32 %v1956_v3  ;;  %v1955_v8 = vmul.f32 -1.442695, %v1515_v4  ;;  %v2670_v10 = vadd.f32 %v1941_v62, %v1250_v7  ;;  %v1421_v51 = vadd.f32 %v2654_v57, %v1420_v32 }
 0x2e2   :  { %v1530_v12 = vadd.f32 %v1426_v6, %v1150_v45  ;;  %v2202_v19 = vpop.f32.mrf.mxu0  ;;  %v1160_v32 = vadd.f32 %v2633_v21, %v2661_v61 }
 0x2e3   :  { %2267 = vpow2.f32 %v1955_v8  ;;  %v1529_v13 = vadd.f32 %v1421_v51, %v1145_v11  ;;  %v1512_v26 = vadd.f32 %v2202_v19, %v2677_v20  ;;  %v1155_v8 = vadd.f32 %v2661_v61, %v2642_v22 }
 0x2e4   :  { %v1958_v39 = vmul.f32 -1.442695, %v1530_v12  ;;  %v1506_v27 = vpop.f32.mrf.mxu0 }
 0x2e5   :  { %v1957_v14 = vmul.f32 -1.442695, %v1529_v13  ;;  %v1507_v35 = vadd.f32 %v2677_v20, %v1506_v27 }
 0x2e6   :  { %2269 = vpow2.f32 %v1958_v39 }
 0x2e7   :  { %2271 = vpow2.f32 %v1957_v14 }
 0x2ee   :  { %v2266_v29 = vpop.eup %2265 }
 0x2ef   :  { %v1524_v15 = vadd.f32 1.0, %v2266_v29 }
 0x2f0   :  { %v2268_v33 = vpop.eup %2267 }
 0x2f1   :  { %2273 = vrcp.f32 %v1524_v15  ;;  %v1523_v17 = vadd.f32 1.0, %v2268_v33 }
 0x2f3   :  { %2275 = vrcp.f32 %v1523_v17  ;;  %v2270_v18 = vpop.eup %2269 }
 0x2f4   :  { %v2272_v24 = vpop.eup %2271  ;;  %v1538_v25 = vadd.f32 1.0, %v2270_v18 }
 0x2f5   :  { %v1537_v28 = vadd.f32 1.0, %v2272_v24 }
 0x2f6   :  { %2277 = vrcp.f32 %v1538_v25 }
 0x2f7   :  { %2279 = vrcp.f32 %v1537_v28 }
 0x2fe   :  { %v2274_v30 = vpop.eup %2273 }
 0x2ff   :  { %v1544_v34 = vmul.f32 %v2274_v30, %v1512_v26 }
 0x300   :  { %v2276_v9 = vpop.eup %2275 }
 0x301   :  { %v1546_v37 = vadd.f32 %v1544_v34, %v1246_v31  ;;  %v1543_v63 = vmul.f32 %v2276_v9, %v1507_v35 }
 0x303   :  { %2281 = vtanh.f32 %v1546_v37  ;;  %v1545_v2 = vadd.f32 %v1543_v63, %v1241_v36  ;;  %v2278_v38 = vpop.eup %2277 }
 0x304   :  { %v2280_v40 = vpop.eup %2279  ;;  %v1550_v42 = vsub.f32 1.0, %v2278_v38  ;;  %v1554_v50 = vmul.f32 0.0, %v2278_v38 }
 0x305   :  { %2283 = vtanh.f32 %v1545_v2  ;;  %v1549_v44 = vsub.f32 1.0, %v2280_v40  ;;  %v1553_v54 = vmul.f32 0.0, %v2280_v40 }
 0x310   :  { %v2282_v43 = vpop.eup %2281 }
 0x311   :  { %v1552_v46 = vmul.f32 %v2282_v43, %v1550_v42 }
 0x312   :  { %v2284_v49 = vpop.eup %2283 }
 0x313   :  { %v1551_v52 = vmul.f32 %v2284_v49, %v1549_v44  ;;  %v2681_v56 = vadd.f32 %v1554_v50, %v1552_v46 }
 0x315   :  { %v2683_v58 = vadd.f32 %v1553_v54, %v1551_v52  ;;  %1558 = vst.msk [vmem:[%s2745_s9 + $0x8] sm:$0xff] %vm360_vm2, %v2681_v56 }
 0x317   :  { %1557 = vst.msk [vmem:[%s2745_s9] sm:$0xff] %vm360_vm2, %v2683_v58  ;;  %2207 = vmatprep.mubr.msk.f32.mxu1 %vm360_vm2, %v2683_v58  ;;  %2214 = vmatprep.mubr.msk.f32.mxu0 %vm360_vm2, %v2683_v58 }
 0x318   :  { %2208 = vmatmul.mubr.msk.f32.vlgmr.msra.gmra.mxu1 %vm360_vm2, %v2681_v56  ;;  %2215 = vmatmul.mubr.msk.f32.vlgmr.msra.gmra.mxu0 %vm360_vm2, %v2681_v56 }
 0x319   :  { %2218 = vmatpush3.msra.mxu1 %v2577_v53  ;;  %2221 = vmatprep.mubr.msk.f32.mxu1 %vm360_vm2, %v2683_v58  ;;  %v1059_v53 = vadd.f32 %v2638_v16, %v2640_v23 }
 0x31a   :  { %2219 = vmatprep.subr.mxu1 %v2615_v41 }
 0x31b   :  { %2220 = vmatpush3.msra.mxu1 %v2615_v41 }
 0x31c   :  { %2222 = vmatmul.mubr.msk.f32.vlgmr.msra.gmra.mxu1 %vm360_vm2, %v2681_v56 }
 0x3d8   :  { %v2209_v55 = vpop.f32.mrf.mxu1  ;;  %v2216_v59 = vpop.f32.mrf.mxu0 }
 0x3d9   :  { %v1646_v62 = vadd.f32 %v2209_v55, %v2647_v48  ;;  %v1730_v41 = vadd.f32 %v2216_v59, %v2654_v57 }
 0x3da   :  { %v1640_v0 = vpop.f32.mrf.mxu1  ;;  %v1724_v4 = vpop.f32.mrf.mxu0 }
 0x3db   :  { %v1818_v1 = vadd.f32 %v1646_v62, %v1064_v60  ;;  %v1641_v3 = vadd.f32 %v2647_v48, %v1640_v0  ;;  %v1725_v47 = vadd.f32 %v2654_v57, %v1724_v4  ;;  %v1832_v51 = vadd.f32 %v1730_v41, %v1160_v32 }
 0x3dc   :  { %v2223_v14 = vpop.f32.mrf.mxu1 }
 0x3dd   :  { %v1975_v6 = vmul.f32 -1.442695, %v1818_v1  ;;  %v1817_v7 = vadd.f32 %v1641_v3, %v1059_v53  ;;  %v1831_v16 = vadd.f32 %v1725_v47, %v1155_v8  ;;  %v1977_v23 = vmul.f32 -1.442695, %v1832_v51 }
 0x3de   :  { %v1808_v15 = vpop.f32.mrf.mxu1  ;;  %v1814_v22 = vadd.f32 %v2223_v14, %v2677_v20 }
 0x3df   :  { %2285 = vpow2.f32 %v1975_v6  ;;  %v1974_v45 = vmul.f32 -1.442695, %v1817_v7  ;;  %v1976_v48 = vmul.f32 -1.442695, %v1831_v16  ;;  %v1809_v18 = vadd.f32 %v2677_v20, %v1808_v15 }
 0x3e1   :  { %2287 = vpow2.f32 %v1974_v45 }
 0x3e2   :  { %2289 = vpow2.f32 %v1977_v23 }
 0x3e3   :  { %2291 = vpow2.f32 %v1976_v48 }
 0x3ec   :  { %v2286_v11 = vpop.eup %2285 }
 0x3ed   :  { %v1826_v12 = vadd.f32 1.0, %v2286_v11 }
 0x3ee   :  { %v2288_v13 = vpop.eup %2287 }
 0x3ef   :  { %2293 = vrcp.f32 %v1826_v12  ;;  %v1825_v39 = vadd.f32 1.0, %v2288_v13  ;;  %v2290_v21 = vpop.eup %2289 }
 0x3f0   :  { %v2292_v29 = vpop.eup %2291  ;;  %v1840_v57 = vadd.f32 1.0, %v2290_v21 }
 0x3f1   :  { %2295 = vrcp.f32 %v1825_v39  ;;  %v1839_v33 = vadd.f32 1.0, %v2292_v29 }
 0x3f2   :  { %2297 = vrcp.f32 %v1840_v57 }
 0x3f3   :  { %2299 = vrcp.f32 %v1839_v33 }
 0x3fc   :  { %v2294_v61 = vpop.eup %2293 }
 0x3fd   :  { %v1846_v17 = vmul.f32 %v2294_v61, %v1814_v22 }
 0x3fe   :  { %v2296_v19 = vpop.eup %2295 }
 0x3ff   :  { %v1848_v24 = vadd.f32 %v1846_v17, %v2666_v5  ;;  %v1845_v25 = vmul.f32 %v2296_v19, %v1809_v18  ;;  %v2298_v27 = vpop.eup %2297 }
 0x400   :  { %v2300_v28 = vpop.eup %2299  ;;  %v1852_v30 = vsub.f32 1.0, %v2298_v27  ;;  %v1856_v34 = vmul.f32 %v2298_v27, %v2681_v56 }
 0x401   :  { %2301 = vtanh.f32 %v1848_v24  ;;  %v1847_v26 = vadd.f32 %v1845_v25, %v2670_v10  ;;  %v1851_v9 = vsub.f32 1.0, %v2300_v28  ;;  %v1855_v20 = vmul.f32 %v2300_v28, %v2683_v58 }
 0x403   :  { %2303 = vtanh.f32 %v1847_v26 }
 0x40e   :  { %v2302_v31 = vpop.eup %2301 }
 0x40f   :  { %v1854_v35 = vmul.f32 %v2302_v31, %v1852_v30 }
 0x410   :  { %v2304_v36 = vpop.eup %2303 }
 0x411   :  { %v1858_v37 = vadd.f32 %v1856_v34, %v1854_v35  ;;  %v1853_v63 = vmul.f32 %v2304_v36, %v1851_v9 }
 0x413   :  { %1860 = vst.msk [vmem:[%s2745_s9 + $0x18] sm:$0xff] %vm360_vm2, %v1858_v37  ;;  %v1857_v5 = vadd.f32 %v1855_v20, %v1853_v63 }
 0x415   :  { %1859 = vst.msk [vmem:[%s2745_s9 + $0x10] sm:$0xff] %vm360_vm2, %v1857_v5 }

// kernel: _lambda_.2
= control target key start
LH: loop header
LB: loop body
LE: loop exit
PB: predicated region body
PF: predicated region fallthrough
CT: control target
= control target key end

     0   :  { %s4034_s13 = smov 0   ;;  %s5917_s0 = inlined_call_operand.vmem [shape: bf16[2,256,27], index: 0, kind: input, shape index: {}]   ;;  %s5918_s1 = inlined_call_operand.vmem [shape: bf16[27,8], index: 1, kind: input, shape index: {}]   ;;  %s5919_s2 = inlined_call_operand.vmem [shape: f32[1,8], index: 2, kind: input, shape index: {}]   ;;  %s5920_s3 = inlined_call_operand.vmem [shape: bf16[8,16], index: 3, kind: input, shape index: {}]   ;;  %s5921_s4 = inlined_call_operand.vmem [shape: f32[1,16], index: 4, kind: input, shape index: {}]   ;;  %s5922_s5 = inlined_call_operand.vmem [shape: f32[9,16], index: 5, kind: input, shape index: {}]   ;;  %s5923_s6 = inlined_call_operand.vmem [shape: bf16[16,8], index: 6, kind: input, shape index: {}]   ;;  %s5924_s7 = inlined_call_operand.vmem [shape: f32[1,8], index: 7, kind: input, shape index: {}]   ;;  %s5925_s8 = inlined_call_operand.vmem [shape: bf16[8,512], index: 8, kind: input, shape index: {}]   ;;  %s5926_s9 = inlined_call_operand.vmem [shape: f32[1,512], index: 9, kind: input, shape index: {}]   ;;  %s5927_s10 = inlined_call_operand.vmem [shape: f32[2,1,512], index: 10, kind: output, shape index: {}]  }
   0x1 LB: > { %s3740_s14 = sadd.s32 4294967295, %s3972_s13   ;;  %p3744_p0 = scmp.ge.s32.totalorder %s3972_s13, 1  ;;  %s3972_s13 = sphi %s4034_s13, %s20_s13  }
   0x2   : > { %p312_p1 = scmp.lt.s32.totalorder %s3972_s13, 3 }
   0x4   : > { %p313_p2 = pnand %p3744_p0, %p312_p1 }
   0x6   : > { %316 = sbr.rel (%p313_p2) target bundleno = 1140 (0x474), region = 60 }
   0xb   : > { %v3941_v0 = vld [vmem:[%s5918_s1 + $0x8] sm:$0x3f]   ;;  %vm542_vm0 = vcmask 1044480   ;;  %vm543_vm1 = vcmask 1045504   ;;  %v3974_v1 = vmov 65535   ;;  %p349_p3 = scmp.lt.s32.totalorder %s3740_s14, 1 }
   0xc   : > { %v544_v2 = vsel %vm542_vm0, 4294967295, %v3974_v1  ;;  %v3942_v5 = vld [vmem:[%s5918_s1] sm:$0xff]   ;;  %vm493_vm2 = vcmask 220160   ;;  %vm847_vm3 = vcmask 1043456   ;;  %vm798_vm4 = vcmask 64512  }
   0xd   : > { %v545_v3 = vsel %vm543_vm1, %v544_v2, 0  ;;  %s6297_s14 = smov (!%p349_p3, %s3740_s14), 1  ;;  %v790_v22 = vld [vmem:[%s5920_s3] sm:$0xf] }
   0xe   : > { %v547_v4 = vand.u32 %v3941_v0, %v545_v3  ;;  %s3813_s19 = sshll.u32 %s6297_s14, 7  ;;  %3927 = vmatprep.subr.msk.bf16.mxu1 %vm847_vm3, %v790_v22  ;;  %v849_v23 = vsel %vm847_vm3, %v790_v22, 0  ;;  %v4096_v25 = vld [vmem:[%s5919_s2] ss:$0 sm:$0xff]  ;;  %s3747_s29 = sshll.u32 %s6297_s14, 2 }
   0xf   : > { %s4054_s22 = scalar_lea.vmem %s5917_s0, %s3813_s19  ;;  %3888 = vmatpush3.bf16.msra.mxu1 %v849_v23  ;;  %s357_s12 = scalar_lea.vmem %s5927_s10, %s3747_s29 }
  0x10   : > { %3851 = vmatprep.subr.bf16.mxu0 %v547_v4  ;;  %v3943_v6 = vld [vmem:[%s4054_s22] sm:$0xff]   ;;  %v3944_v7 = vld [vmem:[%s4054_s22 + $0x8] sm:$0xff]   ;;  %v3945_v8 = vld [vmem:[%s4054_s22 + $0x10] sm:$0xff]  }
  0x11   : > { %3852 = vmatpush3.bf16.msra.mxu0 %v547_v4  ;;  %3855 = vmatprep.mubr.msk.bf16.mxu0 %vm493_vm2, %v3943_v6  ;;  %v3946_v9 = vld [vmem:[%s4054_s22 + $0x18] sm:$0xff]   ;;  %v3947_v10 = vld [vmem:[%s4054_s22 + $0x20] sm:$0xff]   ;;  %v3948_v11 = vld [vmem:[%s4054_s22 + $0x28] sm:$0xff]  }
  0x12   : > { %3853 = vmatprep.subr.bf16.mxu0 %v3942_v5  ;;  %v3949_v12 = vld [vmem:[%s4054_s22 + $0x30] sm:$0xff]   ;;  %v3950_v13 = vld [vmem:[%s4054_s22 + $0x38] sm:$0xff]   ;;  %v3951_v14 = vld [vmem:[%s4054_s22 + $0x40] sm:$0xff]  }
  0x13   : > { %v3952_v15 = vld [vmem:[%s4054_s22 + $0x48] sm:$0xff]   ;;  %v3953_v16 = vld [vmem:[%s4054_s22 + $0x50] sm:$0xff]   ;;  %v3954_v17 = vld [vmem:[%s4054_s22 + $0x58] sm:$0xff]  }
  0x14   : > { %v3955_v18 = vld [vmem:[%s4054_s22 + $0x60] sm:$0xff]   ;;  %v3956_v19 = vld [vmem:[%s4054_s22 + $0x68] sm:$0xff]   ;;  %v3957_v20 = vld [vmem:[%s4054_s22 + $0x70] sm:$0xff]  }
  0x15   : > { %3854 = vmatpush3.bf16.msra.mxu0 %v3942_v5  ;;  %v3958_v21 = vld [vmem:[%s4054_s22 + $0x78] sm:$0xff]  }
  0x18   : > { %3856 = vmatmul.mubr.msk.bf16.vlgmr.msra.gmra.mxu0 %vm493_vm2, %v3944_v7 }
  0x19   : > { %3859 = vmatprep.mubr.msk.bf16.mxu0 %vm493_vm2, %v3945_v8 }
  0x20   : > { %3860 = vmatmul.mubr.msk.bf16.gmra.mxu0 %vm493_vm2, %v3946_v9 }
  0x21   : > { %3863 = vmatprep.mubr.msk.bf16.mxu0 %vm493_vm2, %v3947_v10 }
  0x28   : > { %3864 = vmatmul.mubr.msk.bf16.gmra.mxu0 %vm493_vm2, %v3948_v11 }
  0x29   : > { %3867 = vmatprep.mubr.msk.bf16.mxu0 %vm493_vm2, %v3949_v12 }
  0x30   : > { %3868 = vmatmul.mubr.msk.bf16.gmra.mxu0 %vm493_vm2, %v3950_v13 }
  0x31   : > { %3871 = vmatprep.mubr.msk.bf16.mxu0 %vm493_vm2, %v3951_v14 }
  0x38   : > { %3872 = vmatmul.mubr.msk.bf16.gmra.mxu0 %vm493_vm2, %v3952_v15 }
  0x39   : > { %3875 = vmatprep.mubr.msk.bf16.mxu0 %vm493_vm2, %v3953_v16 }
  0x40   : > { %3876 = vmatmul.mubr.msk.bf16.gmra.mxu0 %vm493_vm2, %v3954_v17 }
  0x41   : > { %3879 = vmatprep.mubr.msk.bf16.mxu0 %vm493_vm2, %v3955_v18 }
  0x48   : > { %3880 = vmatmul.mubr.msk.bf16.gmra.mxu0 %vm493_vm2, %v3956_v19 }
  0x49   : > { %3883 = vmatprep.mubr.msk.bf16.mxu0 %vm493_vm2, %v3957_v20 }
  0x50   : > { %3884 = vmatmul.mubr.msk.bf16.gmra.mxu0 %vm493_vm2, %v3958_v21 }
  0xd8   : > { %v3857_v24 = vpop.f32.mrf.mxu0 }
  0xd9   : > { %v592_v27 = vadd.f32 %v3857_v24, %v4096_v25 }
  0xda   : > { %v583_v26 = vpop.f32.mrf.mxu0 }
  0xdb   : > { %v584_v28 = vadd.f32 %v4096_v25, %v583_v26  ;;  %v712_v33 = vmax.f32 %v592_v27, 0.0 }
  0xdc   : > { %v3858_v29 = vpop.f32.mrf.mxu0 }
  0xdd   : > { %v710_v30 = vmax.f32 %v584_v28, 0.0  ;;  %v595_v31 = vadd.f32 %v3858_v29, %v4096_v25  ;;  %v744_v41 = vmin.f32 %v712_v33, 6.0 }
  0xde   : > { %v586_v32 = vpop.f32.mrf.mxu0 }
  0xdf   : > { %v713_v34 = vmax.f32 %v595_v31, 0.0  ;;  %v587_v35 = vadd.f32 %v4096_v25, %v586_v32  ;;  %v742_v37 = vmin.f32 %v710_v30, 6.0  ;;  %v3400_v54 = vsel %vm798_vm4, %v744_v41, 0.0 }
  0xe0   : > { %v3861_v36 = vpop.f32.mrf.mxu0 }
  0xe1   : > { %v711_v38 = vmax.f32 %v587_v35, 0.0  ;;  %v745_v39 = vmin.f32 %v713_v34, 6.0  ;;  %v608_v43 = vadd.f32 %v3861_v36, %v4096_v25  ;;  %v3397_v46 = vsel %vm798_vm4, %v742_v37, 0.0 }
  0xe2   : > { %v599_v40 = vpop.f32.mrf.mxu0 }
  0xe3   : > { %v743_v42 = vmin.f32 %v711_v38, 6.0  ;;  %v600_v44 = vadd.f32 %v4096_v25, %v599_v40  ;;  %v775_v50 = vpack.c.bf16 %v745_v39, %v744_v41  ;;  %v716_v55 = vmax.f32 %v608_v43, 0.0 }
  0xe4   : > { %v3862_v45 = vpop.f32.mrf.mxu0  ;;  %v3402_v61 = vsel %vm798_vm4, %v745_v39, 0.0 }
  0xe5   : > { %v3398_v47 = vsel %vm798_vm4, %v743_v42, 0.0  ;;  %v611_v48 = vadd.f32 %v3862_v45, %v4096_v25  ;;  %v774_v49 = vpack.c.bf16 %v743_v42, %v742_v37  ;;  %v714_v52 = vmax.f32 %v600_v44, 0.0 }
  0xe6   : > { %v3399_v51 = vadd.f32 %v3398_v47, %v3397_v46  ;;  %v602_v53 = vpop.f32.mrf.mxu0  ;;  %v748_v2 = vmin.f32 %v716_v55, 6.0 }
  0xe7   : > { %v717_v56 = vmax.f32 %v611_v48, 0.0  ;;  %v603_v57 = vadd.f32 %v4096_v25, %v602_v53  ;;  %3889 = vmatprep.mubr.msk.bf16.mxu1 %vm798_vm4, %v774_v49  ;;  %v746_v59 = vmin.f32 %v714_v52, 6.0 }
  0xe8   : > { %v3401_v58 = vadd.f32 %v3400_v54, %v3399_v51  ;;  %v3865_v60 = vpop.f32.mrf.mxu0  ;;  %3890 = vmatmul.mubr.msk.bf16.vlgmr.msra.gmra.mxu1 %vm798_vm4, %v775_v50  ;;  %v3408_v16 = vsel %vm798_vm4, %v748_v2, 0.0 }
  0xe9   : > { %v715_v62 = vmax.f32 %v603_v57, 0.0  ;;  %v749_v0 = vmin.f32 %v717_v56, 6.0  ;;  %v3404_v3 = vsel %vm798_vm4, %v746_v59, 0.0  ;;  %v624_v5 = vadd.f32 %v3865_v60, %v4096_v25 }
  0xea   : > { %v3403_v63 = vadd.f32 %v3402_v61, %v3401_v58  ;;  %v615_v1 = vpop.f32.mrf.mxu0 }
  0xeb   : > { %v747_v4 = vmin.f32 %v715_v62, 6.0  ;;  %v616_v7 = vadd.f32 %v4096_v25, %v615_v1  ;;  %v777_v12 = vpack.c.bf16 %v749_v0, %v748_v2  ;;  %v720_v17 = vmax.f32 %v624_v5, 0.0 }
  0xec   : > { %v3405_v6 = vadd.f32 %v3404_v3, %v3403_v63  ;;  %v3866_v8 = vpop.f32.mrf.mxu0  ;;  %v3410_v23 = vsel %vm798_vm4, %v749_v0, 0.0 }
  0xed   : > { %v776_v9 = vpack.c.bf16 %v747_v4, %v746_v59  ;;  %v3406_v10 = vsel %vm798_vm4, %v747_v4, 0.0  ;;  %v627_v11 = vadd.f32 %v3866_v8, %v4096_v25  ;;  %v718_v14 = vmax.f32 %v616_v7, 0.0 }
  0xee   : > { %v3407_v13 = vadd.f32 %v3406_v10, %v3405_v6  ;;  %v618_v15 = vpop.f32.mrf.mxu0  ;;  %v752_v29 = vmin.f32 %v720_v17, 6.0 }
  0xef   : > { %v721_v18 = vmax.f32 %v627_v11, 0.0  ;;  %v619_v19 = vadd.f32 %v4096_v25, %v618_v15  ;;  %3893 = vmatprep.mubr.msk.bf16.mxu1 %vm798_vm4, %v776_v9  ;;  %v750_v21 = vmin.f32 %v718_v14, 6.0 }
  0xf0   : > { %v3409_v20 = vadd.f32 %v3408_v16, %v3407_v13  ;;  %v3869_v22 = vpop.f32.mrf.mxu0  ;;  %3894 = vmatmul.mubr.msk.bf16.gmra.mxu1 %vm798_vm4, %v777_v12  ;;  %v3416_v43 = vsel %vm798_vm4, %v752_v29, 0.0 }
  0xf1   : > { %v719_v24 = vmax.f32 %v619_v19, 0.0  ;;  %v753_v27 = vmin.f32 %v721_v18, 6.0  ;;  %v3412_v30 = vsel %vm798_vm4, %v750_v21, 0.0  ;;  %v640_v32 = vadd.f32 %v3869_v22, %v4096_v25 }
  0xf2   : > { %v3411_v26 = vadd.f32 %v3410_v23, %v3409_v20  ;;  %v631_v28 = vpop.f32.mrf.mxu0 }
  0xf3   : > { %v751_v31 = vmin.f32 %v719_v24, 6.0  ;;  %v632_v34 = vadd.f32 %v4096_v25, %v631_v28  ;;  %v779_v39 = vpack.c.bf16 %v753_v27, %v752_v29  ;;  %v724_v44 = vmax.f32 %v640_v32, 0.0 }
  0xf4   : > { %v3413_v33 = vadd.f32 %v3412_v30, %v3411_v26  ;;  %v3870_v35 = vpop.f32.mrf.mxu0  ;;  %v3418_v50 = vsel %vm798_vm4, %v753_v27, 0.0 }
  0xf5   : > { %v778_v36 = vpack.c.bf16 %v751_v31, %v750_v21  ;;  %v3414_v37 = vsel %vm798_vm4, %v751_v31, 0.0  ;;  %v643_v38 = vadd.f32 %v3870_v35, %v4096_v25  ;;  %v722_v41 = vmax.f32 %v632_v34, 0.0 }
  0xf6   : > { %v3415_v40 = vadd.f32 %v3414_v37, %v3413_v33  ;;  %v634_v42 = vpop.f32.mrf.mxu0  ;;  %v756_v55 = vmin.f32 %v724_v44, 6.0 }
  0xf7   : > { %v725_v45 = vmax.f32 %v643_v38, 0.0  ;;  %v635_v46 = vadd.f32 %v4096_v25, %v634_v42  ;;  %3897 = vmatprep.mubr.msk.bf16.mxu1 %vm798_vm4, %v778_v36  ;;  %v754_v48 = vmin.f32 %v722_v41, 6.0 }
  0xf8   : > { %v3417_v47 = vadd.f32 %v3416_v43, %v3415_v40  ;;  %v3873_v49 = vpop.f32.mrf.mxu0  ;;  %3898 = vmatmul.mubr.msk.bf16.gmra.mxu1 %vm798_vm4, %v779_v39  ;;  %v3424_v5 = vsel %vm798_vm4, %v756_v55, 0.0 }
  0xf9   : > { %v723_v51 = vmax.f32 %v635_v46, 0.0  ;;  %v757_v53 = vmin.f32 %v725_v45, 6.0  ;;  %v3420_v56 = vsel %vm798_vm4, %v754_v48, 0.0  ;;  %v656_v58 = vadd.f32 %v3873_v49, %v4096_v25 }
  0xfa   : > { %v3419_v52 = vadd.f32 %v3418_v50, %v3417_v47  ;;  %v647_v54 = vpop.f32.mrf.mxu0 }
  0xfb   : > { %v755_v57 = vmin.f32 %v723_v51, 6.0  ;;  %v648_v60 = vadd.f32 %v4096_v25, %v647_v54  ;;  %v781_v1 = vpack.c.bf16 %v757_v53, %v756_v55  ;;  %v728_v6 = vmax.f32 %v656_v58, 0.0 }
  0xfc   : > { %v3421_v59 = vadd.f32 %v3420_v56, %v3419_v52  ;;  %v3874_v61 = vpop.f32.mrf.mxu0  ;;  %v3426_v12 = vsel %vm798_vm4, %v757_v53, 0.0 }
  0xfd   : > { %v780_v62 = vpack.c.bf16 %v755_v57, %v754_v48  ;;  %v3422_v63 = vsel %vm798_vm4, %v755_v57, 0.0  ;;  %v659_v0 = vadd.f32 %v3874_v61, %v4096_v25  ;;  %v726_v3 = vmax.f32 %v648_v60, 0.0 }
  0xfe   : > { %v3423_v2 = vadd.f32 %v3422_v63, %v3421_v59  ;;  %v650_v4 = vpop.f32.mrf.mxu0  ;;  %v760_v17 = vmin.f32 %v728_v6, 6.0 }
  0xff   : > { %v729_v7 = vmax.f32 %v659_v0, 0.0  ;;  %v651_v8 = vadd.f32 %v4096_v25, %v650_v4  ;;  %3901 = vmatprep.mubr.msk.bf16.mxu1 %vm798_vm4, %v780_v62  ;;  %v758_v10 = vmin.f32 %v726_v3, 6.0 }
 0x100   : > { %v3425_v9 = vadd.f32 %v3424_v5, %v3423_v2  ;;  %v3877_v11 = vpop.f32.mrf.mxu0  ;;  %3902 = vmatmul.mubr.msk.bf16.gmra.mxu1 %vm798_vm4, %v781_v1  ;;  %v3432_v32 = vsel %vm798_vm4, %v760_v17, 0.0 }
 0x101   : > { %v727_v13 = vmax.f32 %v651_v8, 0.0  ;;  %v761_v15 = vmin.f32 %v729_v7, 6.0  ;;  %v3428_v18 = vsel %vm798_vm4, %v758_v10, 0.0  ;;  %v672_v20 = vadd.f32 %v3877_v11, %v4096_v25 }
 0x102   : > { %v3427_v14 = vadd.f32 %v3426_v12, %v3425_v9  ;;  %v663_v16 = vpop.f32.mrf.mxu0 }
 0x103   : > { %v759_v19 = vmin.f32 %v727_v13, 6.0  ;;  %v664_v22 = vadd.f32 %v4096_v25, %v663_v16  ;;  %v783_v28 = vpack.c.bf16 %v761_v15, %v760_v17  ;;  %v732_v33 = vmax.f32 %v672_v20, 0.0 }
 0x104   : > { %v3429_v21 = vadd.f32 %v3428_v18, %v3427_v14  ;;  %v3878_v23 = vpop.f32.mrf.mxu0  ;;  %v3434_v39 = vsel %vm798_vm4, %v761_v15, 0.0 }
 0x105   : > { %v782_v24 = vpack.c.bf16 %v759_v19, %v758_v10  ;;  %v3430_v26 = vsel %vm798_vm4, %v759_v19, 0.0  ;;  %v675_v27 = vadd.f32 %v3878_v23, %v4096_v25  ;;  %v730_v30 = vmax.f32 %v664_v22, 0.0 }
 0x106   : > { %v3431_v29 = vadd.f32 %v3430_v26, %v3429_v21  ;;  %v666_v31 = vpop.f32.mrf.mxu0  ;;  %v764_v44 = vmin.f32 %v732_v33, 6.0 }
 0x107   : > { %v733_v34 = vmax.f32 %v675_v27, 0.0  ;;  %v667_v35 = vadd.f32 %v4096_v25, %v666_v31  ;;  %3905 = vmatprep.mubr.msk.bf16.mxu1 %vm798_vm4, %v782_v24  ;;  %v762_v37 = vmin.f32 %v730_v30, 6.0 }
 0x108   : > { %v3433_v36 = vadd.f32 %v3432_v32, %v3431_v29  ;;  %v3881_v38 = vpop.f32.mrf.mxu0  ;;  %3906 = vmatmul.mubr.msk.bf16.gmra.mxu1 %vm798_vm4, %v783_v28  ;;  %v3440_v58 = vsel %vm798_vm4, %v764_v44, 0.0 }
 0x109   : > { %v731_v40 = vmax.f32 %v667_v35, 0.0  ;;  %v765_v42 = vmin.f32 %v733_v34, 6.0  ;;  %v3436_v45 = vsel %vm798_vm4, %v762_v37, 0.0  ;;  %v688_v47 = vadd.f32 %v3881_v38, %v4096_v25 }
 0x10a   : > { %v3435_v41 = vadd.f32 %v3434_v39, %v3433_v36  ;;  %v679_v43 = vpop.f32.mrf.mxu0 }
 0x10b   : > { %v763_v46 = vmin.f32 %v731_v40, 6.0  ;;  %v680_v49 = vadd.f32 %v4096_v25, %v679_v43  ;;  %v785_v54 = vpack.c.bf16 %v765_v42, %v764_v44  ;;  %v736_v59 = vmax.f32 %v688_v47, 0.0  ;;  %v4183_v43 = vld [vmem:[%s5921_s4] ss:$0 sm:$0xff] }
 0x10c   : > { %v3437_v48 = vadd.f32 %v3436_v45, %v3435_v41  ;;  %v3882_v50 = vpop.f32.mrf.mxu0  ;;  %v3442_v1 = vsel %vm798_vm4, %v765_v42, 0.0 }
 0x10d   : > { %v784_v51 = vpack.c.bf16 %v763_v46, %v762_v37  ;;  %v3438_v52 = vsel %vm798_vm4, %v763_v46, 0.0  ;;  %v691_v53 = vadd.f32 %v3882_v50, %v4096_v25  ;;  %v734_v56 = vmax.f32 %v680_v49, 0.0 }
 0x10e   : > { %v3439_v55 = vadd.f32 %v3438_v52, %v3437_v48  ;;  %v682_v57 = vpop.f32.mrf.mxu0  ;;  %v768_v6 = vmin.f32 %v736_v59, 6.0  ;;  %v5928_v50 = vlaneseq }
 0x10f   : > { %v737_v60 = vmax.f32 %v691_v53, 0.0  ;;  %v683_v61 = vadd.f32 %v4096_v25, %v682_v57  ;;  %3909 = vmatprep.mubr.msk.bf16.mxu1 %vm798_vm4, %v784_v51  ;;  %v766_v63 = vmin.f32 %v734_v56, 6.0 }
 0x110   : > { %v3441_v62 = vadd.f32 %v3440_v58, %v3439_v55  ;;  %v3885_v0 = vpop.f32.mrf.mxu0  ;;  %3910 = vmatmul.mubr.msk.bf16.gmra.mxu1 %vm798_vm4, %v785_v54  ;;  %v3448_v20 = vsel %vm798_vm4, %v768_v6, 0.0  ;;  %v4192_v57 = vshrl.u32 %v5928_v50, 7 }
 0x111   : > { %v735_v2 = vmax.f32 %v683_v61, 0.0  ;;  %v769_v4 = vmin.f32 %v737_v60, 6.0  ;;  %v3444_v7 = vsel %vm798_vm4, %v766_v63, 0.0  ;;  %v704_v9 = vadd.f32 %v3885_v0, %v4096_v25 }
 0x112   : > { %v3443_v3 = vadd.f32 %v3442_v1, %v3441_v62  ;;  %v695_v5 = vpop.f32.mrf.mxu0  ;;  %v1081_v61 = vadd.s32 32, %v4192_v57  ;;  %v5930_v1 = vsub.s32 1, %v4192_v57  ;;  %vm1527_vm5 = vcmp.lt.s32.totalorder %v4192_v57, 1 }
 0x113   : > { %v767_v8 = vmin.f32 %v735_v2, 6.0  ;;  %v696_v11 = vadd.f32 %v4096_v25, %v695_v5  ;;  %v787_v16 = vpack.c.bf16 %v769_v4, %v768_v6  ;;  %v740_v21 = vmax.f32 %v704_v9, 0.0 }
 0x114   : > { %v3445_v10 = vadd.f32 %v3444_v7, %v3443_v3  ;;  %v3886_v12 = vpop.f32.mrf.mxu0  ;;  %v3450_v27 = vsel %vm798_vm4, %v769_v4, 0.0  ;;  %v5931_v2 = vsub.s32 2, %v4192_v57  ;;  %v1080_v3 = vadd.s32 24, %v4192_v57 }
 0x115   : > { %v786_v13 = vpack.c.bf16 %v767_v8, %v766_v63  ;;  %v3446_v14 = vsel %vm798_vm4, %v767_v8, 0.0  ;;  %v707_v15 = vadd.f32 %v3886_v12, %v4096_v25  ;;  %v738_v18 = vmax.f32 %v696_v11, 0.0  ;;  %v4211_v8 = vld [vmem:[%s5922_s5] sm:$0xff] }
 0x116   : > { %v3447_v17 = vadd.f32 %v3446_v14, %v3445_v10  ;;  %v698_v19 = vpop.f32.mrf.mxu0  ;;  %v772_v31 = vmin.f32 %v740_v21, 6.0  ;;  %v5932_v63 = vsub.s32 0, %v4192_v57  ;;  %v1141_v11 = vand.u32 15, %v1081_v61 }
 0x117   : > { %v741_v22 = vmax.f32 %v707_v15, 0.0  ;;  %v699_v23 = vadd.f32 %v4096_v25, %v698_v19  ;;  %3913 = vmatprep.mubr.msk.bf16.mxu1 %vm798_vm4, %v786_v13  ;;  %v770_v26 = vmin.f32 %v738_v18, 6.0  ;;  %vm2016_vm6 = vcmp.lt.s32.totalorder %v4192_v57, 7 }
 0x118   : > { %v3449_v24 = vadd.f32 %v3448_v20, %v3447_v17  ;;  %3914 = vmatmul.mubr.msk.bf16.gmra.mxu1 %vm798_vm4, %v787_v16  ;;  %v3456_v38 = vsel %vm798_vm4, %v772_v31, 0.0  ;;  %v4220_v13 = vrot.slane %v4211_v8, %v5932_v63  ;;  %v1134_v16 = vand.u32 15, %v1080_v3 }
 0x119   : > { %v739_v28 = vmax.f32 %v699_v23, 0.0  ;;  %v773_v30 = vmin.f32 %v741_v22, 6.0  ;;  %v3452_v32 = vsel %vm798_vm4, %v770_v26, 0.0  ;;  %v4242_v18 = vrot.slane %v4211_v8, %v5931_v2 }
 0x11a   : > { %v3451_v29 = vadd.f32 %v3450_v27, %v3449_v24  ;;  %v4249_v21 = vrot.slane %v4211_v8, %v5930_v1  ;;  %vm4252_vm7 = vcmp.ge.s32.totalorder %v1141_v11, 1  ;;  %vm4263_vm8 = vcmp.le.s32.totalorder %v1134_v16, 14 }
 0x11b   : > { %v771_v33 = vmin.f32 %v739_v28, 6.0  ;;  %v789_v25 = vpack.c.bf16 %v773_v30, %v772_v31  ;;  %v3458_v40 = vsel %vm798_vm4, %v773_v30, 0.0  ;;  %v5929_v28 = vsub.s32 3, %v4192_v57 }
 0x11c   : > { %v3453_v34 = vadd.f32 %v3452_v32, %v3451_v29 }
 0x11d   : > { %v788_v35 = vpack.c.bf16 %v771_v33, %v770_v26  ;;  %v3454_v36 = vsel %vm798_vm4, %v771_v33, 0.0 }
 0x11e   : > { %v3455_v37 = vadd.f32 %v3454_v36, %v3453_v34 }
 0x11f   : > { %3917 = vmatprep.mubr.msk.bf16.mxu1 %vm798_vm4, %v788_v35 }
 0x120   : > { %v3457_v39 = vadd.f32 %v3456_v38, %v3455_v37  ;;  %3918 = vmatmul.mubr.msk.bf16.gmra.mxu1 %vm798_vm4, %v789_v25  ;;  %v1082_v38 = vadd.s32 40, %v4192_v57 }
 0x122   : > { %v4178_v41 = vadd.f32 %v3458_v40, %v3457_v39 }
 0x124   : > { %6013 = vst [vmem:[#allocation2_spill] sm:$0xff] %v4178_v41 }
 0x1a8   : > { %v3891_v42 = vpop.f32.mrf.mxu1 }
 0x1a9   : > { %v894_v45 = vadd.f32 %v3891_v42, %v4183_v43 }
 0x1aa   : > { %v885_v44 = vpop.f32.mrf.mxu1 }
 0x1ab   : > { %v886_v47 = vadd.f32 %v4183_v43, %v885_v44  ;;  %v1014_v49 = vmax.f32 %v894_v45, 0.0  ;;  %v4289_v45 = vrot.slane %v4211_v8, %v5929_v28 }
 0x1ac   : > { %v3892_v46 = vpop.f32.mrf.mxu1 }
 0x1ad   : > { %v1012_v52 = vmax.f32 %v886_v47, 0.0  ;;  %v897_v53 = vadd.f32 %v3892_v46, %v4183_v43  ;;  %v4189_v56 = vmin.f32 %v1014_v49, 6.0 }
 0x1ae   : > { %v888_v48 = vpop.f32.mrf.mxu1 }
 0x1af   : > { %v889_v51 = vadd.f32 %v4183_v43, %v888_v48  ;;  %v4194_v58 = vmin.f32 %v1012_v52, 6.0  ;;  %v1015_v59 = vmax.f32 %v897_v53, 0.0  ;;  %v1497_v0 = vrot.slane %v4189_v56, 7 }
 0x1b0   : > { %v3895_v54 = vpop.f32.mrf.mxu1  ;;  %v1986_v9 = vrot.slane %v4189_v56, 1  ;;  %v1828_v36 = vmul.f32 %v4249_v21, %v4189_v56  ;;  %v2443_v52 = vsub.s32 4, %v4192_v57 }
 0x1b1   : > { %v1013_v55 = vmax.f32 %v889_v51, 0.0  ;;  %6014 = vst [vmem:[#allocation3_spill] sm:$0xff] %v4194_v58  ;;  %v5933_v4 = vrot.slane %v4194_v58, 7  ;;  %v4214_v10 = vmin.f32 %v1015_v59, 6.0  ;;  %v910_v31 = vadd.f32 %v3895_v54, %v4183_v43 }
 0x1b2   : > { %v901_v62 = vpop.f32.mrf.mxu1  ;;  %v4320_v16 = vrot.slane %v4211_v8, %v2443_v52 }
 0x1b3   : > { %v4196_v60 = vmin.f32 %v1013_v55, 6.0  ;;  %v902_v7 = vadd.f32 %v4183_v43, %v901_v62  ;;  %v1987_v22 = vrot.slane %v4214_v10, 1  ;;  %v1498_v32 = vrot.slane %v4214_v10, 7 }
 0x1b4   : > { %v3896_v12 = vpop.f32.mrf.mxu1  ;;  %v1018_v48 = vmax.f32 %v910_v31, 0.0  ;;  %v1148_v62 = vand.u32 15, %v1082_v38  ;;  %v2739_v31 = vsub.s32 6, %v4192_v57 }
 0x1b5   : > { %v1496_v5 = vrot.slane %v4196_v60, 7  ;;  %v5934_v6 = vrot.slane %v4196_v60, 1  ;;  %v1016_v20 = vmax.f32 %v902_v7, 0.0  ;;  %v1827_v29 = vmul.f32 %v4249_v21, %v4196_v60 }
 0x1b6   : > { %v904_v26 = vpop.f32.mrf.mxu1  ;;  %v4278_v25 = vsel %vm2016_vm6, %v1986_v9, %v1987_v22  ;;  %v913_v44 = vadd.f32 %v3896_v12, %v4183_v43  ;;  %v4293_v47 = vsel %vm1527_vm5, %v1497_v0, %v1498_v32  ;;  %vm4328_vm9 = vcmp.le.s32.totalorder %v1148_v62, 14 }
 0x1b7   : > { %v4225_v14 = vsel %vm1527_vm5, %v1496_v5, %v1497_v0  ;;  %v4231_v15 = vsel %vm1527_vm5, %v5933_v4, %v1496_v5  ;;  %v4237_v17 = vsel %vm2016_vm6, %v5934_v6, %v1986_v9  ;;  %v4271_v34 = vmin.f32 %v1016_v20, 6.0  ;;  %6020 = vst [vmem:[#allocation5_spill] sm:$0xff] %v4278_v25 }
 0x1b8   : > { %6015 = vst [vmem:[#allocation4_spill] sm:$0xff] %v4225_v14  ;;  %v1664_v19 = vmul.f32 %v4220_v13, %v4225_v14  ;;  %v1663_v24 = vmul.f32 %v4220_v13, %v4231_v15  ;;  %v2120_v27 = vmul.f32 %v4242_v18, %v4237_v17  ;;  %v905_v35 = vadd.f32 %v4183_v43, %v904_v26  ;;  %v3899_v62 = vpop.f32.mrf.mxu1 }
 0x1b9   : > { %v1499_v40 = vrot.slane %v4271_v34, 7  ;;  %v1988_v42 = vrot.slane %v4271_v34, 1  ;;  %v2121_v53 = vmul.f32 %v4242_v18, %v4278_v25  ;;  %v1019_v61 = vmax.f32 %v913_v44, 0.0 }
 0x1ba   : > { %v1760_v33 = vsel %vm4252_vm7, %v1664_v19, 0.0  ;;  %v1955_v37 = vadd.f32 %v1827_v29, %v1663_v24  ;;  %v2216_v39 = vsel %vm4263_vm8, %v2120_v27, 0.0  ;;  %v1017_v51 = vmax.f32 %v905_v35, 0.0 }
 0x1bb   : > { %v1956_v46 = vadd.f32 %v1828_v36, %v1760_v33  ;;  %v4297_v49 = vsel %vm1527_vm5, %v1498_v32, %v1499_v40  ;;  %v4306_v59 = vsel %vm2016_vm6, %v1987_v22, %v1988_v42  ;;  %v2511_v0 = vsub.s32 5, %v4192_v57 }
 0x1bc   : > { %v2248_v54 = vadd.f32 %v2216_v39, %v1955_v37  ;;  %v2285_v55 = vmul.f32 %v4289_v45, %v4297_v49  ;;  %v2284_v3 = vmul.f32 %v4289_v45, %v4293_v47  ;;  %v1665_v7 = vmul.f32 %v4220_v13, %v4293_v47 }
 0x1bd   : > { %v2249_v5 = vadd.f32 %v2121_v53, %v1956_v46  ;;  %v4313_v9 = vmin.f32 %v1018_v48, 6.0  ;;  %v4317_v12 = vmin.f32 %v1017_v51, 6.0  ;;  %v2122_v20 = vmul.f32 %v4242_v18, %v4306_v59 }
 0x1be   : > { %v2381_v11 = vsel %vm4252_vm7, %v2285_v55, 0.0  ;;  %v2412_v19 = vadd.f32 %v2284_v3, %v2248_v54  ;;  %v1829_v22 = vmul.f32 %v4249_v21, %v4214_v10  ;;  %v4326_v24 = vmin.f32 %v1019_v61, 6.0 }
 0x1bf   : > { %6021 = vst [vmem:[#allocation6_spill] sm:$0xff] %v4313_v9  ;;  %v6023_v26 = vmov 0  ;;  %v4333_v27 = vrot.slane %v4211_v8, %v2511_v0  ;;  %v2448_v29 = vmul.f32 %v4320_v16, %v4214_v10  ;;  %v2413_v32 = vadd.f32 %v2381_v11, %v2249_v5 }
 0x1c0   : > { %6022 = vst [vmem:[#allocation7_spill] sm:$0xff] %v4326_v24  ;;  %v6024_v26 = vsel %vm4328_vm9, 4294967295, %v6023_v26  ;;  %v1957_v33 = vadd.f32 %v1829_v22, %v1665_v7  ;;  %v1990_v35 = vrot.slane %v4313_v9, 1  ;;  %v1500_v36 = vrot.slane %v4317_v12, 7 }
 0x1c1   : > { %6025 = vst [vmem:[#allocation8_spill] sm:$0xff] %v6024_v26  ;;  %v1989_v37 = vrot.slane %v4317_v12, 1  ;;  %v2480_v38 = vadd.f32 %v2448_v29, %v2412_v19  ;;  %v2449_v39 = vmul.f32 %v4320_v16, %v4271_v34  ;;  %v2516_v44 = vmul.f32 %v4333_v27, %v4306_v59 }
 0x1c2   : > { %v2218_v46 = vsel %vm4328_vm9, %v2122_v20, 0.0  ;;  %v1502_v48 = vrot.slane %v4326_v24, 7  ;;  %v1554_v51 = vsel %vm1527_vm5, %v1499_v40, %v1500_v36  ;;  %v2903_v54 = vsub.s32 7, %v4192_v57 }
 0x1c3   : > { %v2042_v52 = vsel %vm2016_vm6, %v1989_v37, %v1990_v35  ;;  %v4354_v53 = vsel %vm2016_vm6, %v1988_v42, %v1989_v37  ;;  %v1501_v55 = vrot.slane %v4313_v9, 7  ;;  %v2481_v61 = vadd.f32 %v2449_v39, %v2413_v32  ;;  %v917_v39 = vpop.f32.mrf.mxu1 }
 0x1c4   : > { %v1085_v0 = vadd.s32 64, %v4192_v57  ;;  %v4360_v3 = vrot.slane %v4211_v8, %v2739_v31  ;;  %v1991_v40 = vrot.slane %v4326_v24, 1  ;;  %v2250_v5 = vadd.f32 %v2218_v46, %v1957_v33 }
 0x1c5   : > { %v2286_v7 = vmul.f32 %v4289_v45, %v1554_v51  ;;  %v4366_v42 = vsel %vm1527_vm5, %v1500_v36, %v1501_v55  ;;  %v2517_v11 = vmul.f32 %v4333_v27, %v4354_v53  ;;  %v2518_v19 = vmul.f32 %v4333_v27, %v2042_v52  ;;  %v3900_v28 = vpop.f32.mrf.mxu1 }
 0x1c6   : > { %v2612_v20 = vsel %vm4263_vm8, %v2516_v44, 0.0  ;;  %v4377_v22 = vsel %vm1527_vm5, %v1501_v55, %v1502_v48  ;;  %v2450_v31 = vmul.f32 %v4320_v16, %v4317_v12  ;;  %v4382_v33 = vrot.slane %v4211_v8, %v2903_v54  ;;  %v4388_v44 = vld [vmem:[%s5922_s5 + $0x8] ss:$0 sm:$0xff] }
 0x1c7   : > { %v2414_v29 = vadd.f32 %v2286_v7, %v2250_v5  ;;  %v2644_v32 = vadd.f32 %v2612_v20, %v2480_v38  ;;  %v1084_v36 = vadd.s32 56, %v4192_v57  ;;  %v2645_v37 = vadd.f32 %v2517_v11, %v2481_v61 }
 0x1c8   : > { %v1169_v46 = vand.u32 15, %v1085_v0  ;;  %v4394_v55 = vsel %vm2016_vm6, %v1990_v35, %v1991_v40  ;;  %v2744_v8 = vmul.f32 %v4360_v3, %v1554_v51  ;;  %v2745_v54 = vmul.f32 %v4360_v3, %v4366_v42 }
 0x1c9   : > { %6026 = vst [vmem:[#allocation9_spill] sm:$0xff] %v4394_v55  ;;  %v2482_v38 = vadd.f32 %v2450_v31, %v2414_v29  ;;  %v2746_v61 = vmul.f32 %v4360_v3, %v4377_v22  ;;  %v2614_v0 = vsel %vm4328_vm9, %v2518_v19, 0.0  ;;  %v2908_v5 = vmul.f32 %v4382_v33, %v4317_v12 }
 0x1ca   : > { %v3104_v7 = vmul.f32 %v4388_v44, %v2042_v52  ;;  %v2841_v35 = vsel %vm4252_vm7, %v2745_v54, 0.0  ;;  %v2872_v20 = vadd.f32 %v2744_v8, %v2644_v32  ;;  %v918_v29 = vadd.f32 %v4183_v43, %v917_v39 }
 0x1cb   : > { %v2646_v11 = vadd.f32 %v2614_v0, %v2482_v38  ;;  %v2909_v31 = vmul.f32 %v4382_v33, %v4313_v9  ;;  %v2873_v50 = vadd.f32 %v2841_v35, %v2645_v37  ;;  %v1162_v1 = vand.u32 15, %v1084_v36 }
 0x1cc   : > { %v3036_v19 = vadd.f32 %v2908_v5, %v2872_v20  ;;  %v1020_v63 = vmax.f32 %v918_v29, 0.0  ;;  %v3105_v4 = vmul.f32 %v4388_v44, %v4394_v55  ;;  %v1668_v23 = vmul.f32 %v4220_v13, %v4366_v42 }
 0x1cd   : > { %v4411_v2 = vadd.f32 %v2746_v61, %v2646_v11  ;;  %v3037_v38 = vadd.f32 %v2909_v31, %v2873_v50  ;;  %v3200_v32 = vsel %vm4263_vm8, %v3104_v7, 0.0  ;;  %vm4421_vm10 = vcmp.ge.s32.totalorder %v1169_v46, 1  ;;  %v920_v61 = vpop.f32.mrf.mxu1 }
 0x1ce   : > { %v4419_v39 = vadd.f32 %v3200_v32, %v3036_v19  ;;  %v1667_v36 = vmul.f32 %v4220_v13, %v1554_v51  ;;  %v4428_v54 = vmin.f32 %v1020_v63, 6.0  ;;  %vm4430_vm11 = vcmp.le.s32.totalorder %v1162_v1, 14 }
 0x1cf   : > { %6027 = vst [vmem:[#allocation10_spill] sm:$0xff] %v4411_v2  ;;  %v4426_v8 = vadd.f32 %v3105_v4, %v3037_v38  ;;  %v2124_v50 = vmul.f32 %v4242_v18, %v2042_v52  ;;  %v1831_v30 = vmul.f32 %v4249_v21, %v4317_v12  ;;  %v926_v46 = vadd.f32 %v3899_v62, %v4183_v43 }
 0x1d0   : > { %6028 = vst [vmem:[#allocation11_spill] sm:$0xff] %v4419_v39  ;;  %6032 = vst [vmem:[#allocation13_spill] sm:$0xff] %v4428_v54  ;;  %v1503_v5 = vrot.slane %v4428_v54, 7  ;;  %v1764_v4 = vsel %vm4421_vm10, %v1668_v23, 0.0  ;;  %v1832_v63 = vmul.f32 %v4249_v21, %v4313_v9  ;;  %v921_v1 = vadd.f32 %v4183_v43, %v920_v61 }
 0x1d1   : > { %6031 = vst [vmem:[#allocation12_spill] sm:$0xff] %v4426_v8  ;;  %v1959_v51 = vadd.f32 %v1831_v30, %v1667_v36  ;;  %v1992_v12 = vrot.slane %v4428_v54, 1  ;;  %v1086_v62 = vadd.s32 72, %v4192_v57  ;;  %v2220_v7 = vsel %vm4430_vm11, %v2124_v50, 0.0 }
 0x1d2   : > { %v4448_v52 = vsel %vm1527_vm5, %v1502_v48, %v1503_v5  ;;  %v1960_v11 = vadd.f32 %v1832_v63, %v1764_v4  ;;  %v929_v35 = vadd.f32 %v3900_v28, %v4183_v43  ;;  %v1022_v20 = vmax.f32 %v926_v46, 0.0 }
 0x1d3   : > { %6035 = vst [vmem:[#allocation14_spill] sm:$0xff] %v4448_v52  ;;  %v2289_v29 = vmul.f32 %v4289_v45, %v4448_v52  ;;  %v2125_v31 = vmul.f32 %v4242_v18, %v4394_v55  ;;  %v1021_v19 = vmax.f32 %v921_v1, 0.0  ;;  %v2252_v48 = vadd.f32 %v2220_v7, %v1959_v51 }
 0x1d4   : > { %v4463_v23 = vsel %vm2016_vm6, %v1991_v40, %v1992_v12  ;;  %v1176_v38 = vand.u32 15, %v1086_v62  ;;  %v1023_v36 = vmax.f32 %v929_v35, 0.0  ;;  %v2288_v28 = vmul.f32 %v4289_v45, %v4377_v22 }
 0x1d5   : > { %6036 = vst [vmem:[#allocation15_spill] sm:$0xff] %v4463_v23  ;;  %v2253_v32 = vadd.f32 %v2125_v31, %v1960_v11  ;;  %v4467_v61 = vmin.f32 %v1022_v20, 6.0  ;;  %v2385_v50 = vsel %vm4421_vm10, %v2289_v29, 0.0  ;;  %v1669_v30 = vmul.f32 %v4220_v13, %v4377_v22 }
 0x1d6   : > { %v2126_v46 = vmul.f32 %v4242_v18, %v4463_v23  ;;  %v4475_v4 = vmin.f32 %v1021_v19, 6.0  ;;  %v2416_v40 = vadd.f32 %v2288_v28, %v2252_v48  ;;  %vm4477_vm12 = vcmp.le.s32.totalorder %v1176_v38, 14 }
 0x1d7   : > { %6037 = vst [vmem:[#allocation16_spill] sm:$0xff] %v4467_v61  ;;  %v6038_v63 = vmov 0  ;;  %v1833_v1 = vmul.f32 %v4249_v21, %v4326_v24  ;;  %v2417_v51 = vadd.f32 %v2385_v50, %v2253_v32  ;;  %v4483_v62 = vmin.f32 %v1023_v36, 6.0 }
 0x1d8   : > { %v6039_v63 = vsel %vm4477_vm12, 4294967295, %v6038_v63  ;;  %v2452_v7 = vmul.f32 %v4320_v16, %v4326_v24  ;;  %v1994_v22 = vrot.slane %v4467_v61, 1  ;;  %v1504_v11 = vrot.slane %v4475_v4, 7 }
 0x1d9   : > { %6040 = vst [vmem:[#allocation17_spill] sm:$0xff] %v6039_v63  ;;  %6041 = vst [vmem:[#allocation18_spill] sm:$0xff] %v4483_v62  ;;  %v1993_v35 = vrot.slane %v4475_v4, 1  ;;  %v1961_v20 = vadd.f32 %v1833_v1, %v1669_v30  ;;  %v2453_v29 = vmul.f32 %v4320_v16, %v4428_v54  ;;  %v2520_v31 = vmul.f32 %v4333_v27, %v4463_v23  ;;  %v3903_v1 = vpop.f32.mrf.mxu1 }
 0x1da   : > { %v2222_v19 = vsel %vm4477_vm12, %v2126_v46, 0.0  ;;  %v1550_v48 = vsel %vm1527_vm5, %v1503_v5, %v1504_v11  ;;  %v2484_v36 = vadd.f32 %v2452_v7, %v2416_v40  ;;  %v1505_v28 = vrot.slane %v4467_v61, 7 }
 0x1db   : > { %v2038_v38 = vsel %vm2016_vm6, %v1993_v35, %v1994_v22  ;;  %v4502_v32 = vsel %vm2016_vm6, %v1992_v12, %v1993_v35  ;;  %v2485_v50 = vadd.f32 %v2453_v29, %v2417_v51  ;;  %v1506_v30 = vrot.slane %v4483_v62, 7  ;;  %v933_v6 = vpop.f32.mrf.mxu1 }
 0x1dc   : > { %6042 = vst [vmem:[#allocation19_spill] sm:$0xff] %v4502_v32  ;;  %v2254_v46 = vadd.f32 %v2222_v19, %v1961_v20  ;;  %v2290_v41 = vmul.f32 %v4289_v45, %v1550_v48  ;;  %v2521_v5 = vmul.f32 %v4333_v27, %v4502_v32  ;;  %v4512_v26 = vsel %vm1527_vm5, %v1504_v11, %v1505_v28 }
 0x1dd   : > { %6043 = vst [vmem:[#allocation20_spill] sm:$0xff] %v4512_v26  ;;  %v2522_v12 = vmul.f32 %v4333_v27, %v2038_v38  ;;  %v2616_v40 = vsel %vm4430_vm11, %v2520_v31, 0.0  ;;  %v2454_v7 = vmul.f32 %v4320_v16, %v4475_v4  ;;  %v4521_v20 = vsel %vm1527_vm5, %v1505_v28, %v1506_v30 }
 0x1de   : > { %v2418_v51 = vadd.f32 %v2290_v41, %v2254_v46  ;;  %v2648_v35 = vadd.f32 %v2616_v40, %v2484_v36  ;;  %v1088_v29 = vadd.s32 88, %v4192_v57  ;;  %v2649_v19 = vadd.f32 %v2521_v5, %v2485_v50 }
 0x1df   : > { %v2748_v11 = vmul.f32 %v4360_v3, %v1550_v48  ;;  %v6044_v32 = vrot.slane %v4483_v62, 1  ;;  %v2749_v36 = vmul.f32 %v4360_v3, %v4512_v26  ;;  %v1089_v46 = vadd.s32 96, %v4192_v57 }
 0x1e0   : > { %v2486_v41 = vadd.f32 %v2454_v7, %v2418_v51  ;;  %v2618_v28 = vsel %vm4477_vm12, %v2522_v12, 0.0  ;;  %v2912_v50 = vmul.f32 %v4382_v33, %v4475_v4  ;;  %v3108_v5 = vmul.f32 %v4388_v44, %v2038_v38 }
 0x1e1   : > { %v4529_v31 = vsel %vm2016_vm6, %v1994_v22, %v6044_v32  ;;  %v2876_v40 = vadd.f32 %v2748_v11, %v2648_v35  ;;  %v2750_v23 = vmul.f32 %v4360_v3, %v4521_v20  ;;  %v2845_v32 = vsel %vm4421_vm10, %v2749_v36, 0.0 }
 0x1e2   : > { %6045 = vst [vmem:[#allocation21_spill] sm:$0xff] %v4529_v31  ;;  %v2650_v22 = vadd.f32 %v2618_v28, %v2486_v41  ;;  %v934_v51 = vadd.f32 %v4183_v43, %v933_v6  ;;  %v2913_v7 = vmul.f32 %v4382_v33, %v4467_v61  ;;  %v2877_v63 = vadd.f32 %v2845_v32, %v2649_v19 }
 0x1e3   : > { %v3040_v12 = vadd.f32 %v2912_v50, %v2876_v40  ;;  %v3204_v11 = vsel %vm4430_vm11, %v3108_v5, 0.0  ;;  %v1197_v52 = vand.u32 15, %v1089_v46  ;;  %v3109_v41 = vmul.f32 %v4388_v44, %v4529_v31  ;;  %v3904_v50 = vpop.f32.mrf.mxu1 }
 0x1e4   : > { %v4546_v35 = vadd.f32 %v2750_v23, %v2650_v22  ;;  %v1024_v54 = vmax.f32 %v934_v51, 0.0  ;;  %v3041_v28 = vadd.f32 %v2913_v7, %v2877_v63  ;;  %v1190_v36 = vand.u32 15, %v1088_v29 }
 0x1e5   : > { %v4552_v37 = vadd.f32 %v3204_v11, %v3040_v12  ;;  %v1672_v19 = vmul.f32 %v4220_v13, %v4512_v26  ;;  %v1671_v23 = vmul.f32 %v4220_v13, %v1550_v48  ;;  %vm4561_vm13 = vcmp.ge.s32.totalorder %v1197_v52, 1  ;;  %v936_v11 = vpop.f32.mrf.mxu1 }
 0x1e6   : > { %6046 = vst [vmem:[#allocation22_spill] sm:$0xff] %v4546_v35  ;;  %v4554_v6 = vmin.f32 %v1024_v54, 6.0  ;;  %v4558_v40 = vadd.f32 %v3109_v41, %v3041_v28  ;;  %v2128_v46 = vmul.f32 %v4242_v18, %v2038_v38  ;;  %v1835_v54 = vmul.f32 %v4249_v21, %v4475_v4 }
 0x1e7   : > { %6047 = vst [vmem:[#allocation23_spill] sm:$0xff] %v4552_v37  ;;  %vm4569_vm14 = vcmp.le.s32.totalorder %v1190_v36, 14  ;;  %v1768_v5 = vsel %vm4561_vm13, %v1672_v19, 0.0  ;;  %v1090_v52 = vadd.s32 104, %v4192_v57  ;;  %v1836_v48 = vmul.f32 %v4249_v21, %v4467_v61 }
 0x1e8   : > { %6048 = vst [vmem:[#allocation24_spill] sm:$0xff] %v4554_v6  ;;  %6049 = vst [vmem:[#allocation25_spill] sm:$0xff] %v4558_v40  ;;  %v5945_v63 = vrot.slane %v4554_v6, 7  ;;  %v1963_v22 = vadd.f32 %v1835_v54, %v1671_v23  ;;  %v1996_v4 = vrot.slane %v4554_v6, 1  ;;  %v1078_v32 = vadd.s32 8, %v4192_v57 }
 0x1e9   : > { %v4587_v51 = vadd.s32 16, %v4192_v57  ;;  %v2224_v7 = vsel %vm4569_vm14, %v2128_v46, 0.0  ;;  %v942_v12 = vadd.f32 %v3903_v1, %v4183_v43  ;;  %v1964_v41 = vadd.f32 %v1836_v48, %v1768_v5 }
 0x1ea   : > { %v4582_v38 = vsel %vm1527_vm5, %v1506_v30, %v5945_v63  ;;  %v4593_v28 = vadd.s32 48, %v4192_v57  ;;  %v945_v36 = vadd.f32 %v3904_v50, %v4183_v43  ;;  %v1204_v19 = vand.u32 15, %v1090_v52 }
 0x1eb   : > { %6054 = vst [vmem:[#allocation26_spill] sm:$0xff] %v4582_v38  ;;  %6055 = vst [vmem:[#allocation27_spill] sm:$0xff] %v4587_v51  ;;  %v2293_v30 = vmul.f32 %v4289_v45, %v4582_v38  ;;  %v2129_v23 = vmul.f32 %v4242_v18, %v4529_v31  ;;  %v2256_v54 = vadd.f32 %v2224_v7, %v1963_v22  ;;  %v6056_v63 = vrot.slane %v4483_v62, 1  ;;  %v4613_v7 = vpop.f32.mrf.mxu1 }
 0x1ec   : > { %v937_v46 = vadd.f32 %v4183_v43, %v936_v11  ;;  %v1120_v5 = vand.u32 15, %v1078_v32  ;;  %v1026_v35 = vmax.f32 %v942_v12, 0.0  ;;  %v4609_v38 = vadd.s32 120, %v4192_v57 }
 0x1ed   : > { %v4604_v1 = vsel %vm2016_vm6, %v6056_v63, %v1996_v4  ;;  %v2292_v50 = vmul.f32 %v4289_v45, %v4521_v20  ;;  %v2257_v52 = vadd.f32 %v2129_v23, %v1964_v41  ;;  %v4616_v40 = vadd.s32 128, %v4192_v57 }
 0x1ee   : > { %6057 = vst [vmem:[#allocation28_spill] sm:$0xff] %v4604_v1  ;;  %v1025_v22 = vmax.f32 %v937_v46, 0.0  ;;  %v2130_v32 = vmul.f32 %v4242_v18, %v4604_v1  ;;  %v2389_v12 = vsel %vm4561_vm13, %v2293_v30, 0.0  ;;  %v1027_v11 = vmax.f32 %v945_v36, 0.0 }
 0x1ef   : > { %v4624_v48 = vadd.s32 80, %v4192_v57  ;;  %v1673_v41 = vmul.f32 %v4220_v13, %v4521_v20  ;;  %v2420_v23 = vadd.f32 %v2292_v50, %v2256_v54  ;;  %vm4628_vm15 = vcmp.le.s32.totalorder %v1204_v19, 14  ;;  %v949_v19 = vpop.f32.mrf.mxu1 }
 0x1f0   : > { %v6058_v46 = vmov 0  ;;  %v4632_v31 = vmin.f32 %v1026_v35, 6.0  ;;  %v4635_v63 = vadd.s32 112, %v4192_v57  ;;  %v4637_v37 = vmin.f32 %v1025_v22, 6.0 }
 0x1f1   : > { %v6059_v46 = vsel %vm4628_vm15, 4294967295, %v6058_v46  ;;  %v1837_v36 = vmul.f32 %v4249_v21, %v4483_v62  ;;  %v2456_v20 = vmul.f32 %v4320_v16, %v4483_v62  ;;  %v2421_v54 = vadd.f32 %v2389_v12, %v2257_v52 }
 0x1f2   : > { %6060 = vst [vmem:[#allocation29_spill] sm:$0xff] %v6059_v46  ;;  %v1225_v50 = vand.u32 15, %v4616_v40  ;;  %v2524_v35 = vmul.f32 %v4333_v27, %v4604_v1  ;;  %v4647_v61 = vmin.f32 %v1027_v11, 6.0  ;;  %v2226_v22 = vsel %vm4628_vm15, %v2130_v32, 0.0 }
 0x1f3   : > { %v4652_v30 = vadd.s32 144, %v4192_v57  ;;  %v1965_v26 = vadd.f32 %v1837_v36, %v1673_v41  ;;  %v2457_v8 = vmul.f32 %v4320_v16, %v4554_v6  ;;  %v1508_v52 = vrot.slane %v4637_v37, 7 }
 0x1f4   : > { %v2488_v12 = vadd.f32 %v2456_v20, %v2420_v23  ;;  %v1998_v40 = vrot.slane %v4632_v31, 1  ;;  %v1997_v62 = vrot.slane %v4637_v37, 1  ;;  %v950_v11 = vadd.f32 %v4183_v43, %v949_v19 }
 0x1f5   : > { %v4661_v1 = vadd.s32 136, %v4192_v57  ;;  %v1509_v32 = vrot.slane %v4632_v31, 7  ;;  %v2489_v39 = vadd.f32 %v2457_v8, %v2421_v54  ;;  %v6061_v41 = vrot.slane %v4554_v6, 7 }
 0x1f6   : > { %v2258_v2 = vadd.f32 %v2226_v22, %v1965_v26  ;;  %v1510_v23 = vrot.slane %v4647_v61, 7  ;;  %v2034_v20 = vsel %vm2016_vm6, %v1997_v62, %v1998_v40  ;;  %v4673_v19 = vsel %vm2016_vm6, %v1996_v4, %v1997_v62 }
 0x1f7   : > { %v1546_v36 = vsel %vm1527_vm5, %v6061_v41, %v1508_v52  ;;  %6062 = vst [vmem:[#allocation30_spill] sm:$0xff] %v4673_v19  ;;  %v2620_v55 = vsel %vm4569_vm14, %v2524_v35, 0.0  ;;  %vm4677_vm0 = vcmp.le.s32.totalorder %v1120_v5, 14  ;;  %v4684_v26 = vsel %vm1527_vm5, %v1508_v52, %v1509_v32 }
 0x1f8   : > { %v2294_v22 = vmul.f32 %v4289_v45, %v1546_v36  ;;  %v2652_v41 = vadd.f32 %v2620_v55, %v2488_v12  ;;  %v2525_v62 = vmul.f32 %v4333_v27, %v4673_v19  ;;  %v2526_v4 = vmul.f32 %v4333_v27, %v2034_v20 }
 0x1f9   : > { %v1028_v6 = vmax.f32 %v950_v11, 0.0  ;;  %v4691_v5 = vadd.s32 152, %v4192_v57  ;;  %v2282_v35 = vmul.f32 %v4289_v45, %v4231_v15  ;;  %v2458_v52 = vmul.f32 %v4320_v16, %v4637_v37 }
 0x1fa   : > { %v2422_v54 = vadd.f32 %v2294_v22, %v2258_v2  ;;  %v2752_v24 = vmul.f32 %v4360_v3, %v1546_v36  ;;  %v2917_v55 = vmul.f32 %v4382_v33, %v4632_v31  ;;  %v4702_v12 = vsel %vm1527_vm5, %v1509_v32, %v1510_v23 }
 0x1fb   : > { %v2653_v11 = vadd.f32 %v2525_v62, %v2489_v39  ;;  %v2753_v19 = vmul.f32 %v4360_v3, %v4684_v26  ;;  %v6065_v9 = vrot.slane %v4647_v61, 1  ;;  %v2916_v14 = vmul.f32 %v4382_v33, %v4637_v37 }
 0x1fc   : > { %v2490_v15 = vadd.f32 %v2458_v52, %v2422_v54  ;;  %v2880_v22 = vadd.f32 %v2752_v24, %v2652_v41  ;;  %v2622_v25 = vsel %vm4628_vm15, %v2526_v4, 0.0  ;;  %v3112_v32 = vmul.f32 %v4388_v44, %v2034_v20 }
 0x1fd   : > { %v4710_v2 = vsel %vm2016_vm6, %v1998_v40, %v6065_v9  ;;  %v2849_v39 = vsel %vm4561_vm13, %v2753_v19, 0.0  ;;  %v4719_v62 = vmin.f32 %v1028_v6, 6.0  ;;  %v2754_v51 = vmul.f32 %v4360_v3, %v4702_v12 }
 0x1fe   : > { %v2654_v9 = vadd.f32 %v2622_v25, %v2490_v15  ;;  %v2881_v40 = vadd.f32 %v2849_v39, %v2653_v11  ;;  %v3044_v54 = vadd.f32 %v2916_v14, %v2880_v22  ;;  %v2446_v24 = vmul.f32 %v4320_v16, %v4196_v60 }
 0x1ff   : > { %v2514_v41 = vmul.f32 %v4333_v27, %v4237_v17  ;;  %v3113_v0 = vmul.f32 %v4388_v44, %v4710_v2  ;;  %v3208_v19 = vsel %vm4569_vm14, %v3112_v32, 0.0  ;;  %v1676_v6 = vmul.f32 %v4220_v13, %v4684_v26 }
 0x200   : > { %v4733_v4 = vadd.f32 %v2754_v51, %v2654_v9  ;;  %v3045_v25 = vadd.f32 %v2917_v55, %v2881_v40  ;;  %v4735_v52 = vadd.f32 %v3208_v19, %v3044_v54  ;;  %v1675_v14 = vmul.f32 %v4220_v13, %v1546_v36  ;;  %v3908_v36 = vpop.f32.mrf.mxu1 }
 0x201   : > { %v5966_v11 = vrot.slane %v4719_v62, 7  ;;  %vm4739_vm1 = vcmp.ge.s32.totalorder %v1225_v50, 1  ;;  %v1232_v15 = vand.u32 15, %v4661_v1  ;;  %v2478_v29 = vadd.f32 %v2446_v24, %v2282_v35 }
 0x202   : > { %6066 = vst [vmem:[#allocation31_spill] sm:$0xff] %v4735_v52  ;;  %v6069_v22 = vand.u32 15, %v4593_v28  ;;  %v2132_v51 = vmul.f32 %v4242_v18, %v2034_v20  ;;  %v4751_v55 = vadd.f32 %v3113_v0, %v3045_v25  ;;  %v2610_v50 = vsel %vm4677_vm0, %v2514_v41, 0.0 }
 0x203   : > { %v1839_v1 = vmul.f32 %v4249_v21, %v4637_v37  ;;  %v6073_v35 = vand.u32 15, %v4609_v38  ;;  %v1772_v40 = vsel %vm4739_vm1, %v1676_v6, 0.0  ;;  %v1840_v24 = vmul.f32 %v4249_v21, %v4632_v31 }
 0x204   : > { %vm4746_vm2 = vcmp.ge.s32.totalorder %v6069_v22, 1  ;;  %6072 = vst [vmem:[#allocation32_spill] sm:$0xff] %v4751_v55  ;;  %v4775_v37 = vsel %vm1527_vm5, %v1510_v23, %v5966_v11  ;;  %v5967_v38 = vrot.slane %v4719_v62, 1  ;;  %vm4778_vm8 = vcmp.le.s32.totalorder %v1232_v15, 14  ;;  %v952_v22 = vpop.f32.mrf.mxu1 }
 0x205   : > { %vm4760_vm7 = vcmp.le.s32.totalorder %v6073_v35, 14  ;;  %v1967_v41 = vadd.f32 %v1839_v1, %v1675_v14  ;;  %v6076_v0 = vmov 0  ;;  %v4784_v19 = vmul.f32 %v4320_v16, %v4189_v56 }
 0x206   : > { %v6077_v0 = vsel %vm4778_vm8, 4294967295, %v6076_v0  ;;  %v2642_v6 = vadd.f32 %v2610_v50, %v2478_v29  ;;  %v2228_v25 = vsel %vm4760_vm7, %v2132_v51, 0.0  ;;  %v958_v14 = vadd.f32 %v4613_v7, %v4183_v43 }
 0x207   : > { %6078 = vst [vmem:[#allocation33_spill] sm:$0xff] %v6077_v0  ;;  %6079 = vst [vmem:[#allocation34_spill] sm:$0xff] %v4784_v19  ;;  %v4792_v23 = vmul.f32 %v4382_v33, %v4189_v56  ;;  %v4796_v15 = vmul.f32 %v4249_v21, %v4194_v58  ;;  %v1968_v35 = vadd.f32 %v1840_v24, %v1772_v40  ;;  %v6082_v9 = vrot.slane %v4647_v61, 1 }
 0x208   : > { %v2742_v29 = vmul.f32 %v4360_v3, %v4293_v47  ;;  %v1666_v51 = vmul.f32 %v4220_v13, %v4297_v49  ;;  %v2297_v7 = vmul.f32 %v4289_v45, %v4775_v37  ;;  %v961_v50 = vadd.f32 %v3908_v36, %v4183_v43 }
 0x209   : > { %6080 = vst [vmem:[#allocation35_spill] sm:$0xff] %v4792_v23  ;;  %6081 = vst [vmem:[#allocation36_spill] sm:$0xff] %v4796_v15  ;;  %v2133_v56 = vmul.f32 %v4242_v18, %v4710_v2  ;;  %v2260_v20 = vadd.f32 %v2228_v25, %v1967_v41  ;;  %v4814_v40 = vsel %vm2016_vm6, %v6082_v9, %v5967_v38  ;;  %v1030_v54 = vmax.f32 %v958_v14, 0.0 }
 0x20a   : > { %v953_v47 = vadd.f32 %v4183_v43, %v952_v22  ;;  %v4819_v24 = vmul.f32 %v4320_v16, %v4194_v58  ;;  %v2906_v36 = vmul.f32 %v4382_v33, %v4214_v10  ;;  %v2870_v32 = vadd.f32 %v2742_v29, %v2642_v6 }
 0x20b   : > { %v3102_v41 = vmul.f32 %v4388_v44, %v4306_v59  ;;  %v2296_v25 = vmul.f32 %v4289_v45, %v4702_v12  ;;  %v2261_v11 = vadd.f32 %v2133_v56, %v1968_v35  ;;  %v1762_v22 = vsel %vm4746_vm2, %v1666_v51, 0.0 }
 0x20c   : > { %6083 = vst [vmem:[#allocation37_spill] sm:$0xff] %v4819_v24  ;;  %v1029_v9 = vmax.f32 %v953_v47, 0.0  ;;  %v2134_v38 = vmul.f32 %v4242_v18, %v4814_v40  ;;  %v2393_v1 = vsel %vm4739_vm1, %v2297_v7, 0.0  ;;  %v1031_v10 = vmax.f32 %v961_v50, 0.0 }
 0x20d   : > { %v1830_v6 = vmul.f32 %v4249_v21, %v4271_v34  ;;  %v1677_v59 = vmul.f32 %v4220_v13, %v4702_v12  ;;  %v2424_v14 = vadd.f32 %v2296_v25, %v2260_v20  ;;  %v4838_v35 = vadd.s32 160, %v4192_v57 }
 0x20e   : > { %v6084_v29 = vrot.slane %v4196_v60, 1  ;;  %v6085_v51 = vrot.slane %v4194_v58, 1  ;;  %v3034_v7 = vadd.f32 %v2906_v36, %v2870_v32  ;;  %v4848_v50 = vmin.f32 %v1030_v54, 6.0 }
 0x20f   : > { %v4850_v47 = vmin.f32 %v1029_v9, 6.0  ;;  %v1958_v23 = vadd.f32 %v1830_v6, %v1762_v22  ;;  %v1841_v12 = vmul.f32 %v4249_v21, %v4647_v61  ;;  %v2460_v20 = vmul.f32 %v4320_v16, %v4647_v61 }
 0x210   : > { %v4846_v56 = vsel %vm2016_vm6, %v6085_v51, %v6084_v29  ;;  %v2425_v25 = vadd.f32 %v2393_v1, %v2261_v11  ;;  %v3198_v60 = vsel %vm4677_vm0, %v3102_v41, 0.0  ;;  %v2528_v29 = vmul.f32 %v4333_v27, %v4814_v40 }
 0x211   : > { %v4860_v51 = vmin.f32 %v1031_v10, 6.0  ;;  %v2230_v32 = vsel %vm4778_vm8, %v2134_v38, 0.0  ;;  %v1969_v54 = vadd.f32 %v1841_v12, %v1677_v59  ;;  %v2461_v36 = vmul.f32 %v4320_v16, %v4719_v62  ;;  %v4873_v10 = vpop.f32.mrf.mxu1 }
 0x212   : > { %v1512_v9 = vrot.slane %v4850_v47, 7  ;;  %v2492_v22 = vadd.f32 %v2460_v20, %v2424_v14  ;;  %v2123_v11 = vmul.f32 %v4242_v18, %v4354_v53  ;;  %v2287_v8 = vmul.f32 %v4289_v45, %v4366_v42 }
 0x213   : > { %6086 = vst [vmem:[#allocation38_spill] sm:$0xff] %v4860_v51  ;;  %v2002_v1 = vrot.slane %v4848_v50, 1  ;;  %v2001_v41 = vrot.slane %v4850_v47, 1  ;;  %v1513_v38 = vrot.slane %v4848_v50, 7  ;;  %v2493_v6 = vadd.f32 %v2461_v36, %v2425_v25  ;;  %v6090_v36 = vld [vmem:[#allocation27_spill] sm:$0xff] }
 0x214   : > { %v6087_v59 = vrot.slane %v4719_v62, 7  ;;  %v2262_v12 = vadd.f32 %v2230_v32, %v1969_v54  ;;  %v6088_v19 = vrot.slane %v4719_v62, 1  ;;  %v2624_v25 = vsel %vm4760_vm7, %v2528_v29, 0.0 }
 0x215   : > { %v4885_v42 = vsel %vm2016_vm6, %v2001_v41, %v2002_v1  ;;  %v6091_v15 = vand.u32 15, %v6090_v36  ;;  %v3230_v32 = vadd.f32 %v3198_v60, %v3034_v7  ;;  %v4903_v54 = vsel %vm1527_vm5, %v1512_v9, %v1513_v38  ;;  %v965_v36 = vpop.f32.mrf.mxu1 }
 0x216   : > { %v4880_v14 = vsel %vm1527_vm5, %v6087_v59, %v1512_v9  ;;  %v4891_v24 = vsel %vm2016_vm6, %v6088_v19, %v2001_v41  ;;  %v6092_v59 = vmov 0  ;;  %v2656_v58 = vadd.f32 %v2624_v25, %v2492_v22 }
 0x217   : > { %6089 = vst [vmem:[#allocation39_spill] sm:$0xff] %v4891_v24  ;;  %vm4897_vm10 = vcmp.ge.s32.totalorder %v6091_v15, 1  ;;  %v2298_v20 = vmul.f32 %v4289_v45, %v4880_v14  ;;  %v2251_v19 = vadd.f32 %v2123_v11, %v1958_v23  ;;  %v2529_v29 = vmul.f32 %v4333_v27, %v4891_v24 }
 0x218   : > { %v6093_v59 = vsel %vm4897_vm10, 4294967295, %v6092_v59  ;;  %v2530_v15 = vmul.f32 %v4333_v27, %v4885_v42  ;;  %v2383_v7 = vsel %vm4746_vm2, %v2287_v8, 0.0  ;;  %v2462_v9 = vmul.f32 %v4320_v16, %v4850_v47 }
 0x219   : > { %6094 = vst [vmem:[#allocation27_spill] sm:$0xff] %v6093_v59  ;;  %v2426_v60 = vadd.f32 %v2298_v20, %v2262_v12  ;;  %v2756_v22 = vmul.f32 %v4360_v3, %v4880_v14  ;;  %v2921_v23 = vmul.f32 %v4382_v33, %v4848_v50  ;;  %v6095_v11 = vrot.slane %v4860_v51, 7 }
 0x21a   : > { %v2657_v41 = vadd.f32 %v2529_v29, %v2493_v6  ;;  %v2757_v8 = vmul.f32 %v4360_v3, %v4903_v54  ;;  %v2920_v46 = vmul.f32 %v4382_v33, %v4850_v47  ;;  %v966_v55 = vadd.f32 %v4183_v43, %v965_v36 }
 0x21b   : > { %v4924_v25 = vsel %vm1527_vm5, %v1513_v38, %v6095_v11  ;;  %v2494_v12 = vadd.f32 %v2462_v9, %v2426_v60  ;;  %v2884_v20 = vadd.f32 %v2756_v22, %v2656_v58  ;;  %v6096_v24 = vrot.slane %v4860_v51, 1  ;;  %v6098_v9 = vld [vmem:[#allocation5_spill] sm:$0xff] }
 0x21c   : > { %v2626_v38 = vsel %vm4778_vm8, %v2530_v15, 0.0  ;;  %v2853_v6 = vsel %vm4739_vm1, %v2757_v8, 0.0  ;;  %v3116_v58 = vmul.f32 %v4388_v44, %v4885_v42  ;;  %v2758_v29 = vmul.f32 %v4360_v3, %v4924_v25 }
 0x21d   : > { %v4935_v52 = vsel %vm2016_vm6, %v2002_v1, %v6096_v24  ;;  %v2658_v60 = vadd.f32 %v2626_v38, %v2494_v12  ;;  %v2885_v43 = vadd.f32 %v2853_v6, %v2657_v41  ;;  %v3048_v36 = vadd.f32 %v2920_v46, %v2884_v20  ;;  %v6100_v24 = vld [vmem:[#allocation4_spill] sm:$0xff] }
 0x21e   : > { %6097 = vst [vmem:[#allocation40_spill] sm:$0xff] %v4935_v52  ;;  %v4947_v22 = vmul.f32 %v4333_v27, %v6098_v9  ;;  %v4951_v1 = vmul.f32 %v4289_v45, %v6100_v24  ;;  %v4955_v17 = vmul.f32 %v4360_v3, %v4297_v49  ;;  %v3212_v15 = vsel %vm4760_vm7, %v3116_v58, 0.0 }
 0x21f   : > { %v3117_v11 = vmul.f32 %v4388_v44, %v4935_v52  ;;  %v6103_v46 = vand.u32 15, %v4691_v5  ;;  %v4967_v8 = vadd.f32 %v2758_v29, %v2658_v60  ;;  %v3049_v12 = vadd.f32 %v2921_v23, %v2885_v43 }
 0x220   : > { %6099 = vst [vmem:[#allocation5_spill] sm:$0xff] %v4947_v22  ;;  %6101 = vst [vmem:[#allocation4_spill] sm:$0xff] %v4951_v1  ;;  %v4969_v20 = vadd.f32 %v3212_v15, %v3048_v36  ;;  %v4973_v49 = vmul.f32 %v4388_v44, %v6098_v9  ;;  %v4977_v28 = vmul.f32 %v4242_v18, %v4846_v56  ;;  %v1032_v6 = vmax.f32 %v966_v55, 0.0  ;;  %v6119_v9 = vld [vmem:[#allocation7_spill] sm:$0xff] }
 0x221   : > { %6102 = vst [vmem:[#allocation41_spill] sm:$0xff] %v4955_v17  ;;  %vm4963_vm11 = vcmp.le.s32.totalorder %v6103_v46, 14  ;;  %6106 = vst [vmem:[#allocation42_spill] sm:$0xff] %v4967_v8  ;;  %v2415_v38 = vadd.f32 %v2383_v7, %v2251_v19  ;;  %v4981_v5 = vmul.f32 %v4333_v27, %v4846_v56  ;;  %v4985_v58 = vmul.f32 %v4360_v3, %v6100_v24  ;;  %v6116_v19 = vld [vmem:[#allocation6_spill] sm:$0xff]  ;;  %v6124_v55 = vld [vmem:[#allocation11_spill] sm:$0xff] }
 0x222   : > { %6107 = vst [vmem:[#allocation43_spill] sm:$0xff] %v4969_v20  ;;  %6108 = vst [vmem:[#allocation44_spill] sm:$0xff] %v4973_v49  ;;  %v3262_v23 = vmax.f32 %v3230_v32, 0.0  ;;  %v6112_v29 = vand.u32 15, %v4624_v48  ;;  %v4993_v43 = vadd.f32 %v3117_v11, %v3049_v12  ;;  %v2451_v56 = vmul.f32 %v4320_v16, %v6116_v19  ;;  %v6120_v11 = vld [vmem:[#allocation9_spill] sm:$0xff] }
 0x223   : > { %6109 = vst [vmem:[#allocation45_spill] sm:$0xff] %v4977_v28  ;;  %6110 = vst [vmem:[#allocation46_spill] sm:$0xff] %v4981_v5  ;;  %v5000_v7 = vmin.f32 %v1032_v6, 6.0  ;;  %v1253_v36 = vand.u32 15, %v4838_v35  ;;  %v5008_v32 = vmul.f32 %v4382_v33, %v4271_v34  ;;  %v2910_v24 = vmul.f32 %v4382_v33, %v6119_v9  ;;  %v6123_v34 = vld [vmem:[#allocation10_spill] sm:$0xff] }
 0x224   : > { %6111 = vst [vmem:[#allocation47_spill] sm:$0xff] %v4985_v58  ;;  %vm4989_vm13 = vcmp.ge.s32.totalorder %v6112_v29, 1  ;;  %6115 = vst [vmem:[#allocation48_spill] sm:$0xff] %v4993_v43  ;;  %v1680_v15 = vmul.f32 %v4220_v13, %v4903_v54  ;;  %v2519_v46 = vmul.f32 %v4333_v27, %v6120_v11  ;;  %v2483_v12 = vadd.f32 %v2451_v56, %v2415_v38  ;;  %v3912_v29 = vpop.f32.mrf.mxu1  ;;  %v6125_v43 = vld [vmem:[#allocation12_spill] sm:$0xff]  ;;  %v6126_v11 = vld [vmem:[#allocation14_spill] sm:$0xff] }
 0x225   : > { %6117 = vst [vmem:[#allocation6_spill] sm:$0xff] %v5000_v7  ;;  %6118 = vst [vmem:[#allocation49_spill] sm:$0xff] %v5008_v32  ;;  %vm5017_vm14 = vcmp.ge.s32.totalorder %v1253_v36, 1  ;;  %v5021_v19 = vmin.f32 %v3262_v23, 6.0  ;;  %v3038_v48 = vadd.f32 %v2910_v24, %v6123_v34  ;;  %v3264_v9 = vmax.f32 %v6124_v55, 0.0  ;;  %v6127_v55 = vld [vmem:[#allocation13_spill] sm:$0xff] }
 0x226   : > { %v1679_v0 = vmul.f32 %v4220_v13, %v4880_v14  ;;  %v2747_v38 = vmul.f32 %v4360_v3, %v6126_v11  ;;  %v2136_v56 = vmul.f32 %v4242_v18, %v4885_v42  ;;  %v5035_v23 = vld [vmem:[%s5921_s4] ss:$0 sm:$0xff]  ;;  %v1834_v24 = vmul.f32 %v4249_v21, %v6127_v55 }
 0x227   : > { %v974_v36 = vadd.f32 %v5035_v23, %v4873_v10  ;;  %v1843_v14 = vmul.f32 %v4249_v21, %v4850_v47  ;;  %v1776_v34 = vsel %vm5017_vm14, %v1680_v15, 0.0  ;;  %v977_v8 = vadd.f32 %v5035_v23, %v3912_v29  ;;  %v968_v47 = vpop.f32.mrf.mxu1  ;;  %v6131_v15 = vld [vmem:[#allocation15_spill] sm:$0xff] }
 0x228   : > { %v1670_v42 = vmul.f32 %v4220_v13, %v6126_v11  ;;  %v2647_v35 = vadd.f32 %v2519_v46, %v2483_v12  ;;  %v1844_v20 = vmul.f32 %v4249_v21, %v4848_v50  ;;  %v6128_v10 = vrot.slane %v5000_v7, 7 }
 0x229   : > { %v6129_v32 = vrot.slane %v4860_v51, 7  ;;  %v5058_v49 = vmin.f32 %v3264_v9, 6.0  ;;  %v3106_v29 = vmul.f32 %v4388_v44, %v6131_v15  ;;  %v1971_v22 = vadd.f32 %v1843_v14, %v1679_v0 }
 0x22a   : > { %v2004_v46 = vrot.slane %v5000_v7, 1  ;;  %v2843_v12 = vsel %vm4746_vm2, %v2747_v38, 0.0  ;;  %v2232_v11 = vsel %vm4963_vm11, %v2136_v56, 0.0  ;;  %v1034_v1 = vmax.f32 %v974_v36, 0.0 }
 0x22b   : > { %v5056_v17 = vsel %vm1527_vm5, %v6129_v32, %v6128_v10  ;;  %v1972_v5 = vadd.f32 %v1844_v20, %v1776_v34  ;;  %v1035_v10 = vmax.f32 %v977_v8, 0.0  ;;  %v969_v9 = vadd.f32 %v5035_v23, %v968_v47 }
 0x22c   : > { %6130 = vst [vmem:[#allocation7_spill] sm:$0xff] %v5056_v17  ;;  %v2301_v32 = vmul.f32 %v4289_v45, %v5056_v17  ;;  %v1098_v28 = vadd.s32 168, %v4192_v57  ;;  %v1766_v0 = vsel %vm4989_vm13, %v1670_v42, 0.0  ;;  %v2875_v14 = vadd.f32 %v2843_v12, %v2647_v35 }
 0x22d   : > { %v2911_v39 = vmul.f32 %v4382_v33, %v6127_v55  ;;  %v2137_v38 = vmul.f32 %v4242_v18, %v4935_v52  ;;  %v2264_v56 = vadd.f32 %v2232_v11, %v1971_v22  ;;  %v6132_v20 = vrot.slane %v4860_v51, 1  ;;  %v6137_v52 = vld [vmem:[#allocation19_spill] sm:$0xff] }
 0x22e   : > { %v1033_v36 = vmax.f32 %v969_v9, 0.0  ;;  %v1260_v34 = vand.u32 15, %v1098_v28  ;;  %v3202_v15 = vsel %vm4328_vm9, %v3106_v29, 0.0  ;;  %v1681_v35 = vmul.f32 %v4220_v13, %v4924_v25 }
 0x22f   : > { %v5081_v8 = vsel %vm2016_vm6, %v6132_v20, %v2004_v46  ;;  %v2300_v55 = vmul.f32 %v4289_v45, %v4924_v25  ;;  %v2265_v42 = vadd.f32 %v2137_v38, %v1972_v5  ;;  %v5089_v12 = vmin.f32 %v1034_v1, 6.0  ;;  %v6143_v38 = vld [vmem:[#allocation20_spill] sm:$0xff] }
 0x230   : > { %6133 = vst [vmem:[#allocation9_spill] sm:$0xff] %v5081_v8  ;;  %v2397_v22 = vsel %vm5017_vm14, %v2301_v32, 0.0  ;;  %v5093_v11 = vmin.f32 %v1035_v10, 6.0  ;;  %v5095_v20 = vmin.f32 %v1033_v36, 6.0  ;;  %v1962_v28 = vadd.f32 %v1834_v24, %v1766_v0 }
 0x231   : > { %6135 = vst [vmem:[#allocation10_spill] sm:$0xff] %v5089_v12  ;;  %v3039_v9 = vadd.f32 %v2911_v39, %v2875_v14  ;;  %v5097_v47 = vadd.f32 %v3202_v15, %v3038_v48  ;;  %v2138_v29 = vmul.f32 %v4242_v18, %v5081_v8  ;;  %v2127_v25 = vmul.f32 %v4242_v18, %v6137_v52 }
 0x232   : > { %6136 = vst [vmem:[#allocation11_spill] sm:$0xff] %v5093_v11  ;;  %v1845_v1 = vmul.f32 %v4249_v21, %v4860_v51  ;;  %v2428_v5 = vadd.f32 %v2300_v55, %v2264_v56  ;;  %vm5105_vm9 = vcmp.le.s32.totalorder %v1260_v34, 14  ;;  %v6138_v32 = vmov 0 }
 0x233   : > { %v6139_v32 = vsel %vm5105_vm9, 4294967295, %v6138_v32  ;;  %v3107_v24 = vmul.f32 %v4388_v44, %v6137_v52  ;;  %v2464_v48 = vmul.f32 %v4320_v16, %v4860_v51  ;;  %v2429_v10 = vadd.f32 %v2397_v22, %v2265_v42 }
 0x234   : > { %6140 = vst [vmem:[#allocation12_spill] sm:$0xff] %v6139_v32  ;;  %v1516_v0 = vrot.slane %v5095_v20, 7  ;;  %v1973_v14 = vadd.f32 %v1845_v1, %v1681_v35  ;;  %v2006_v39 = vrot.slane %v5089_v12, 1  ;;  %v2005_v56 = vrot.slane %v5095_v20, 1 }
 0x235   : > { %v2465_v36 = vmul.f32 %v4320_v16, %v5000_v7  ;;  %v2532_v34 = vmul.f32 %v4333_v27, %v5081_v8  ;;  %v6141_v52 = vrot.slane %v5000_v7, 7  ;;  %v2234_v35 = vsel %vm5105_vm9, %v2138_v29, 0.0  ;;  %v5142_v29 = vpop.f32.mrf.mxu1 }
 0x236   : > { %v1517_v55 = vrot.slane %v5089_v12, 7  ;;  %v5132_v42 = vsel %vm2016_vm6, %v2005_v56, %v2006_v39  ;;  %v5136_v22 = vsel %vm2016_vm6, %v2004_v46, %v2005_v56  ;;  %v2496_v1 = vadd.f32 %v2464_v48, %v2428_v5 }
 0x237   : > { %v5125_v15 = vsel %vm1527_vm5, %v6141_v52, %v1516_v0  ;;  %6142 = vst [vmem:[#allocation14_spill] sm:$0xff] %v5136_v22  ;;  %v2291_v8 = vmul.f32 %v4289_v45, %v6143_v38  ;;  %v2497_v51 = vadd.f32 %v2465_v36, %v2429_v10  ;;  %v2266_v52 = vadd.f32 %v2234_v35, %v1973_v14 }
 0x238   : > { %v2302_v7 = vmul.f32 %v4289_v45, %v5125_v15  ;;  %vm3325_vm0 = vcmask 130048   ;;  %v3235_v58 = vadd.f32 %v3107_v24, %v3039_v9  ;;  %v6144_v59 = vrot.slane %v5093_v11, 7 }
 0x239   : > { %v2533_v46 = vmul.f32 %v4333_v27, %v5136_v22  ;;  %v2534_v5 = vmul.f32 %v4333_v27, %v5132_v42  ;;  %v5156_v48 = vsel %vm1527_vm5, %v1516_v0, %v1517_v55  ;;  %v2466_v9 = vmul.f32 %v4320_v16, %v5095_v20  ;;  %v981_v0 = vpop.f32.mrf.mxu1 }
 0x23a   : > { %v5148_v17 = vsel %vm1527_vm5, %v1517_v55, %v6144_v59  ;;  %v2430_v10 = vadd.f32 %v2302_v7, %v2266_v52  ;;  %v2628_v24 = vsel %vm4963_vm11, %v2532_v34, 0.0  ;;  %v3266_v59 = vmax.f32 %v5097_v47, 0.0 }
 0x23b   : > { %v2255_v14 = vadd.f32 %v2127_v25, %v1962_v28  ;;  %v5987_v38 = vrot.slane %v5093_v11, 1  ;;  %v2660_v56 = vadd.f32 %v2628_v24, %v2496_v1  ;;  %v2387_v36 = vsel %vm4989_vm13, %v2291_v8, 0.0 }
 0x23c   : > { %v2498_v35 = vadd.f32 %v2466_v9, %v2430_v10  ;;  %v2661_v22 = vadd.f32 %v2533_v46, %v2497_v51  ;;  %v2760_v7 = vmul.f32 %v4360_v3, %v5125_v15  ;;  %v3267_v55 = vmax.f32 %v3235_v58, 0.0 }
 0x23d   : > { %v2762_v52 = vmul.f32 %v4360_v3, %v5148_v17  ;;  %v2630_v47 = vsel %vm5105_vm9, %v2534_v5, 0.0  ;;  %v2761_v28 = vmul.f32 %v4360_v3, %v5156_v48  ;;  %v2924_v8 = vmul.f32 %v4382_v33, %v5095_v20 }
 0x23e   : > { %v2662_v25 = vadd.f32 %v2630_v47, %v2498_v35  ;;  %v2888_v34 = vadd.f32 %v2760_v7, %v2660_v56  ;;  %v3120_v51 = vmul.f32 %v4388_v44, %v5132_v42  ;;  %v5182_v58 = vsel %vm2016_vm6, %v2006_v39, %v5987_v38 }
 0x23f   : > { %6145 = vst [vmem:[#allocation13_spill] sm:$0xff] %v5182_v58  ;;  %v2857_v1 = vsel %vm5017_vm14, %v2761_v28, 0.0  ;;  %v982_v46 = vadd.f32 %v5035_v23, %v981_v0  ;;  %v1101_v5 = vadd.s32 192, %v4192_v57  ;;  %v2925_v10 = vmul.f32 %v4382_v33, %v5089_v12 }
 0x240   : > { %v2889_v9 = vadd.f32 %v2857_v1, %v2661_v22  ;;  %v5190_v24 = vadd.f32 %v2762_v52, %v2662_v25  ;;  %v3052_v56 = vadd.f32 %v2924_v8, %v2888_v34  ;;  %v6147_v35 = vmax.f32 %v6125_v43, 0.0  ;;  %v6152_v43 = vld [vmem:[#allocation16_spill] sm:$0xff] }
 0x241   : > { %v2419_v47 = vadd.f32 %v2387_v36, %v2255_v14  ;;  %v6148_v39 = vand.u32 15, %v4635_v63  ;;  %v3216_v0 = vsel %vm4963_vm11, %v3120_v51, 0.0  ;;  %v1036_v28 = vmax.f32 %v982_v46, 0.0 }
 0x242   : > { %6146 = vst [vmem:[#allocation15_spill] sm:$0xff] %v5190_v24  ;;  %v3297_v7 = vmin.f32 %v6147_v35, 6.0  ;;  %v3121_v22 = vmul.f32 %v4388_v44, %v5182_v58  ;;  %v1100_v52 = vadd.s32 184, %v4192_v57  ;;  %v3053_v25 = vadd.f32 %v2925_v10, %v2889_v9  ;;  %v6157_v9 = vld [vmem:[#allocation23_spill] sm:$0xff]  ;;  %v3916_v35 = vpop.f32.mrf.mxu1 }
 0x243   : > { %vm5196_vm1 = vcmp.ge.s32.totalorder %v6148_v39, 1  ;;  %v5205_v34 = vadd.f32 %v3216_v0, %v3052_v56  ;;  %v2455_v14 = vmul.f32 %v4320_v16, %v6152_v43  ;;  %v3298_v63 = vmin.f32 %v3266_v59, 6.0  ;;  %v6159_v0 = vld [vmem:[#allocation18_spill] sm:$0xff] }
 0x244   : > { %v5209_v36 = vmin.f32 %v1036_v28, 6.0  ;;  %v1281_v8 = vand.u32 15, %v1101_v5  ;;  %v5213_v41 = vsel %vm3325_vm0, %v5021_v19, 0.0  ;;  %v5217_v51 = vmul.f32 %v4388_v44, %v4354_v53  ;;  %v6158_v19 = vld [vmem:[#allocation21_spill] sm:$0xff] }
 0x245   : > { %6151 = vst [vmem:[#allocation8_spill] sm:$0xff] %v5205_v34  ;;  %v3299_v1 = vmin.f32 %v3267_v55, 6.0  ;;  %v5219_v46 = vadd.f32 %v3121_v22, %v3053_v25  ;;  %v5223_v10 = vsel %vm3325_vm0, %v5058_v49, 0.0  ;;  %v5226_v59 = vsel %vm3325_vm0, %v3297_v7, 0.0  ;;  %v6161_v28 = vld [vmem:[#allocation25_spill] sm:$0xff]  ;;  %v6164_v25 = vld [vmem:[#allocation22_spill] sm:$0xff]  ;;  %v984_v22 = vpop.f32.mrf.mxu1 }
 0x246   : > { %6153 = vst [vmem:[#allocation19_spill] sm:$0xff] %v5209_v36  ;;  %6155 = vst [vmem:[#allocation16_spill] sm:$0xff] %v5223_v10  ;;  %v3268_v5 = vmax.f32 %v6157_v9, 0.0  ;;  %v2487_v56 = vadd.f32 %v2455_v14, %v2419_v47  ;;  %v2523_v39 = vmul.f32 %v4333_v27, %v6158_v19  ;;  %v2914_v53 = vmul.f32 %v4382_v33, %v6159_v0  ;;  %v6167_v0 = vld [vmem:[#allocation24_spill] sm:$0xff] }
 0x247   : > { %6154 = vst [vmem:[#allocation20_spill] sm:$0xff] %v5219_v46  ;;  %6156 = vst [vmem:[#allocation50_spill] sm:$0xff] %v5226_v59  ;;  %v1274_v44 = vand.u32 15, %v1100_v52  ;;  %v1684_v55 = vmul.f32 %v4220_v13, %v5156_v48  ;;  %v5236_v49 = vsel %vm3325_vm0, %v3298_v63, 0.0  ;;  %v3269_v7 = vmax.f32 %v6161_v28, 0.0  ;;  %v6166_v52 = vld [vmem:[#allocation26_spill] sm:$0xff] }
 0x248   : > { %6160 = vst [vmem:[#allocation23_spill] sm:$0xff] %v5236_v49  ;;  %vm5240_vm2 = vcmp.ge.s32.totalorder %v1281_v8, 1  ;;  %v3042_v43 = vadd.f32 %v2914_v53, %v6164_v25  ;;  %v5246_v14 = vsel %vm3325_vm0, %v3299_v1, 0.0  ;;  %v1674_v9 = vmul.f32 %v4220_v13, %v6166_v52 }
 0x249   : > { %6165 = vst [vmem:[#allocation21_spill] sm:$0xff] %v5246_v14  ;;  %v1683_v63 = vmul.f32 %v4220_v13, %v5125_v15  ;;  %v5252_v19 = vmin.f32 %v3268_v5, 6.0  ;;  %v1838_v28 = vmul.f32 %v4249_v21, %v6167_v0  ;;  %v2651_v8 = vadd.f32 %v2523_v39, %v2487_v56  ;;  %v6173_v14 = vld [vmem:[#allocation30_spill] sm:$0xff] }
 0x24a   : > { %v2140_v38 = vmul.f32 %v4242_v18, %v5132_v42  ;;  %v1847_v1 = vmul.f32 %v4249_v21, %v5095_v20  ;;  %vm5260_vm7 = vcmp.le.s32.totalorder %v1274_v44, 14  ;;  %v990_v15 = vadd.f32 %v5035_v23, %v5142_v29 }
 0x24b   : > { %v1780_v5 = vsel %vm5240_vm2, %v1684_v55, 0.0  ;;  %v5268_v25 = vmin.f32 %v3269_v7, 6.0  ;;  %v2751_v56 = vmul.f32 %v4360_v3, %v6166_v52  ;;  %v1848_v42 = vmul.f32 %v4249_v21, %v5089_v12 }
 0x24c   : > { %v6170_v20 = vrot.slane %v5209_v36, 7  ;;  %v6171_v39 = vrot.slane %v5093_v11, 7  ;;  %v1770_v29 = vsel %vm5196_vm1, %v1674_v9, 0.0  ;;  %v1975_v55 = vadd.f32 %v1847_v1, %v1683_v63 }
 0x24d   : > { %v993_v7 = vadd.f32 %v5035_v23, %v3916_v35  ;;  %v985_v46 = vadd.f32 %v5035_v23, %v984_v22  ;;  %v2236_v52 = vsel %vm5260_vm7, %v2140_v38, 0.0  ;;  %v1976_v32 = vadd.f32 %v1848_v42, %v1780_v5  ;;  %v5299_v38 = vld [vmem:[%s5922_s5 + $0x8] ss:$0 sm:$0xff]  ;;  %v6172_v22 = vld [vmem:[#allocation28_spill] sm:$0xff] }
 0x24e   : > { %v5280_v44 = vsel %vm1527_vm5, %v6171_v39, %v6170_v20  ;;  %v2008_v34 = vrot.slane %v5209_v36, 1  ;;  %v1102_v24 = vadd.s32 200, %v4192_v57  ;;  %v2915_v20 = vmul.f32 %v4382_v33, %v6167_v0 }
 0x24f   : > { %v1038_v39 = vmax.f32 %v990_v15, 0.0  ;;  %v2305_v9 = vmul.f32 %v4289_v45, %v5280_v44  ;;  %v1039_v63 = vmax.f32 %v993_v7, 0.0  ;;  %v2847_v35 = vsel %vm4989_vm13, %v2751_v56, 0.0 }
 0x250   : > { %v3110_v1 = vmul.f32 %v5299_v38, %v6172_v22  ;;  %v2141_v5 = vmul.f32 %v4242_v18, %v5182_v58  ;;  %v1037_v0 = vmax.f32 %v985_v46, 0.0  ;;  %v1966_v15 = vadd.f32 %v1838_v28, %v1770_v29 }
 0x251   : > { %v2879_v42 = vadd.f32 %v2847_v35, %v2651_v8  ;;  %v2131_v7 = vmul.f32 %v4242_v18, %v6173_v14  ;;  %v2268_v12 = vadd.f32 %v2236_v52, %v1975_v55  ;;  %v6174_v60 = vrot.slane %v5093_v11, 1 }
 0x252   : > { %v2269_v49 = vadd.f32 %v2141_v5, %v1976_v32  ;;  %v5313_v59 = vmin.f32 %v1037_v0, 6.0  ;;  %v1288_v22 = vand.u32 15, %v1102_v24  ;;  %v2295_v58 = vmul.f32 %v4289_v45, %v4684_v26 }
 0x253   : > { %v5311_v56 = vsel %vm2016_vm6, %v6174_v60, %v2008_v34  ;;  %v5317_v46 = vmin.f32 %v1038_v39, 6.0  ;;  %v2401_v28 = vsel %vm5240_vm2, %v2305_v9, 0.0  ;;  %v5321_v8 = vmin.f32 %v1039_v63, 6.0 }
 0x254   : > { %6175 = vst [vmem:[#allocation18_spill] sm:$0xff] %v5311_v56  ;;  %6176 = vst [vmem:[#allocation25_spill] sm:$0xff] %v5313_v59  ;;  %v3206_v55 = vsel %vm4477_vm12, %v3110_v1, 0.0  ;;  %v1685_v52 = vmul.f32 %v4220_v13, %v5148_v17  ;;  %v2304_v32 = vmul.f32 %v4289_v45, %v5148_v17  ;;  %v1520_v24 = vrot.slane %v5313_v59, 7 }
 0x255   : > { %6177 = vst [vmem:[#allocation22_spill] sm:$0xff] %v5317_v46  ;;  %6178 = vst [vmem:[#allocation26_spill] sm:$0xff] %v5321_v8  ;;  %v5330_v35 = vadd.f32 %v3206_v55, %v3042_v43  ;;  %v2259_v26 = vadd.f32 %v2131_v7, %v1966_v15  ;;  %v2142_v39 = vmul.f32 %v4242_v18, %v5311_v56  ;;  %v2009_v9 = vrot.slane %v5313_v59, 1 }
 0x256   : > { %v1849_v63 = vmul.f32 %v4249_v21, %v5093_v11  ;;  %v2432_v1 = vadd.f32 %v2304_v32, %v2268_v12  ;;  %v2433_v5 = vadd.f32 %v2401_v28, %v2269_v49  ;;  %vm5337_vm12 = vcmp.le.s32.totalorder %v1288_v22, 14 }
 0x257   : > { %v6180_v0 = vmov 0  ;;  %v2391_v17 = vsel %vm5196_vm1, %v2295_v58, 0.0  ;;  %v2468_v43 = vmul.f32 %v4320_v16, %v5093_v11  ;;  %v2010_v15 = vrot.slane %v5317_v46, 1  ;;  %v5370_v11 = vpop.f32.mrf.mxu1 }
 0x258   : > { %v6181_v0 = vsel %vm5337_vm12, 4294967295, %v6180_v0  ;;  %v1977_v60 = vadd.f32 %v1849_v63, %v1685_v52  ;;  %v1521_v29 = vrot.slane %v5317_v46, 7  ;;  %v2469_v12 = vmul.f32 %v4320_v16, %v5209_v36 }
 0x259   : > { %6182 = vst [vmem:[#allocation24_spill] sm:$0xff] %v6181_v0  ;;  %v6183_v49 = vrot.slane %v5209_v36, 7  ;;  %v2536_v58 = vmul.f32 %v4333_v27, %v5311_v56  ;;  %v5360_v28 = vsel %vm2016_vm6, %v2009_v9, %v2010_v15  ;;  %v5364_v55 = vsel %vm2016_vm6, %v2008_v34, %v2009_v9 }
 0x25a   : > { %6184 = vst [vmem:[#allocation28_spill] sm:$0xff] %v5364_v55  ;;  %v2238_v52 = vsel %vm5337_vm12, %v2142_v39, 0.0  ;;  %v2501_v32 = vadd.f32 %v2469_v12, %v2433_v5  ;;  %v2500_v7 = vadd.f32 %v2468_v43, %v2432_v1  ;;  %v3043_v56 = vadd.f32 %v2915_v20, %v2879_v42 }
 0x25b   : > { %v5354_v22 = vsel %vm1527_vm5, %v6183_v49, %v1520_v24  ;;  %v2270_v63 = vadd.f32 %v2238_v52, %v1977_v60  ;;  %v3270_v36 = vmax.f32 %v5330_v35, 0.0  ;;  %v6185_v10 = vrot.slane %v5321_v8, 7  ;;  %v6254_v5 = vld [vmem:[#allocation25_spill] sm:$0xff] }
 0x25c   : > { %v2306_v49 = vmul.f32 %v4289_v45, %v5354_v22  ;;  %v2537_v39 = vmul.f32 %v4333_v27, %v5364_v55  ;;  %v6187_v9 = vand.u32 15, %v4652_v30  ;;  %v5389_v20 = vsel %vm1527_vm5, %v1520_v24, %v1521_v29  ;;  %v6236_v55 = vld [vmem:[#allocation5_spill] sm:$0xff] }
 0x25d   : > { %v5377_v34 = vsel %vm1527_vm5, %v1521_v29, %v6185_v10  ;;  %6190 = vst [vmem:[#allocation17_spill] sm:$0xff] %v5389_v20  ;;  %v2470_v35 = vmul.f32 %v4320_v16, %v5313_v59  ;;  %v2538_v10 = vmul.f32 %v4333_v27, %v5360_v28  ;;  %v2423_v1 = vadd.f32 %v2391_v17, %v2259_v26 }
 0x25e   : > { %6186 = vst [vmem:[#allocation30_spill] sm:$0xff] %v5377_v34  ;;  %vm5383_vm11 = vcmp.ge.s32.totalorder %v6187_v9, 1  ;;  %v2434_v42 = vadd.f32 %v2306_v49, %v2270_v63  ;;  %v3111_v43 = vmul.f32 %v5299_v38, %v6173_v14  ;;  %v2632_v60 = vsel %vm5260_vm7, %v2536_v58, 0.0  ;;  %v997_v63 = vpop.f32.mrf.mxu1 }
 0x25f   : > { %v2664_v52 = vadd.f32 %v2632_v60, %v2500_v7  ;;  %v2665_v24 = vadd.f32 %v2537_v39, %v2501_v32  ;;  %v2764_v29 = vmul.f32 %v4360_v3, %v5354_v22  ;;  %v2766_v9 = vmul.f32 %v4360_v3, %v5377_v34 }
 0x260   : > { %v2502_v12 = vadd.f32 %v2470_v35, %v2434_v42  ;;  %v3239_v49 = vadd.f32 %v3111_v43, %v3043_v56  ;;  %v2634_v26 = vsel %vm5337_vm12, %v2538_v10, 0.0  ;;  %v2765_v14 = vmul.f32 %v4360_v3, %v5389_v20 }
 0x261   : > { %v2892_v30 = vadd.f32 %v2764_v29, %v2664_v52  ;;  %v2928_v7 = vmul.f32 %v4382_v33, %v5313_v59  ;;  %v3124_v58 = vmul.f32 %v5299_v38, %v5360_v28  ;;  %v6191_v32 = vrot.slane %v5321_v8, 1  ;;  %v6237_v59 = vld [vmem:[#allocation44_spill] sm:$0xff] }
 0x262   : > { %v2666_v17 = vadd.f32 %v2634_v26, %v2502_v12  ;;  %v2861_v39 = vsel %vm5240_vm2, %v2765_v14, 0.0  ;;  %v998_v42 = vadd.f32 %v5035_v23, %v997_v63  ;;  %v1105_v35 = vadd.s32 224, %v4192_v57 }
 0x263   : > { %v5416_v56 = vsel %vm2016_vm6, %v2010_v15, %v6191_v32  ;;  %v2929_v10 = vmul.f32 %v4382_v33, %v5317_v46  ;;  %v2893_v43 = vadd.f32 %v2861_v39, %v2665_v24  ;;  %v3056_v12 = vadd.f32 %v2928_v7, %v2892_v30 }
 0x264   : > { %6192 = vst [vmem:[#allocation51_spill] sm:$0xff] %v5416_v56  ;;  %v5424_v60 = vadd.f32 %v2766_v9, %v2666_v17  ;;  %v2459_v52 = vmul.f32 %v4320_v16, %v4632_v31  ;;  %v1678_v15 = vmul.f32 %v4220_v13, %v4775_v37  ;;  %v3220_v47 = vsel %vm5260_vm7, %v3124_v58, 0.0 }
 0x265   : > { %v1040_v29 = vmax.f32 %v998_v42, 0.0  ;;  %v3125_v63 = vmul.f32 %v5299_v38, %v5416_v56  ;;  %v3057_v26 = vadd.f32 %v2929_v10, %v2893_v43  ;;  %v5434_v14 = vadd.f32 %v3220_v47, %v3056_v12 }
 0x266   : > { %6193 = vst [vmem:[#allocation52_spill] sm:$0xff] %v5424_v60  ;;  %v1309_v24 = vand.u32 15, %v1105_v35  ;;  %v5438_v30 = vsel %vm3325_vm0, %v5252_v19, 0.0  ;;  %v3271_v9 = vmax.f32 %v3239_v49, 0.0  ;;  %v2491_v31 = vadd.f32 %v2459_v52, %v2423_v1  ;;  %v6201_v35 = vld [vmem:[#allocation31_spill] sm:$0xff] }
 0x267   : > { %6194 = vst [vmem:[#allocation53_spill] sm:$0xff] %v5434_v14  ;;  %6195 = vst [vmem:[#allocation54_spill] sm:$0xff] %v5438_v30  ;;  %v5440_v17 = vmin.f32 %v1040_v29, 6.0  ;;  %v5444_v53 = vsel %vm3325_vm0, %v5268_v25, 0.0  ;;  %v3302_v7 = vmin.f32 %v3270_v36, 6.0  ;;  %v2918_v58 = vmul.f32 %v4382_v33, %v4647_v61  ;;  %v6204_v29 = vld [vmem:[#allocation32_spill] sm:$0xff] }
 0x268   : > { %6197 = vst [vmem:[#allocation56_spill] sm:$0xff] %v5444_v53  ;;  %v5448_v32 = vadd.f32 %v3125_v63, %v3057_v26  ;;  %v2527_v39 = vmul.f32 %v4333_v27, %v4710_v2  ;;  %v1774_v19 = vsel %vm5383_vm11, %v1678_v15, 0.0  ;;  %v2755_v1 = vmul.f32 %v4360_v3, %v4775_v37  ;;  %v6203_v15 = vld [vmem:[#allocation39_spill] sm:$0xff] }
 0x269   : > { %6196 = vst [vmem:[#allocation55_spill] sm:$0xff] %v5440_v17  ;;  %v1688_v49 = vmul.f32 %v4220_v13, %v5389_v20  ;;  %v1842_v36 = vmul.f32 %v4249_v21, %v4719_v62  ;;  %v3114_v61 = vmul.f32 %v5299_v38, %v4814_v40  ;;  %v5995_v25 = vrot.slane %v5440_v17, 7 }
 0x26a   : > { %6198 = vst [vmem:[#allocation57_spill] sm:$0xff] %v5448_v32  ;;  %vm5463_vm13 = vcmp.ge.s32.totalorder %v1309_v24, 1  ;;  %v3046_v2 = vadd.f32 %v2918_v58, %v4733_v4  ;;  %v3272_v10 = vmax.f32 %v6201_v35, 0.0  ;;  %v3303_v37 = vmin.f32 %v3271_v9, 6.0  ;;  %v3920_v9 = vpop.f32.mrf.mxu1 }
 0x26b   : > { %v2655_v43 = vadd.f32 %v2527_v39, %v2491_v31  ;;  %v5470_v12 = vsel %vm3325_vm0, %v3302_v7, 0.0  ;;  %v5474_v52 = vmul.f32 %v4320_v16, %v4848_v50  ;;  %v1970_v40 = vadd.f32 %v1842_v36, %v1774_v19 }
 0x26c   : > { %6202 = vst [vmem:[#allocation31_spill] sm:$0xff] %v5470_v12  ;;  %v2135_v47 = vmul.f32 %v4242_v18, %v6203_v15  ;;  %v3273_v63 = vmax.f32 %v6204_v29, 0.0  ;;  %v2851_v4 = vsel %vm5196_vm1, %v2755_v1, 0.0  ;;  %v2299_v26 = vmul.f32 %v4289_v45, %v4903_v54 }
 0x26d   : > { %v1784_v24 = vsel %vm5463_vm13, %v1688_v49, 0.0  ;;  %v3210_v50 = vsel %vm4628_vm15, %v3114_v61, 0.0  ;;  %v1852_v7 = vmul.f32 %v4249_v21, %v5317_v46  ;;  %v1006_v58 = vadd.f32 %v5035_v23, %v5370_v11  ;;  %v6221_v46 = vld [vmem:[#allocation37_spill] sm:$0xff] }
 0x26e   : > { %v6206_v6 = vrot.slane %v5321_v8, 7  ;;  %v3304_v39 = vmin.f32 %v3272_v10, 6.0  ;;  %v5500_v19 = vsel %vm3325_vm0, %v3303_v37, 0.0  ;;  %v2883_v1 = vadd.f32 %v2851_v4, %v2655_v43  ;;  %v1000_v43 = vpop.f32.mrf.mxu1 }
 0x26f   : > { %6208 = vst [vmem:[#allocation32_spill] sm:$0xff] %v5500_v19  ;;  %v5502_v49 = vadd.f32 %v3210_v50, %v3046_v2  ;;  %v2919_v36 = vmul.f32 %v4382_v33, %v4719_v62  ;;  %v2263_v61 = vadd.f32 %v2135_v47, %v1970_v40  ;;  %v1980_v11 = vadd.f32 %v1852_v7, %v1784_v24 }
 0x270   : > { %v5497_v54 = vsel %vm1527_vm5, %v6206_v6, %v5995_v25  ;;  %v1009_v35 = vadd.f32 %v5035_v23, %v3920_v9  ;;  %v2395_v29 = vsel %vm5383_vm11, %v2299_v26, 0.0  ;;  %v2012_v31 = vrot.slane %v5440_v17, 1  ;;  %v6213_v25 = vld [vmem:[#allocation3_spill] sm:$0xff] }
 0x271   : > { %6207 = vst [vmem:[#allocation39_spill] sm:$0xff] %v5497_v54  ;;  %v2309_v10 = vmul.f32 %v4289_v45, %v5497_v54  ;;  %v1106_v37 = vadd.s32 232, %v4192_v57  ;;  %v5513_v2 = vmin.f32 %v3273_v63, 6.0  ;;  %v2145_v62 = vmul.f32 %v4242_v18, %v5416_v56 }
 0x272   : > { %v1042_v40 = vmax.f32 %v1006_v58, 0.0  ;;  %v1043_v47 = vmax.f32 %v1009_v35, 0.0  ;;  %v5518_v4 = vsel %vm3325_vm0, %v3304_v39, 0.0  ;;  %v5520_v24 = vadd.f32 %v2919_v36, %v2883_v1 }
 0x273   : > { %6209 = vst [vmem:[#allocation29_spill] sm:$0xff] %v5518_v4  ;;  %v1099_v9 = vadd.s32 176, %v4192_v57  ;;  %v5524_v50 = vadd.f32 %v2395_v29, %v2263_v61  ;;  %v2273_v7 = vadd.f32 %v2145_v62, %v1980_v11  ;;  %v1001_v63 = vadd.f32 %v5035_v23, %v1000_v43  ;;  %v6212_v62 = vld [vmem:[#allocation7_spill] sm:$0xff] }
 0x274   : > { %v5526_v6 = vmin.f32 %v1043_v47, 6.0  ;;  %v1689_v58 = vmul.f32 %v4220_v13, %v5377_v34  ;;  %v6210_v35 = vrot.slane %v5321_v8, 1  ;;  %v2405_v1 = vsel %vm5463_vm13, %v2309_v10, 0.0  ;;  %v6222_v34 = vld [vmem:[#allocation47_spill] sm:$0xff] }
 0x275   : > { %v1316_v36 = vand.u32 15, %v1106_v37  ;;  %v5539_v61 = vmin.f32 %v1042_v40, 6.0  ;;  %v1108_v11 = vadd.s32 248, %v4192_v57  ;;  %v1113_v29 = vand.u32 15, %v4192_v57 }
 0x276   : > { %v5535_v39 = vsel %vm2016_vm6, %v6210_v35, %v2012_v31  ;;  %v1526_v23 = vrot.slane %v5526_v6, 7  ;;  %v1267_v43 = vand.u32 15, %v1099_v9  ;;  %v5546_v47 = vmul.f32 %v4220_v13, %v6212_v62 }
 0x277   : > { %6211 = vst [vmem:[#allocation58_spill] sm:$0xff] %v5535_v39  ;;  %v1853_v35 = vmul.f32 %v4249_v21, %v5321_v8  ;;  %v1041_v26 = vmax.f32 %v1001_v63, 0.0  ;;  %v5551_v10 = vadd.s32 208, %v4192_v57  ;;  %v2146_v37 = vmul.f32 %v4242_v18, %v5535_v39  ;;  %v6220_v8 = vld [vmem:[#allocation36_spill] sm:$0xff] }
 0x278   : > { %v2437_v40 = vadd.f32 %v2405_v1, %v2273_v7  ;;  %v6214_v32 = vrot.slane %v6213_v25, 7  ;;  %vm5560_vm15 = vcmp.le.s32.totalorder %v1316_v36, 14  ;;  %v1525_v56 = vrot.slane %v5539_v61, 7 }
 0x279   : > { %v1981_v14 = vadd.f32 %v1853_v35, %v1689_v58  ;;  %v2473_v39 = vmul.f32 %v4320_v16, %v5440_v17  ;;  %v1330_v7 = vand.u32 15, %v1108_v11  ;;  %vm5568_vm14 = vcmp.ge.s32.totalorder %v1113_v29, 1 }
 0x27a   : > { %v1559_v9 = vsel %vm1527_vm5, %v1526_v23, %v6214_v32  ;;  %v2014_v32 = vrot.slane %v5539_v61, 1  ;;  %v5577_v54 = vmin.f32 %v1041_v26, 6.0  ;;  %v2242_v11 = vsel %vm5560_vm15, %v2146_v37, 0.0  ;;  %v6226_v37 = vld [vmem:[#allocation46_spill] sm:$0xff] }
 0x27b   : > { %v1662_v0 = vmul.f32 %v4220_v13, %v1559_v9  ;;  %v2281_v63 = vmul.f32 %v4289_v45, %v1559_v9  ;;  %v2505_v9 = vadd.f32 %v2473_v39, %v2437_v40  ;;  %v2015_v29 = vrot.slane %v5526_v6, 1 }
 0x27c   : > { %v2837_v12 = vsel %vm5568_vm14, %v6222_v34, 0.0  ;;  %v1528_v26 = vsel %vm1527_vm5, %v1525_v56, %v1526_v23  ;;  %vm5591_vm1 = vcmp.le.s32.totalorder %v1330_v7, 14  ;;  %v2274_v7 = vadd.f32 %v2242_v11, %v1981_v14 }
 0x27d   : > { %v1758_v36 = vsel %vm4897_vm10, %v1662_v0, 0.0  ;;  %v2377_v35 = vsel %vm5568_vm14, %v2281_v63, 0.0  ;;  %v1524_v0 = vrot.slane %v5577_v54, 7  ;;  %v2013_v63 = vrot.slane %v5577_v54, 1 }
 0x27e   : > { %v1954_v4 = vadd.f32 %v6220_v8, %v1758_v36  ;;  %v2477_v19 = vadd.f32 %v6221_v46, %v2377_v35  ;;  %v6225_v46 = vld [vmem:[#allocation45_spill] sm:$0xff]  ;;  %v6227_v36 = vrot.slane %v5440_v17, 7  ;;  %vm5611_vm2 = vcmp.ge.s32.totalorder %v1267_v43, 1 }
 0x27f   : > { %v5605_v1 = vsel %vm2016_vm6, %v2013_v63, %v2014_v32  ;;  %v5609_v23 = vsel %vm2016_vm6, %v2012_v31, %v2013_v63  ;;  %v1855_v17 = vmul.f32 %v4249_v21, %v5577_v54  ;;  %v6233_v31 = vrot.slane %v6213_v25, 1 }
 0x280   : > { %v2247_v39 = vadd.f32 %v6225_v46, %v1954_v4  ;;  %v2641_v40 = vadd.f32 %v6226_v37, %v2477_v19  ;;  %v5601_v34 = vsel %vm1527_vm5, %v6227_v36, %v1524_v0  ;;  %v6231_v19 = vld [vmem:[#allocation4_spill] sm:$0xff]  ;;  %v2312_v43 = vmul.f32 %v4289_v45, %v1528_v26 }
 0x281   : > { %6228 = vst [vmem:[#allocation7_spill] sm:$0xff] %v5601_v34  ;;  %v6232_v4 = vsel %vm4897_vm10, %v6231_v19, 0.0  ;;  %v1691_v36 = vmul.f32 %v4220_v13, %v5601_v34  ;;  %v2048_v14 = vsel %vm2016_vm6, %v2015_v29, %v6233_v31  ;;  %v2148_v11 = vmul.f32 %v4242_v18, %v5605_v1 }
 0x282   : > { %v2411_v46 = vadd.f32 %v6232_v4, %v2247_v39  ;;  %v2869_v37 = vadd.f32 %v2837_v12, %v2641_v40  ;;  %v2310_v63 = vmul.f32 %v4289_v45, %v5601_v34  ;;  %v6234_v12 = vld [vmem:[#allocation34_spill] sm:$0xff]  ;;  %v6235_v40 = vld [vmem:[#allocation35_spill] sm:$0xff]  ;;  %v2541_v53 = vmul.f32 %v4333_v27, %v5609_v23 }
 0x283   : > { %v1983_v4 = vadd.f32 %v1855_v17, %v1691_v36  ;;  %v2244_v25 = vsel %vm5591_vm1, %v2148_v11, 0.0  ;;  %v2474_v30 = vmul.f32 %v4320_v16, %v5577_v54  ;;  %v2542_v20 = vmul.f32 %v4333_v27, %v5605_v1 }
 0x284   : > { %v2479_v39 = vadd.f32 %v6234_v12, %v2411_v46  ;;  %v3033_v19 = vadd.f32 %v6235_v40, %v2869_v37  ;;  %v2438_v31 = vadd.f32 %v2310_v63, %v2274_v7  ;;  %v5646_v17 = vsel %vm1527_vm5, %v1524_v0, %v1525_v56  ;;  %v6238_v12 = vld [vmem:[#allocation41_spill] sm:$0xff] }
 0x285   : > { %v2276_v37 = vadd.f32 %v2244_v25, %v1983_v4  ;;  %v2476_v36 = vmul.f32 %v4320_v16, %v5526_v6  ;;  %v2544_v7 = vmul.f32 %v4333_v27, %v2048_v14  ;;  %v2638_v63 = vsel %vm5560_vm15, %v2542_v20, 0.0  ;;  %v6240_v25 = vld [vmem:[#allocation49_spill] sm:$0xff] }
 0x286   : > { %v2643_v34 = vadd.f32 %v6236_v55, %v2479_v39  ;;  %v3229_v46 = vadd.f32 %v6237_v59, %v3033_v19  ;;  %v2506_v11 = vadd.f32 %v2474_v30, %v2438_v31  ;;  %v6239_v55 = vsel %vm4897_vm10, %v6238_v12, 0.0 }
 0x287   : > { %v2440_v40 = vadd.f32 %v2312_v43, %v2276_v37  ;;  %v2669_v19 = vadd.f32 %v2541_v53, %v2505_v9  ;;  %v5659_v56 = vsel %vm2016_vm6, %v2014_v32, %v2015_v29  ;;  %v2770_v0 = vmul.f32 %v4360_v3, %v1528_v26 }
 0x288   : > { %v2871_v39 = vadd.f32 %v6239_v55, %v2643_v34  ;;  %v3261_v59 = vmax.f32 %v3229_v46, 0.0  ;;  %v2670_v4 = vadd.f32 %v2638_v63, %v2506_v11  ;;  %v2769_v30 = vmul.f32 %v4360_v3, %v5646_v17  ;;  %v6241_v11 = vld [vmem:[#allocation40_spill] sm:$0xff]  ;;  %v6242_v55 = vld [vmem:[#allocation6_spill] sm:$0xff] }
 0x289   : > { %v3130_v58 = vmul.f32 %v5299_v38, %v2048_v14  ;;  %v2508_v12 = vadd.f32 %v2476_v36, %v2440_v40  ;;  %v2640_v34 = vsel %vm5591_vm1, %v2544_v7, 0.0  ;;  %v2934_v53 = vmul.f32 %v4382_v33, %v5526_v6 }
 0x28a   : > { %v3035_v20 = vadd.f32 %v6240_v25, %v2871_v39  ;;  %v3293_v31 = vmin.f32 %v3261_v59, 6.0  ;;  %v2865_v32 = vsel %vm5463_vm13, %v2769_v30, 0.0  ;;  %v2898_v9 = vadd.f32 %v2770_v0, %v2670_v4  ;;  %v3959_v59 = vld [vmem:[%s5923_s6] sm:$0xff]  }
 0x28b   : > { %v2933_v29 = vmul.f32 %v4382_v33, %v5539_v61  ;;  %v5675_v43 = vadd.f32 %v2640_v34, %v2508_v12  ;;  %v2897_v14 = vadd.f32 %v2865_v32, %v2669_v19  ;;  %v3115_v46 = vmul.f32 %v5299_v38, %v6203_v15  ;;  %v6243_v30 = vld [vmem:[#allocation14_spill] sm:$0xff] }
 0x28c   : > { %v3231_v26 = vadd.f32 %v5217_v51, %v3035_v20  ;;  %v1778_v8 = vsel %vm5611_vm2, %v5546_v47, 0.0  ;;  %v3129_v42 = vmul.f32 %v5299_v38, %v5659_v56  ;;  %v3062_v6 = vadd.f32 %v2934_v53, %v2898_v9  ;;  %v3522_v20 = vld [vmem:[%s5925_s8] sm:$0xff] }
 0x28d   : > { %v3226_v37 = vsel %vm5560_vm15, %v3130_v58, 0.0  ;;  %v3326_v51 = vsel %vm3325_vm0, %v3293_v31, 0.0  ;;  %v3061_v7 = vadd.f32 %v2933_v29, %v2897_v14  ;;  %v2531_v63 = vmul.f32 %v4333_v27, %v6241_v11  ;;  %v5715_v31 = vld [vmem:[%s5925_s8 + $0x8] sm:$0xff]  ;;  %v6244_v12 = vld [vmem:[#allocation38_spill] sm:$0xff]  ;;  %v6247_v14 = vld [vmem:[#allocation16_spill] sm:$0xff] }
 0x28e   : > { %v3263_v36 = vmax.f32 %v3231_v26, 0.0  ;;  %v3243_v15 = vadd.f32 %v3115_v46, %v5520_v24  ;;  %v1846_v39 = vmul.f32 %v4249_v21, %v6242_v55  ;;  %v5692_v47 = vadd.f32 %v3226_v37, %v3062_v6 }
 0x28f   : > { %v2495_v60 = vadd.f32 %v5474_v52, %v5524_v50  ;;  %v1295_v40 = vand.u32 15, %v5551_v10  ;;  %v5700_v0 = vadd.f32 %v3129_v42, %v3061_v7  ;;  %v2139_v24 = vmul.f32 %v4242_v18, %v6243_v30  ;;  %v6249_v7 = vld [vmem:[#allocation43_spill] sm:$0xff] }
 0x290   : > { %v3295_v19 = vmin.f32 %v3263_v36, 6.0  ;;  %v1974_v4 = vadd.f32 %v1846_v39, %v1778_v8  ;;  %v3328_v25 = vadd.f32 %v5213_v41, %v3326_v51  ;;  %v2303_v58 = vmul.f32 %v4289_v45, %v5156_v48  ;;  %v6250_v39 = vld [vmem:[#allocation50_spill] sm:$0xff] }
 0x291   : > { %v1104_v52 = vadd.s32 216, %v4192_v57  ;;  %v3975_v10 = vmov 0.0   ;;  %v5719_v41 = vsel %vm3325_vm0, %v5513_v2, 0.0  ;;  %v2922_v34 = vmul.f32 %v4382_v33, %v6244_v12 }
 0x292   : > { %v3329_v50 = vsel %vm3325_vm0, %v3295_v19, 0.0  ;;  %3921 = vmatprep.subr.bf16.mxu1 %v3975_v10  ;;  %v1686_v48 = vmul.f32 %v4220_v13, %v5280_v44  ;;  %vm3976_vm5 = vmmov 0   ;;  %v2659_v32 = vadd.f32 %v2531_v63, %v2495_v60  ;;  %v6252_v19 = vld [vmem:[#allocation19_spill] sm:$0xff] }
 0x293   : > { %v3330_v53 = vadd.f32 %v3329_v50, %v3328_v25  ;;  %3922 = vmatpush3.bf16.msra.mxu1 %v3959_v59  ;;  %3923 = vmatprep.mubr.msk.bf16.mxu1 %vm3976_vm5, %v3975_v10  ;;  %v2759_v9 = vmul.f32 %v4360_v3, %v6212_v62  ;;  %vm5727_vm6 = vcmp.ge.s32.totalorder %v1295_v40, 1  ;;  %v3804_v2 = vcombine.high %v3522_v20, %v3522_v20 }
 0x294   : > { %v2267_v26 = vadd.f32 %v2139_v24, %v1974_v4  ;;  %v3803_v8 = vcombine.low %v3522_v20, %v3522_v20  ;;  %v3806_v42 = vcombine.high %v5715_v31, %v5715_v31  ;;  %v6248_v6 = vmax.f32 %v5502_v49, 0.0 }
 0x295   : > { %v3332_v46 = vadd.f32 %v6247_v14, %v3330_v53  ;;  %v3275_v36 = vmax.f32 %v3243_v15, 0.0  ;;  %v2399_v51 = vsel %vm5611_vm2, %v2303_v58, 0.0  ;;  %v1302_v62 = vand.u32 15, %v1104_v52  ;;  %3807 = vmatprep.subr.msk.bf16.mxu0 %vm847_vm3, %v3804_v2  ;;  %v6251_v15 = vld [vmem:[#allocation9_spill] sm:$0xff]  ;;  %v6253_v52 = vld [vmem:[#allocation23_spill] sm:$0xff]  ;;  %v6257_v53 = vld [vmem:[#allocation28_spill] sm:$0xff] }
 0x296   : > { %v3306_v37 = vmin.f32 %v6248_v6, 6.0  ;;  %v3276_v11 = vmax.f32 %v6249_v7, 0.0  ;;  %v1782_v63 = vsel %vm5727_vm6, %v1686_v48, 0.0  ;;  %v3560_v60 = vsel %vm847_vm3, %v3803_v8, 0  ;;  %3809 = vmatprep.subr.msk.bf16.mxu1 %vm847_vm3, %v3806_v42  ;;  %v6260_v14 = vld [vmem:[#allocation21_spill] sm:$0xff]  ;;  %v6261_v42 = vld [vmem:[#allocation42_spill] sm:$0xff] }
 0x297   : > { %v3334_v59 = vadd.f32 %v6250_v39, %v3332_v46  ;;  %v2855_v49 = vsel %vm5383_vm11, %v2759_v9, 0.0  ;;  %v3118_v40 = vmul.f32 %v5299_v38, %v6251_v15  ;;  %v1850_v4 = vmul.f32 %v4249_v21, %v6252_v19  ;;  %3586 = vmatpush1.bf16.msra.mxu0 %v3560_v60 }
 0x298   : > { %v1687_v24 = vmul.f32 %v4220_v13, %v5354_v22  ;;  %v2887_v25 = vadd.f32 %v2855_v49, %v2659_v32  ;;  %v2431_v20 = vadd.f32 %v2399_v51, %v2267_v26  ;;  %v2144_v58 = vmul.f32 %v4242_v18, %v5360_v28  ;;  %v6258_v22 = vld [vmem:[#allocation10_spill] sm:$0xff]  ;;  %v6259_v28 = vld [vmem:[#allocation17_spill] sm:$0xff]  ;;  %v6263_v49 = vld [vmem:[#allocation48_spill] sm:$0xff] }
 0x299   : > { %v3336_v50 = vadd.f32 %v6253_v52, %v3334_v59  ;;  %v1978_v10 = vadd.f32 %v1850_v4, %v1782_v63  ;;  %v1851_v12 = vmul.f32 %v4249_v21, %v6254_v5  ;;  %vm5758_vm10 = vcmp.le.s32.totalorder %v1302_v62, 14  ;;  %v6262_v59 = vld [vmem:[#allocation54_spill] sm:$0xff]  ;;  %v6265_v5 = vld [vmem:[#allocation13_spill] sm:$0xff] }
 0x29a   : > { %v2143_v9 = vmul.f32 %v4242_v18, %v6257_v53  ;;  %v2467_v32 = vmul.f32 %v4320_v16, %v6258_v22  ;;  %v2923_v2 = vmul.f32 %v4382_v33, %v6242_v55  ;;  %v2307_v26 = vmul.f32 %v4289_v45, %v6259_v28 }
 0x29b   : > { %v3338_v46 = vadd.f32 %v6260_v14, %v3336_v50  ;;  %v3351_v8 = vsel %vm3325_vm0, %v3306_v37, 0.0  ;;  %v3050_v6 = vadd.f32 %v2922_v34, %v6261_v42  ;;  %v3307_v51 = vmin.f32 %v3275_v36, 6.0 }
 0x29c   : > { %v1979_v62 = vadd.f32 %v1851_v12, %v1687_v24  ;;  %v3051_v7 = vadd.f32 %v2923_v2, %v2887_v25  ;;  %v2499_v63 = vadd.f32 %v2467_v32, %v2431_v20  ;;  %v2240_v39 = vsel %vm5758_vm10, %v2144_v58, 0.0  ;;  %v6266_v24 = vld [vmem:[#allocation56_spill] sm:$0xff]  ;;  %v6268_v32 = vld [vmem:[#allocation31_spill] sm:$0xff] }
 0x29d   : > { %v3340_v60 = vadd.f32 %v6262_v59, %v3338_v46  ;;  %v3277_v55 = vmax.f32 %v6263_v49, 0.0  ;;  %v3308_v15 = vmin.f32 %v3276_v11, 6.0  ;;  %v3214_v52 = vsel %vm4778_vm8, %v3118_v40, 0.0  ;;  %v6267_v40 = vld [vmem:[#allocation11_spill] sm:$0xff]  ;;  %v6272_v59 = vld [vmem:[#allocation32_spill] sm:$0xff] }
 0x29e   : > { %v2271_v50 = vadd.f32 %v2143_v9, %v1978_v10  ;;  %v2535_v37 = vmul.f32 %v4333_v27, %v6265_v5  ;;  %v3119_v34 = vmul.f32 %v5299_v38, %v6243_v30  ;;  %v2403_v36 = vsel %vm5727_vm6, %v2307_v26, 0.0  ;;  %v6269_v26 = vld [vmem:[#allocation30_spill] sm:$0xff]  ;;  %v6274_v5 = vld [vmem:[#allocation29_spill] sm:$0xff] }
 0x29f   : > { %v3342_v25 = vadd.f32 %v6266_v24, %v3340_v60  ;;  %v3246_v20 = vadd.f32 %v3214_v52, %v3050_v6  ;;  %v2763_v58 = vmul.f32 %v4360_v3, %v5280_v44  ;;  %v2272_v11 = vadd.f32 %v2240_v39, %v1979_v62  ;;  %v6270_v44 = vld [vmem:[#allocation15_spill] sm:$0xff]  ;;  %v6271_v62 = vld [vmem:[#allocation18_spill] sm:$0xff] }
 0x2a0   : > { %v1107_v12 = vadd.s32 240, %v4192_v57  ;;  %v2926_v10 = vmul.f32 %v4382_v33, %v6267_v40  ;;  %v3247_v9 = vadd.f32 %v3119_v34, %v3051_v7  ;;  %v2663_v22 = vadd.f32 %v2535_v37, %v2499_v63  ;;  %v6273_v7 = vld [vmem:[#allocation22_spill] sm:$0xff]  ;;  %v6275_v37 = vld [vmem:[#allocation8_spill] sm:$0xff] }
 0x2a1   : > { %v3344_v2 = vadd.f32 %v6268_v32, %v3342_v25  ;;  %v3309_v30 = vmin.f32 %v3277_v55, 6.0  ;;  %v3353_v28 = vsel %vm3325_vm0, %v3307_v51, 0.0  ;;  %v2308_v14 = vmul.f32 %v4289_v45, %v6269_v26  ;;  %v6276_v24 = vld [vmem:[#allocation26_spill] sm:$0xff]  ;;  %v6280_v32 = vld [vmem:[#allocation51_spill] sm:$0xff] }
 0x2a2   : > { %v2435_v46 = vadd.f32 %v2403_v36, %v2271_v50  ;;  %v3355_v42 = vsel %vm3325_vm0, %v3308_v15, 0.0  ;;  %v3054_v6 = vadd.f32 %v2926_v10, %v6270_v44  ;;  %v3122_v39 = vmul.f32 %v5299_v38, %v6271_v62 }
 0x2a3   : > { %v3346_v60 = vadd.f32 %v6272_v59, %v3344_v2  ;;  %v2471_v63 = vmul.f32 %v4320_v16, %v6273_v7  ;;  %v2859_v49 = vsel %vm5611_vm2, %v2763_v58, 0.0  ;;  %v2436_v51 = vadd.f32 %v2308_v14, %v2272_v11  ;;  %v6278_v58 = vld [vmem:[#allocation39_spill] sm:$0xff] }
 0x2a4   : > { %v1323_v55 = vand.u32 15, %v1107_v12  ;;  %v3278_v4 = vmax.f32 %v3246_v20, 0.0  ;;  %v3279_v52 = vmax.f32 %v3247_v9, 0.0  ;;  %v2891_v50 = vadd.f32 %v2859_v49, %v2663_v22  ;;  %v6279_v20 = vld [vmem:[#allocation58_spill] sm:$0xff] }
 0x2a5   : > { %v3348_v15 = vadd.f32 %v6274_v5, %v3346_v60  ;;  %v3280_v34 = vmax.f32 %v6275_v37, 0.0  ;;  %v2927_v36 = vmul.f32 %v4382_v33, %v6252_v19  ;;  %v2472_v25 = vmul.f32 %v4320_v16, %v6276_v24 }
 0x2a6   : > { %v2503_v40 = vadd.f32 %v2471_v63, %v2435_v46  ;;  %v3218_v35 = vsel %vm5105_vm9, %v3122_v39, 0.0  ;;  %v1690_v11 = vmul.f32 %v4220_v13, %v6278_v58  ;;  %v2540_v12 = vmul.f32 %v4333_v27, %v6279_v20  ;;  %v6283_v39 = vld [vmem:[#allocation20_spill] sm:$0xff] }
 0x2a7   : > { %v3350_v9 = vadd.f32 %v5719_v41, %v3348_v15  ;;  %v3250_v22 = vadd.f32 %v3218_v35, %v3054_v6  ;;  %v2539_v2 = vmul.f32 %v4333_v27, %v6280_v32  ;;  %vm5819_vm8 = vcmp.ge.s32.totalorder %v1323_v55, 1  ;;  %v6284_v55 = vld [vmem:[#allocation55_spill] sm:$0xff] }
 0x2a8   : > { %v2504_v26 = vadd.f32 %v2472_v25, %v2436_v51  ;;  %v3357_v14 = vsel %vm3325_vm0, %v3309_v30, 0.0  ;;  %v3055_v46 = vadd.f32 %v2927_v36, %v2891_v50  ;;  %v2767_v13 = vmul.f32 %v4360_v3, %v6278_v58 }
 0x2a9   : > { %v3352_v44 = vadd.f32 %v3351_v8, %v3350_v9  ;;  %v3310_v62 = vmin.f32 %v3278_v4, 6.0  ;;  %v3281_v59 = vmax.f32 %v6283_v39, 0.0  ;;  %v3311_v41 = vmin.f32 %v3279_v52, 6.0 }
 0x2aa   : > { %v2667_v6 = vadd.f32 %v2539_v2, %v2503_v40  ;;  %v3123_v60 = vmul.f32 %v5299_v38, %v6257_v53  ;;  %v1786_v7 = vsel %vm5819_vm8, %v1690_v11, 0.0  ;;  %v2636_v63 = vsel %vm5758_vm10, %v2540_v12, 0.0 }
 0x2ab   : > { %v3354_v30 = vadd.f32 %v3353_v28, %v3352_v44  ;;  %v3312_v49 = vmin.f32 %v3280_v34, 6.0  ;;  %v3282_v51 = vmax.f32 %v3250_v22, 0.0  ;;  %v1854_v8 = vmul.f32 %v4249_v21, %v6284_v55  ;;  %v6285_v28 = vld [vmem:[#allocation7_spill] sm:$0xff] }
 0x2ac   : > { %v2668_v4 = vadd.f32 %v2636_v63, %v2504_v26  ;;  %v2930_v52 = vmul.f32 %v4382_v33, %v6276_v24  ;;  %v3251_v50 = vadd.f32 %v3123_v60, %v3055_v46  ;;  %v2863_v53 = vsel %vm5727_vm6, %v2767_v13, 0.0  ;;  %v6288_v46 = vld [vmem:[#allocation53_spill] sm:$0xff] }
 0x2ad   : > { %v3356_v5 = vadd.f32 %v3355_v42, %v3354_v30  ;;  %v1982_v15 = vadd.f32 %v1854_v8, %v1786_v7  ;;  %v2895_v37 = vadd.f32 %v2863_v53, %v2667_v6  ;;  %v2147_v36 = vmul.f32 %v4242_v18, %v5609_v23  ;;  %v6286_v42 = vld [vmem:[#allocation52_spill] sm:$0xff] }
 0x2ae   : > { %v2768_v34 = vmul.f32 %v4360_v3, %v6285_v28  ;;  %v3359_v25 = vsel %vm3325_vm0, %v3310_v62, 0.0  ;;  %v3126_v21 = vmul.f32 %v5299_v38, %v6279_v20  ;;  %v2311_v24 = vmul.f32 %v4289_v45, %v5646_v17 }
 0x2af   : > { %v3358_v40 = vadd.f32 %v3357_v14, %v3356_v5  ;;  %v3361_v29 = vsel %vm3325_vm0, %v3311_v41, 0.0  ;;  %v3058_v10 = vadd.f32 %v2930_v52, %v6286_v42  ;;  %v2931_v35 = vmul.f32 %v4382_v33, %v6284_v55 }
 0x2b0   : > { %v2896_v18 = vadd.f32 %v2768_v34, %v2668_v4  ;;  %v3313_v58 = vmin.f32 %v3281_v59, 6.0  ;;  %v3363_v3 = vsel %vm3325_vm0, %v3312_v49, 0.0  ;;  %v3314_v11 = vmin.f32 %v3282_v51, 6.0 }
 0x2b1   : > { %v3360_v12 = vadd.f32 %v3359_v25, %v3358_v40  ;;  %v3283_v9 = vmax.f32 %v3251_v50, 0.0  ;;  %v3059_v22 = vadd.f32 %v2931_v35, %v2895_v37  ;;  %v2275_v20 = vadd.f32 %v2147_v36, %v1982_v15 }
 0x2b2   : > { %v2932_v45 = vmul.f32 %v4382_v33, %v5577_v54  ;;  %v3222_v32 = vsel %vm5337_vm12, %v3126_v21, 0.0  ;;  %v2407_v2 = vsel %vm5819_vm8, %v2311_v24, 0.0  ;;  %v3128_v26 = vmul.f32 %v5299_v38, %v5605_v1  ;;  %v6289_v54 = vld [vmem:[#allocation57_spill] sm:$0xff] }
 0x2b3   : > { %v3362_v14 = vadd.f32 %v3361_v29, %v3360_v12  ;;  %v3284_v13 = vmax.f32 %v6288_v46, 0.0  ;;  %v3254_v44 = vadd.f32 %v3222_v32, %v3058_v10  ;;  %v3127_v39 = vmul.f32 %v5299_v38, %v5609_v23 }
 0x2b4   : > { %v3060_v62 = vadd.f32 %v2932_v45, %v2896_v18  ;;  %v3365_v59 = vsel %vm3325_vm0, %v3313_v58, 0.0  ;;  %v3285_v41 = vmax.f32 %v6289_v54, 0.0  ;;  %v3315_v6 = vmin.f32 %v3283_v9, 6.0 }
 0x2b5   : > { %v3364_v33 = vadd.f32 %v3363_v3, %v3362_v14  ;;  %v2439_v60 = vadd.f32 %v2407_v2, %v2275_v20  ;;  %v3255_v19 = vadd.f32 %v3127_v39, %v3059_v22  ;;  %v3367_v7 = vsel %vm3325_vm0, %v3314_v11, 0.0 }
 0x2b6   : > { %v3224_v1 = vsel %vm5758_vm10, %v3128_v26, 0.0  ;;  %v3316_v30 = vmin.f32 %v3284_v13, 6.0  ;;  %v2475_v49 = vmul.f32 %v4320_v16, %v5539_v61  ;;  %v3286_v51 = vmax.f32 %v3254_v44, 0.0 }
 0x2b7   : > { %v3366_v63 = vadd.f32 %v3365_v59, %v3364_v33  ;;  %v3256_v38 = vadd.f32 %v3224_v1, %v3060_v62  ;;  %v3317_v55 = vmin.f32 %v3285_v41, 6.0  ;;  %v3369_v8 = vsel %vm3325_vm0, %v3315_v6, 0.0  ;;  %v6290_v33 = vld [vmem:[#allocation2_spill] sm:$0xff] }
 0x2b8   : > { %v2507_v4 = vadd.f32 %v2475_v49, %v2439_v60  ;;  %v3287_v52 = vmax.f32 %v3255_v19, 0.0  ;;  %v3371_v53 = vsel %vm3325_vm0, %v3316_v30, 0.0  ;;  %v3318_v5 = vmin.f32 %v3286_v51, 6.0 }
 0x2b9   : > { %v3368_v23 = vadd.f32 %v3367_v7, %v3366_v63  ;;  %v2543_v48 = vmul.f32 %v4333_v27, %v5659_v56  ;;  %v3288_v15 = vmax.f32 %v3256_v38, 0.0  ;;  %v3289_v16 = vmax.f32 %v5700_v0, 0.0 }
 0x2ba   : > { %v3319_v61 = vmin.f32 %v3287_v52, 6.0  ;;  %v3373_v28 = vsel %vm3325_vm0, %v3317_v55, 0.0  ;;  %v3375_v25 = vsel %vm3325_vm0, %v3318_v5, 0.0  ;;  %v3290_v21 = vmax.f32 %v5692_v47, 0.0  ;;  %v3524_v52 = vld [vmem:[%s5926_s9] sm:$0xf] }
 0x2bb   : > { %v3370_v50 = vadd.f32 %v3369_v8, %v3368_v23  ;;  %v2671_v36 = vadd.f32 %v2543_v48, %v2507_v4  ;;  %v3320_v24 = vmin.f32 %v3288_v15, 6.0  ;;  %v3321_v42 = vmin.f32 %v3289_v16, 6.0 }
 0x2bc   : > { %v3377_v10 = vsel %vm3325_vm0, %v3319_v61, 0.0  ;;  %v3292_v56 = vmax.f32 %v5675_v43, 0.0  ;;  %v3322_v35 = vmin.f32 %v3290_v21, 6.0  ;;  %v3805_v13 = vcombine.low %v5715_v31, %v5715_v31  ;;  %v3470_v31 = vld [vmem:[%s5924_s7] sm:$0x1] }
 0x2bd   : > { %v3372_v37 = vadd.f32 %v3371_v53, %v3370_v50  ;;  %v3291_v29 = vmax.f32 %v2671_v36, 0.0  ;;  %v3379_v0 = vsel %vm3325_vm0, %v3320_v24, 0.0  ;;  %v3381_v3 = vsel %vm3325_vm0, %v3321_v42, 0.0 }
 0x2be   : > { %v3324_v12 = vmin.f32 %v3292_v56, 6.0  ;;  %v3383_v47 = vsel %vm3325_vm0, %v3322_v35, 0.0  ;;  %v3566_v39 = vsel %vm847_vm3, %v3805_v13, 0  ;;  %v3977_v59 = vmov 0  }
 0x2bf   : > { %v3374_v34 = vadd.f32 %v3373_v28, %v3372_v37  ;;  %v3323_v58 = vmin.f32 %v3291_v29, 6.0  ;;  %3603 = vmatprep.mubr.bf16.mxu0 %v3977_v59  ;;  %v3460_v54 = vrot.slane %v6290_v33, 4  ;;  %v3978_v8 = vmov 1966171168  }
 0x2c0   : > { %v3387_v45 = vsel %vm3325_vm0, %v3324_v12, 0.0  ;;  %v3660_v4 = vunpack.c.l.s4 %v3978_v8  ;;  %v6291_v53 = vsub.s32 0, %v4192_v57  ;;  %v6292_v48 = vsub.s32 2, %v4192_v57 }
 0x2c1   : > { %v3376_v40 = vadd.f32 %v3375_v25, %v3374_v34  ;;  %v3385_v22 = vsel %vm3325_vm0, %v3323_v58, 0.0  ;;  %v3461_v41 = vadd.f32 %v3460_v54, %v6290_v33  ;;  %v6293_v37 = vsub.s32 1, %v4192_v57 }
 0x2c2   : > { %v3661_v50 = vunpack.c.0.s8 %v3660_v4  ;;  %v3539_v5 = vrot.slane %v3524_v52, %v6291_v53  ;;  %v3547_v15 = vrot.slane %v3524_v52, %v6292_v48  ;;  %v6294_v16 = vsub.s32 3, %v4192_v57 }
 0x2c3   : > { %v3378_v27 = vadd.f32 %v3377_v10, %v3376_v40  ;;  %v3462_v6 = vrot.slane %v3461_v41, 2  ;;  %v3543_v36 = vrot.slane %v3524_v52, %v6293_v37 }
 0x2c4   : > { %v3551_v61 = vrot.slane %v3524_v52, %v6294_v16  ;;  %v3664_v21 = vsub.s32 %v3661_v50, %v4192_v57  ;;  %v6295_v57 = vlaneseq }
 0x2c5   : > { %v3380_v18 = vadd.f32 %v3379_v0, %v3378_v27  ;;  %v3463_v60 = vadd.f32 %v3462_v6, %v3461_v41 }
 0x2c6   : > { %vm3684_vm3 = vcmp.lt.s32.totalorder %v6295_v57, 512 }
 0x2c7   : > { %v3382_v11 = vadd.f32 %v3381_v3, %v3380_v18  ;;  %v3464_v19 = vrot.slane %v3463_v60, 1 }
 0x2c9   : > { %v3384_v9 = vadd.f32 %v3383_v47, %v3382_v11  ;;  %v3465_v7 = vadd.f32 %v3464_v19, %v3463_v60 }
 0x2cb   : > { %v3386_v20 = vadd.f32 %v3385_v22, %v3384_v9  ;;  %v3466_v63 = vmul.f32 0.00390625, %v3465_v7 }
 0x2cd   : > { %v3388_v17 = vadd.f32 %v3387_v45, %v3386_v20 }
 0x2cf   : > { %v3389_v32 = vrot.slane %v3388_v17, 4 }
 0x2d1   : > { %v3390_v43 = vadd.f32 %v3389_v32, %v3388_v17 }
 0x2d3   : > { %v3391_v2 = vrot.slane %v3390_v43, 2 }
 0x2d5   : > { %v3392_v26 = vadd.f32 %v3391_v2, %v3390_v43 }
 0x2d7   : > { %v3393_v14 = vrot.slane %v3392_v26, 1 }
 0x2d9   : > { %v3394_v46 = vadd.f32 %v3393_v14, %v3392_v26 }
 0x2db   : > { %v3396_v44 = vmul.f32 0.00390625, %v3394_v46 }
 0x2dd   : > { %v3467_v62 = vpack.c.bf16 %v3396_v44, %v3396_v44 }
 0x2df   : > { %3924 = vmatmul.mubr.msk.bf16.vlgmr.msra.gmra.mxu1 %vm3325_vm0, %v3467_v62 }
 0x2e0   : > { %3627 = vmatpush1.bf16.msra.mxu1 %v3566_v39  ;;  %3644 = vmatprep.mubr.bf16.mxu1 %v3977_v59 }
 0x39f   : > { %v3514_v1 = vpop.f32.mrf.mxu1 }
 0x3a0   : > { %v3515_v30 = vadd.f32 %v3514_v1, %v3470_v31 }
 0x3a1   : > { %v3925_v49 = vpop.f32.mrf.mxu1 }
 0x3a2   : > { %v3520_v51 = vadd.f32 %v3515_v30, %v3466_v63 }
 0x3a3   : > { %v3517_v38 = vpop.f32.mrf.mxu1 }
 0x3a4   : > { %v3521_v23 = vpack.c.bf16 %v3520_v51, %v3520_v51 }
 0x3a5   : > { %v3926_v55 = vpop.f32.mrf.mxu1 }
 0x3a6   : > { %3808 = vmatmul.mubr.msk.bf16.vlgmr.msra.gmra.mxu0 %vm798_vm4, %v3521_v23  ;;  %3810 = vmatmul.mubr.msk.bf16.vlgmr.msra.gmra.mxu1 %vm798_vm4, %v3521_v23 }
 0x466   : > { %v3605_v28 = vpop.f32.mrf.mxu0  ;;  %v3646_v34 = vpop.f32.mrf.mxu1 }
 0x467   : > { %v3606_v40 = vadd.f32 %v3605_v28, %v3539_v5  ;;  %v3647_v29 = vadd.f32 %v3646_v34, %v3547_v15 }
 0x468   : > { %v3607_v25 = vpop.f32.mrf.mxu0  ;;  %v3648_v24 = vpop.f32.mrf.mxu1 }
 0x469   : > { %v3608_v42 = vadd.f32 %v3607_v25, %v3543_v36  ;;  %v3649_v10 = vadd.f32 %v3648_v24, %v3551_v61 }
 0x46a   : > { %v3609_v27 = vpop.f32.mrf.mxu0  ;;  %v3650_v56 = vpop.f32.mrf.mxu1 }
 0x46b   : > { %v3657_v35 = vcombine.low %v3606_v40, %v3608_v42  ;;  %v3658_v0 = vcombine.low %v3647_v29, %v3649_v10 }
 0x46c   : > { %v3610_v18 = vpop.f32.mrf.mxu0  ;;  %v3651_v58 = vpop.f32.mrf.mxu1 }
 0x46d   : > { %v3665_v3 = vrot.slane %v3657_v35, %v3664_v21  ;;  %v3672_v11 = vrot.slane %v3658_v0, %v3664_v21 }
 0x46f   : > { %v3673_v12 = vcombine.low %v3665_v3, %v3672_v11 }
 0x471   : > { %v3680_v47 = vrot.slane %v3673_v12, %v3664_v21 }
 0x473   : > { %3686 = vst.msk [vmem:[%s357_s12] sm:$0xf] %vm3684_vm3, %v3680_v47 }
 0x474 PF: > { %s20_s13 = sadd.s32 1, %s3972_s13  }
 0x475   : > { %p17_p4 = scmp.ge.s32.totalorder %s20_s13, 4  }
 0x477   :  { %19 = sbr.rel (!%p17_p4) target bundleno = 1 (0x1), region = 90 }

</bundles_post_ra>
